<compile_context>
chip_gen: v7x
topology: tpu7x:2x2x1
jax: 0.10.0
libtpu: 0.0.40
codegen_flags: <defaults>
</compile_context>

<pallas_src>
import jax
import jax.numpy as jnp
from jax import lax
from jax.experimental import pallas as pl
from jax.experimental.pallas import tpu as pltpu

_BN_EPS = 1e-5


def _round_up(n, m):
    return ((n + m - 1) // m) * m


def _full_spec(shape):
    # Whole-array block (allowed even when not (8,128)-aligned because the
    # block equals the full array dims).
    n = len(shape)
    return pl.BlockSpec(shape, lambda i, _n=n: (0,) * _n)


# ----------------------------- fused forward kernel ---------------------------
def _make_fused_kernel(*, num_layers, T, B, B_pad, H_pad):
    """Builds the fused LSTM-stack + head kernel for fixed static shapes."""

    def kernel(*refs):
        x_ref = refs[0]                                       # (T*B_pad, D_in)
        lstm_refs = [(refs[1 + 3 * l], refs[2 + 3 * l], refs[3 + 3 * l])
                     for l in range(num_layers)]
        base = 1 + 3 * num_layers
        (bn0_g, bn0_b, w1_ref, b1_ref,
         bn1_g, bn1_b, w2_ref, b2_ref) = refs[base:base + 8]
        out_ref, hn_ref, cn_ref = refs[base + 8:base + 11]
        hbuf = refs[base + 11]                                # (T*B_pad, H_pad)
        gbuf = refs[base + 12]                                # (T*B_pad, 4*H_pad)

        h_fin = None
        for l in range(num_layers):
            wih_ref, whh_ref, b_ref = lstm_refs[l]

            # Hoisted input projection: one dense MXU call for the whole
            # sequence, bias folded in.  bf16 operands, f32 accumulation.
            xin = x_ref[...] if l == 0 else hbuf[...]
            gbuf[...] = (jnp.dot(xin.astype(jnp.bfloat16), wih_ref[...],
                                 preferred_element_type=jnp.float32)
                         + b_ref[...])
            whh = whh_ref[...]                                # hoisted, bf16
            write_seq = (l + 1 < num_layers)                  # last layer: skip

            def step(t, carry, whh=whh, write_seq=write_seq):
                h, c = carry
                r0 = pl.multiple_of(t * B_pad, B_pad)
                gates = (gbuf[pl.ds(r0, B_pad), :]
                         + jnp.dot(h.astype(jnp.bfloat16), whh,
                                   preferred_element_type=jnp.float32))
                # H_pad is a multiple of 128 -> lane-tile-aligned gate slices.
                i = jax.nn.sigmoid(gates[:, 0:H_pad])
                f = jax.nn.sigmoid(gates[:, H_pad:2 * H_pad])
                g = jnp.tanh(gates[:, 2 * H_pad:3 * H_pad])
                o = jax.nn.sigmoid(gates[:, 3 * H_pad:4 * H_pad])
                c_new = f * c + i * g
                h_new = o * jnp.tanh(c_new)
                if write_seq:
                    hbuf[pl.ds(r0, B_pad), :] = h_new
                return (h_new, c_new)

            zeros = jnp.zeros((B_pad, H_pad), jnp.float32)
            h_fin, c_fin = lax.fori_loop(0, T, step, (zeros, zeros),
                                         unroll=True)
            hn_ref[l] = h_fin
            cn_ref[l] = c_fin

        # ---- head: fc = BN -> Linear -> ReLU ; fc1 = BN -> Linear ----------
        # BatchNorm1d in training mode (biased batch stats) over the REAL
        # batch rows only (padded rows masked out of the statistics).
        row_mask = lax.broadcasted_iota(jnp.int32, (B_pad, 1), 0) < B
        inv_b = jnp.float32(1.0 / B)

        def bn(xv, g_r, b_r):
            xm = jnp.where(row_mask, xv, 0.0)
            mu = jnp.sum(xm, axis=0, keepdims=True) * inv_b
            d = jnp.where(row_mask, xv - mu, 0.0)
            var = jnp.sum(d * d, axis=0, keepdims=True) * inv_b
            return (xv - mu) * lax.rsqrt(var + _BN_EPS) * g_r[...] + b_r[...]

        y = bn(h_fin, bn0_g, bn0_b)                           # out[:, -1, :]
        y = jnp.dot(y, w1_ref[...],
                    preferred_element_type=jnp.float32) + b1_ref[...]
        y = jnp.maximum(y, 0.0)
        y = bn(y, bn1_g, bn1_b)
        out_ref[...] = (jnp.dot(y, w2_ref[...],
                                preferred_element_type=jnp.float32)
                        + b2_ref[...])

    return kernel


# --------------------------------- forward ------------------------------------
def lstm_forward(params, x, *, hidden_dim, num_layers, output_dim):
    """Forward pass of the PyTorch `LSTM` module.

    x: (B, T, input_dim) float32, batch_first.
    Returns (out, (hn, cn)) with out (B, output_dim), hn/cn (num_layers, B, H).
    """
    B, T, D_in = x.shape
    H = hidden_dim
    H_pad = _round_up(H, 128)       # lane-tile padding
    B_pad = _round_up(B, 8)         # f32 sublane-tile padding

    # batch_first -> time-major, pad batch, flatten (T, B_pad) -> rows so the
    # kernel never reshapes and every per-step slice is sublane-aligned.
    x_t = jnp.transpose(x, (1, 0, 2))
    if B_pad != B:
        x_t = jnp.pad(x_t, ((0, 0), (0, B_pad - B), (0, 0)))
    x_flat = x_t.reshape(T * B_pad, D_in).astype(jnp.float32)

    args = [x_flat]
    for l in range(num_layers):
        args += [params[f'lstm{l}_wih'], params[f'lstm{l}_whh'],
                 params[f'lstm{l}_b']]
    args += [params['bn0_g'], params['bn0_b'],
             params['fc_w1'], params['fc_b1'],
             params['bn1_g'], params['bn1_b'],
             params['fc1_w'], params['fc1_b']]

    kernel = _make_fused_kernel(num_layers=num_layers, T=T, B=B,
                                B_pad=B_pad, H_pad=H_pad)

    out_p, hn_p, cn_p = pl.pallas_call(
        kernel,
        out_shape=(
            jax.ShapeDtypeStruct((B_pad, output_dim), jnp.float32),
            jax.ShapeDtypeStruct((num_layers, B_pad, H_pad), jnp.float32),
            jax.ShapeDtypeStruct((num_layers, B_pad, H_pad), jnp.float32)),
        grid=(1,),
        in_specs=[_full_spec(a.shape) for a in args],
        out_specs=(
            _full_spec((B_pad, output_dim)),
            _full_spec((num_layers, B_pad, H_pad)),
            _full_spec((num_layers, B_pad, H_pad))),
        scratch_shapes=[
            pltpu.VMEM((T * B_pad, H_pad), jnp.float32),        # inter-layer h
            pltpu.VMEM((T * B_pad, 4 * H_pad), jnp.float32)],   # hoisted x@Wih
        compiler_params=pltpu.CompilerParams(
            dimension_semantics=("arbitrary",)),
    )(*args)

    out = out_p[:B]
    hn = hn_p[:, :B, :H]
    cn = cn_p[:, :B, :H]
    return out, (hn, cn)


# --------------------------------- parameters ---------------------------------
def init_params(key, input_dim, hidden_dim, num_layers, output_dim):
    """PyTorch-default-style init; stored pre-transposed, gate-padded, and
    (for MXU operands) cast to bfloat16."""
    H = hidden_dim
    H4 = H // 4
    H_pad = _round_up(H, 128)
    params = {}
    keys = iter(jax.random.split(key, 4 * num_layers + 4))

    def unif(k, shape, fan_in):
        bound = 1.0 / jnp.sqrt(jnp.float32(fan_in))
        return jax.random.uniform(k, shape, jnp.float32, -bound, bound)

    def pad_gate_cols(w_t):            # (d, 4H) -> (d, 4*H_pad), per-gate pad
        d = w_t.shape[0]
        w = w_t.reshape(d, 4, H)
        w = jnp.pad(w, ((0, 0), (0, 0), (0, H_pad - H)))
        return w.reshape(d, 4 * H_pad)

    for l in range(num_layers):
        d_in = input_dim if l == 0 else H
        w_ih = unif(next(keys), (4 * H, d_in), H)
        w_hh = unif(next(keys), (4 * H, H), H)
        b_ih = unif(next(keys), (4 * H,), H)
        b_hh = unif(next(keys), (4 * H,), H)
        wih_t = pad_gate_cols(w_ih.T)                          # (d_in, 4*H_pad)
        if l > 0:
            wih_t = jnp.pad(wih_t, ((0, H_pad - H), (0, 0)))   # (H_pad, 4*H_pad)
        whh_t = jnp.pad(pad_gate_cols(w_hh.T), ((0, H_pad - H), (0, 0)))
        params[f'lstm{l}_wih'] = wih_t.astype(jnp.bfloat16)
        params[f'lstm{l}_whh'] = whh_t.astype(jnp.bfloat16)
        params[f'lstm{l}_b'] = pad_gate_cols((b_ih + b_hh).reshape(1, 4 * H))

    # fc = BatchNorm1d(H) -> Linear(H, H//4) -> ReLU
    params['bn0_g'] = jnp.ones((1, H_pad), jnp.float32)
    params['bn0_b'] = jnp.zeros((1, H_pad), jnp.float32)
    w1 = unif(next(keys), (H4, H), H)
    params['fc_w1'] = jnp.pad(w1.T, ((0, H_pad - H), (0, 0)))  # (H_pad, H4)
    params['fc_b1'] = unif(next(keys), (1, H4), H)
    # fc1 = BatchNorm1d(H//4) -> Linear(H//4, output_dim)
    params['bn1_g'] = jnp.ones((1, H4), jnp.float32)
    params['bn1_b'] = jnp.zeros((1, H4), jnp.float32)
    w2 = unif(next(keys), (output_dim, H4), H4)
    params['fc1_w'] = w2.T                                     # (H4, output_dim)
    params['fc1_b'] = unif(next(keys), (1, output_dim), H4)
    return params


if __name__ == "__main__":
    B, T, D_IN, H, L, OUT = 2, 8, 4, 32, 2, 1
    key = jax.random.PRNGKey(0)
    kx, kp = jax.random.split(key)
    x = jax.random.normal(kx, (B, T, D_IN), jnp.float32)
    params = init_params(kp, D_IN, H, L, OUT)

    out, (hn, cn) = lstm_forward(params, x, hidden_dim=H,
                                 num_layers=L, output_dim=OUT)
    jax.block_until_ready((out, hn, cn))

    assert out.shape == (B, OUT)
    assert hn.shape == (L, B, H) and cn.shape == (L, B, H)
    assert bool(jnp.all(jnp.isfinite(out)))
    assert bool(jnp.all(jnp.isfinite(hn))) and bool(jnp.all(jnp.isfinite(cn)))
    print("KERNEL_OK")
</pallas_src>

<mosaic_0001>
module attributes {stable_mosaic.version = 11 : i64} {
  func.func @kernel(%arg0: i32, %arg1: memref<64x4xf32, #tpu.memory_space<vmem>>, %arg2: memref<4x512xbf16, #tpu.memory_space<vmem>>, %arg3: memref<128x512xbf16, #tpu.memory_space<vmem>>, %arg4: memref<1x512xf32, #tpu.memory_space<vmem>>, %arg5: memref<128x512xbf16, #tpu.memory_space<vmem>>, %arg6: memref<128x512xbf16, #tpu.memory_space<vmem>>, %arg7: memref<1x512xf32, #tpu.memory_space<vmem>>, %arg8: memref<1x128xf32, #tpu.memory_space<vmem>>, %arg9: memref<1x128xf32, #tpu.memory_space<vmem>>, %arg10: memref<128x8xf32, #tpu.memory_space<vmem>>, %arg11: memref<1x8xf32, #tpu.memory_space<vmem>>, %arg12: memref<1x8xf32, #tpu.memory_space<vmem>>, %arg13: memref<1x8xf32, #tpu.memory_space<vmem>>, %arg14: memref<8x1xf32, #tpu.memory_space<vmem>>, %arg15: memref<1x1xf32, #tpu.memory_space<vmem>>, %arg16: memref<8x1xf32, #tpu.memory_space<vmem>>, %arg17: memref<2x8x128xf32, #tpu.memory_space<vmem>>, %arg18: memref<2x8x128xf32, #tpu.memory_space<vmem>>, %arg19: memref<64x128xf32, #tpu.memory_space<vmem>>, %arg20: memref<64x512xf32, #tpu.memory_space<vmem>>) attributes {dimension_semantics = [#tpu.dimension_semantics<arbitrary>], iteration_bounds = array<i64: 1>, scalar_prefetch = 0 : i64, scratch_operands = 2 : i64, tpu.core_type = #tpu.core_type<tc>, window_params = [{pipeline_mode = #tpu.pipeline_mode<synchronous>, transform_indices = @transform_0, window_bounds = array<i64: 64, 4>}, {pipeline_mode = #tpu.pipeline_mode<synchronous>, transform_indices = @transform_1, window_bounds = array<i64: 4, 512>}, {pipeline_mode = #tpu.pipeline_mode<synchronous>, transform_indices = @transform_2, window_bounds = array<i64: 128, 512>}, {pipeline_mode = #tpu.pipeline_mode<synchronous>, transform_indices = @transform_3, window_bounds = array<i64: 1, 512>}, {pipeline_mode = #tpu.pipeline_mode<synchronous>, transform_indices = @transform_4, window_bounds = array<i64: 128, 512>}, {pipeline_mode = #tpu.pipeline_mode<synchronous>, transform_indices = @transform_5, window_bounds = array<i64: 128, 512>}, {pipeline_mode = #tpu.pipeline_mode<synchronous>, transform_indices = @transform_6, window_bounds = array<i64: 1, 512>}, {pipeline_mode = #tpu.pipeline_mode<synchronous>, transform_indices = @transform_7, window_bounds = array<i64: 1, 128>}, {pipeline_mode = #tpu.pipeline_mode<synchronous>, transform_indices = @transform_8, window_bounds = array<i64: 1, 128>}, {pipeline_mode = #tpu.pipeline_mode<synchronous>, transform_indices = @transform_9, window_bounds = array<i64: 128, 8>}, {pipeline_mode = #tpu.pipeline_mode<synchronous>, transform_indices = @transform_10, window_bounds = array<i64: 1, 8>}, {pipeline_mode = #tpu.pipeline_mode<synchronous>, transform_indices = @transform_11, window_bounds = array<i64: 1, 8>}, {pipeline_mode = #tpu.pipeline_mode<synchronous>, transform_indices = @transform_12, window_bounds = array<i64: 1, 8>}, {pipeline_mode = #tpu.pipeline_mode<synchronous>, transform_indices = @transform_13, window_bounds = array<i64: 8, 1>}, {pipeline_mode = #tpu.pipeline_mode<synchronous>, transform_indices = @transform_14, window_bounds = array<i64: 1, 1>}, {pipeline_mode = #tpu.pipeline_mode<synchronous>, transform_indices = @transform_15, window_bounds = array<i64: 8, 1>}, {pipeline_mode = #tpu.pipeline_mode<synchronous>, transform_indices = @transform_16, window_bounds = array<i64: 2, 8, 128>}, {pipeline_mode = #tpu.pipeline_mode<synchronous>, transform_indices = @transform_17, window_bounds = array<i64: 2, 8, 128>}]} {
    %c0 = arith.constant 0 : index
    %c0_0 = arith.constant 0 : index
    %0 = vector.load %arg1[%c0, %c0_0] : memref<64x4xf32, #tpu.memory_space<vmem>>, vector<64x4xf32>
    %1 = arith.truncf %0 : vector<64x4xf32> to vector<64x4xbf16>
    %c0_1 = arith.constant 0 : index
    %c0_2 = arith.constant 0 : index
    %2 = vector.load %arg2[%c0_1, %c0_2] : memref<4x512xbf16, #tpu.memory_space<vmem>>, vector<4x512xbf16>
    %cst = arith.constant dense<0.000000e+00> : vector<64x512xf32>
    %3 = tpu.matmul %1, %2, %cst {dimension_numbers = #tpu.dot_dimension_numbers<[1], [0], [0], [1], [0, 0, 1, 1], [], []>} : vector<64x4xbf16>, vector<4x512xbf16>, vector<64x512xf32> -> vector<64x512xf32>
    %c0_3 = arith.constant 0 : index
    %c0_4 = arith.constant 0 : index
    %4 = vector.load %arg4[%c0_3, %c0_4] : memref<1x512xf32, #tpu.memory_space<vmem>>, vector<1x512xf32>
    %5 = vector.broadcast %4 : vector<1x512xf32> to vector<64x512xf32>
    %6 = arith.addf %3, %5 : vector<64x512xf32>
    %c0_5 = arith.constant 0 : index
    %c0_6 = arith.constant 0 : index
    %7 = vector.load %arg20[%c0_5, %c0_6] : memref<64x512xf32, #tpu.memory_space<vmem>>, vector<64x512xf32>
    tpu.vector_store %arg20[%c0_5, %c0_6], %6 {strides = array<i32>} : memref<64x512xf32, #tpu.memory_space<vmem>>, vector<64x512xf32>,
    %c0_7 = arith.constant 0 : index
    %c0_8 = arith.constant 0 : index
    %8 = vector.load %arg3[%c0_7, %c0_8] : memref<128x512xbf16, #tpu.memory_space<vmem>>, vector<128x512xbf16>
    %cst_9 = arith.constant 0.000000e+00 : f32
    %9 = vector.broadcast %cst_9 : f32 to vector<8x128xf32>
    %c0_i32 = arith.constant 0 : i32
    %c8_i32 = arith.constant 8 : i32
    %10 = arith.muli %c0_i32, %c8_i32 : i32
    %11 = tpu.assume_multiple %10, 8 : i32
    %12 = arith.index_cast %11 : i32 to index
    %c0_10 = arith.constant 0 : index
    %13 = vector.load %arg20[%12, %c0_10] : memref<64x512xf32, #tpu.memory_space<vmem>>, vector<8x512xf32>
    %14 = arith.truncf %9 : vector<8x128xf32> to vector<8x128xbf16>
    %cst_11 = arith.constant dense<0.000000e+00> : vector<8x512xf32>
    %15 = tpu.matmul %14, %8, %cst_11 {dimension_numbers = #tpu.dot_dimension_numbers<[1], [0], [0], [1], [0, 0, 1, 1], [], []>} : vector<8x128xbf16>, vector<128x512xbf16>, vector<8x512xf32> -> vector<8x512xf32>
    %16 = arith.addf %13, %15 : vector<8x512xf32>
    %17 = vector.extract_strided_slice %16 {offsets = [0, 0], sizes = [8, 128], strides = [1, 1]} : vector<8x512xf32> to vector<8x128xf32>
    %18 = arith.negf %17 : vector<8x128xf32>
    %19 = math.exp %18 : vector<8x128xf32>
    %cst_12 = arith.constant 1.000000e+00 : f32
    %20 = vector.broadcast %cst_12 : f32 to vector<8x128xf32>
    %21 = arith.addf %20, %19 : vector<8x128xf32>
    %22 = arith.divf %20, %21 : vector<8x128xf32>
    %23 = vector.extract_strided_slice %16 {offsets = [0, 128], sizes = [8, 128], strides = [1, 1]} : vector<8x512xf32> to vector<8x128xf32>
    %24 = arith.negf %23 : vector<8x128xf32>
    %25 = math.exp %24 : vector<8x128xf32>
    %cst_13 = arith.constant 1.000000e+00 : f32
    %26 = vector.broadcast %cst_13 : f32 to vector<8x128xf32>
    %27 = arith.addf %26, %25 : vector<8x128xf32>
    %28 = arith.divf %26, %27 : vector<8x128xf32>
    %29 = vector.extract_strided_slice %16 {offsets = [0, 256], sizes = [8, 128], strides = [1, 1]} : vector<8x512xf32> to vector<8x128xf32>
    %30 = math.tanh %29 : vector<8x128xf32>
    %31 = vector.extract_strided_slice %16 {offsets = [0, 384], sizes = [8, 128], strides = [1, 1]} : vector<8x512xf32> to vector<8x128xf32>
    %32 = arith.negf %31 : vector<8x128xf32>
    %33 = math.exp %32 : vector<8x128xf32>
    %cst_14 = arith.constant 1.000000e+00 : f32
    %34 = vector.broadcast %cst_14 : f32 to vector<8x128xf32>
    %35 = arith.addf %34, %33 : vector<8x128xf32>
    %36 = arith.divf %34, %35 : vector<8x128xf32>
    %37 = arith.mulf %28, %9 : vector<8x128xf32>
    %38 = arith.mulf %22, %30 : vector<8x128xf32>
    %39 = arith.addf %37, %38 : vector<8x128xf32>
    %40 = math.tanh %39 : vector<8x128xf32>
    %41 = arith.mulf %36, %40 : vector<8x128xf32>
    %42 = arith.index_cast %11 : i32 to index
    %c0_15 = arith.constant 0 : index
    %43 = vector.load %arg19[%42, %c0_15] : memref<64x128xf32, #tpu.memory_space<vmem>>, vector<8x128xf32>
    tpu.vector_store %arg19[%42, %c0_15], %41 {strides = array<i32>} : memref<64x128xf32, #tpu.memory_space<vmem>>, vector<8x128xf32>,
    %c1_i32 = arith.constant 1 : i32
    %c8_i32_16 = arith.constant 8 : i32
    %44 = arith.muli %c1_i32, %c8_i32_16 : i32
    %45 = tpu.assume_multiple %44, 8 : i32
    %46 = arith.index_cast %45 : i32 to index
    %c0_17 = arith.constant 0 : index
    %47 = vector.load %arg20[%46, %c0_17] : memref<64x512xf32, #tpu.memory_space<vmem>>, vector<8x512xf32>
    %48 = arith.truncf %41 : vector<8x128xf32> to vector<8x128xbf16>
    %cst_18 = arith.constant dense<0.000000e+00> : vector<8x512xf32>
    %49 = tpu.matmul %48, %8, %cst_18 {dimension_numbers = #tpu.dot_dimension_numbers<[1], [0], [0], [1], [0, 0, 1, 1], [], []>} : vector<8x128xbf16>, vector<128x512xbf16>, vector<8x512xf32> -> vector<8x512xf32>
    %50 = arith.addf %47, %49 : vector<8x512xf32>
    %51 = vector.extract_strided_slice %50 {offsets = [0, 0], sizes = [8, 128], strides = [1, 1]} : vector<8x512xf32> to vector<8x128xf32>
    %52 = arith.negf %51 : vector<8x128xf32>
    %53 = math.exp %52 : vector<8x128xf32>
    %cst_19 = arith.constant 1.000000e+00 : f32
    %54 = vector.broadcast %cst_19 : f32 to vector<8x128xf32>
    %55 = arith.addf %54, %53 : vector<8x128xf32>
    %56 = arith.divf %54, %55 : vector<8x128xf32>
    %57 = vector.extract_strided_slice %50 {offsets = [0, 128], sizes = [8, 128], strides = [1, 1]} : vector<8x512xf32> to vector<8x128xf32>
    %58 = arith.negf %57 : vector<8x128xf32>
    %59 = math.exp %58 : vector<8x128xf32>
    %cst_20 = arith.constant 1.000000e+00 : f32
    %60 = vector.broadcast %cst_20 : f32 to vector<8x128xf32>
    %61 = arith.addf %60, %59 : vector<8x128xf32>
    %62 = arith.divf %60, %61 : vector<8x128xf32>
    %63 = vector.extract_strided_slice %50 {offsets = [0, 256], sizes = [8, 128], strides = [1, 1]} : vector<8x512xf32> to vector<8x128xf32>
    %64 = math.tanh %63 : vector<8x128xf32>
    %65 = vector.extract_strided_slice %50 {offsets = [0, 384], sizes = [8, 128], strides = [1, 1]} : vector<8x512xf32> to vector<8x128xf32>
    %66 = arith.negf %65 : vector<8x128xf32>
    %67 = math.exp %66 : vector<8x128xf32>
    %cst_21 = arith.constant 1.000000e+00 : f32
    %68 = vector.broadcast %cst_21 : f32 to vector<8x128xf32>
    %69 = arith.addf %68, %67 : vector<8x128xf32>
    %70 = arith.divf %68, %69 : vector<8x128xf32>
    %71 = arith.mulf %62, %39 : vector<8x128xf32>
    %72 = arith.mulf %56, %64 : vector<8x128xf32>
    %73 = arith.addf %71, %72 : vector<8x128xf32>
    %74 = math.tanh %73 : vector<8x128xf32>
    %75 = arith.mulf %70, %74 : vector<8x128xf32>
    %76 = arith.index_cast %45 : i32 to index
    %c0_22 = arith.constant 0 : index
    %77 = vector.load %arg19[%76, %c0_22] : memref<64x128xf32, #tpu.memory_space<vmem>>, vector<8x128xf32>
    tpu.vector_store %arg19[%76, %c0_22], %75 {strides = array<i32>} : memref<64x128xf32, #tpu.memory_space<vmem>>, vector<8x128xf32>,
    %c2_i32 = arith.constant 2 : i32
    %c8_i32_23 = arith.constant 8 : i32
    %78 = arith.muli %c2_i32, %c8_i32_23 : i32
    %79 = tpu.assume_multiple %78, 8 : i32
    %80 = arith.index_cast %79 : i32 to index
    %c0_24 = arith.constant 0 : index
    %81 = vector.load %arg20[%80, %c0_24] : memref<64x512xf32, #tpu.memory_space<vmem>>, vector<8x512xf32>
    %82 = arith.truncf %75 : vector<8x128xf32> to vector<8x128xbf16>
    %cst_25 = arith.constant dense<0.000000e+00> : vector<8x512xf32>
    %83 = tpu.matmul %82, %8, %cst_25 {dimension_numbers = #tpu.dot_dimension_numbers<[1], [0], [0], [1], [0, 0, 1, 1], [], []>} : vector<8x128xbf16>, vector<128x512xbf16>, vector<8x512xf32> -> vector<8x512xf32>
    %84 = arith.addf %81, %83 : vector<8x512xf32>
    %85 = vector.extract_strided_slice %84 {offsets = [0, 0], sizes = [8, 128], strides = [1, 1]} : vector<8x512xf32> to vector<8x128xf32>
    %86 = arith.negf %85 : vector<8x128xf32>
    %87 = math.exp %86 : vector<8x128xf32>
    %cst_26 = arith.constant 1.000000e+00 : f32
    %88 = vector.broadcast %cst_26 : f32 to vector<8x128xf32>
    %89 = arith.addf %88, %87 : vector<8x128xf32>
    %90 = arith.divf %88, %89 : vector<8x128xf32>
    %91 = vector.extract_strided_slice %84 {offsets = [0, 128], sizes = [8, 128], strides = [1, 1]} : vector<8x512xf32> to vector<8x128xf32>
    %92 = arith.negf %91 : vector<8x128xf32>
    %93 = math.exp %92 : vector<8x128xf32>
    %cst_27 = arith.constant 1.000000e+00 : f32
    %94 = vector.broadcast %cst_27 : f32 to vector<8x128xf32>
    %95 = arith.addf %94, %93 : vector<8x128xf32>
    %96 = arith.divf %94, %95 : vector<8x128xf32>
    %97 = vector.extract_strided_slice %84 {offsets = [0, 256], sizes = [8, 128], strides = [1, 1]} : vector<8x512xf32> to vector<8x128xf32>
    %98 = math.tanh %97 : vector<8x128xf32>
    %99 = vector.extract_strided_slice %84 {offsets = [0, 384], sizes = [8, 128], strides = [1, 1]} : vector<8x512xf32> to vector<8x128xf32>
    %100 = arith.negf %99 : vector<8x128xf32>
    %101 = math.exp %100 : vector<8x128xf32>
    %cst_28 = arith.constant 1.000000e+00 : f32
    %102 = vector.broadcast %cst_28 : f32 to vector<8x128xf32>
    %103 = arith.addf %102, %101 : vector<8x128xf32>
    %104 = arith.divf %102, %103 : vector<8x128xf32>
    %105 = arith.mulf %96, %73 : vector<8x128xf32>
    %106 = arith.mulf %90, %98 : vector<8x128xf32>
    %107 = arith.addf %105, %106 : vector<8x128xf32>
    %108 = math.tanh %107 : vector<8x128xf32>
    %109 = arith.mulf %104, %108 : vector<8x128xf32>
    %110 = arith.index_cast %79 : i32 to index
    %c0_29 = arith.constant 0 : index
    %111 = vector.load %arg19[%110, %c0_29] : memref<64x128xf32, #tpu.memory_space<vmem>>, vector<8x128xf32>
    tpu.vector_store %arg19[%110, %c0_29], %109 {strides = array<i32>} : memref<64x128xf32, #tpu.memory_space<vmem>>, vector<8x128xf32>,
    %c3_i32 = arith.constant 3 : i32
    %c8_i32_30 = arith.constant 8 : i32
    %112 = arith.muli %c3_i32, %c8_i32_30 : i32
    %113 = tpu.assume_multiple %112, 8 : i32
    %114 = arith.index_cast %113 : i32 to index
    %c0_31 = arith.constant 0 : index
    %115 = vector.load %arg20[%114, %c0_31] : memref<64x512xf32, #tpu.memory_space<vmem>>, vector<8x512xf32>
    %116 = arith.truncf %109 : vector<8x128xf32> to vector<8x128xbf16>
    %cst_32 = arith.constant dense<0.000000e+00> : vector<8x512xf32>
    %117 = tpu.matmul %116, %8, %cst_32 {dimension_numbers = #tpu.dot_dimension_numbers<[1], [0], [0], [1], [0, 0, 1, 1], [], []>} : vector<8x128xbf16>, vector<128x512xbf16>, vector<8x512xf32> -> vector<8x512xf32>
    %118 = arith.addf %115, %117 : vector<8x512xf32>
    %119 = vector.extract_strided_slice %118 {offsets = [0, 0], sizes = [8, 128], strides = [1, 1]} : vector<8x512xf32> to vector<8x128xf32>
    %120 = arith.negf %119 : vector<8x128xf32>
    %121 = math.exp %120 : vector<8x128xf32>
    %cst_33 = arith.constant 1.000000e+00 : f32
    %122 = vector.broadcast %cst_33 : f32 to vector<8x128xf32>
    %123 = arith.addf %122, %121 : vector<8x128xf32>
    %124 = arith.divf %122, %123 : vector<8x128xf32>
    %125 = vector.extract_strided_slice %118 {offsets = [0, 128], sizes = [8, 128], strides = [1, 1]} : vector<8x512xf32> to vector<8x128xf32>
    %126 = arith.negf %125 : vector<8x128xf32>
    %127 = math.exp %126 : vector<8x128xf32>
    %cst_34 = arith.constant 1.000000e+00 : f32
    %128 = vector.broadcast %cst_34 : f32 to vector<8x128xf32>
    %129 = arith.addf %128, %127 : vector<8x128xf32>
    %130 = arith.divf %128, %129 : vector<8x128xf32>
    %131 = vector.extract_strided_slice %118 {offsets = [0, 256], sizes = [8, 128], strides = [1, 1]} : vector<8x512xf32> to vector<8x128xf32>
    %132 = math.tanh %131 : vector<8x128xf32>
    %133 = vector.extract_strided_slice %118 {offsets = [0, 384], sizes = [8, 128], strides = [1, 1]} : vector<8x512xf32> to vector<8x128xf32>
    %134 = arith.negf %133 : vector<8x128xf32>
    %135 = math.exp %134 : vector<8x128xf32>
    %cst_35 = arith.constant 1.000000e+00 : f32
    %136 = vector.broadcast %cst_35 : f32 to vector<8x128xf32>
    %137 = arith.addf %136, %135 : vector<8x128xf32>
    %138 = arith.divf %136, %137 : vector<8x128xf32>
    %139 = arith.mulf %130, %107 : vector<8x128xf32>
    %140 = arith.mulf %124, %132 : vector<8x128xf32>
    %141 = arith.addf %139, %140 : vector<8x128xf32>
    %142 = math.tanh %141 : vector<8x128xf32>
    %143 = arith.mulf %138, %142 : vector<8x128xf32>
    %144 = arith.index_cast %113 : i32 to index
    %c0_36 = arith.constant 0 : index
    %145 = vector.load %arg19[%144, %c0_36] : memref<64x128xf32, #tpu.memory_space<vmem>>, vector<8x128xf32>
    tpu.vector_store %arg19[%144, %c0_36], %143 {strides = array<i32>} : memref<64x128xf32, #tpu.memory_space<vmem>>, vector<8x128xf32>,
    %c4_i32 = arith.constant 4 : i32
    %c8_i32_37 = arith.constant 8 : i32
    %146 = arith.muli %c4_i32, %c8_i32_37 : i32
    %147 = tpu.assume_multiple %146, 8 : i32
    %148 = arith.index_cast %147 : i32 to index
    %c0_38 = arith.constant 0 : index
    %149 = vector.load %arg20[%148, %c0_38] : memref<64x512xf32, #tpu.memory_space<vmem>>, vector<8x512xf32>
    %150 = arith.truncf %143 : vector<8x128xf32> to vector<8x128xbf16>
    %cst_39 = arith.constant dense<0.000000e+00> : vector<8x512xf32>
    %151 = tpu.matmul %150, %8, %cst_39 {dimension_numbers = #tpu.dot_dimension_numbers<[1], [0], [0], [1], [0, 0, 1, 1], [], []>} : vector<8x128xbf16>, vector<128x512xbf16>, vector<8x512xf32> -> vector<8x512xf32>
    %152 = arith.addf %149, %151 : vector<8x512xf32>
    %153 = vector.extract_strided_slice %152 {offsets = [0, 0], sizes = [8, 128], strides = [1, 1]} : vector<8x512xf32> to vector<8x128xf32>
    %154 = arith.negf %153 : vector<8x128xf32>
    %155 = math.exp %154 : vector<8x128xf32>
    %cst_40 = arith.constant 1.000000e+00 : f32
    %156 = vector.broadcast %cst_40 : f32 to vector<8x128xf32>
    %157 = arith.addf %156, %155 : vector<8x128xf32>
    %158 = arith.divf %156, %157 : vector<8x128xf32>
    %159 = vector.extract_strided_slice %152 {offsets = [0, 128], sizes = [8, 128], strides = [1, 1]} : vector<8x512xf32> to vector<8x128xf32>
    %160 = arith.negf %159 : vector<8x128xf32>
    %161 = math.exp %160 : vector<8x128xf32>
    %cst_41 = arith.constant 1.000000e+00 : f32
    %162 = vector.broadcast %cst_41 : f32 to vector<8x128xf32>
    %163 = arith.addf %162, %161 : vector<8x128xf32>
    %164 = arith.divf %162, %163 : vector<8x128xf32>
    %165 = vector.extract_strided_slice %152 {offsets = [0, 256], sizes = [8, 128], strides = [1, 1]} : vector<8x512xf32> to vector<8x128xf32>
    %166 = math.tanh %165 : vector<8x128xf32>
    %167 = vector.extract_strided_slice %152 {offsets = [0, 384], sizes = [8, 128], strides = [1, 1]} : vector<8x512xf32> to vector<8x128xf32>
    %168 = arith.negf %167 : vector<8x128xf32>
    %169 = math.exp %168 : vector<8x128xf32>
    %cst_42 = arith.constant 1.000000e+00 : f32
    %170 = vector.broadcast %cst_42 : f32 to vector<8x128xf32>
    %171 = arith.addf %170, %169 : vector<8x128xf32>
    %172 = arith.divf %170, %171 : vector<8x128xf32>
    %173 = arith.mulf %164, %141 : vector<8x128xf32>
    %174 = arith.mulf %158, %166 : vector<8x128xf32>
    %175 = arith.addf %173, %174 : vector<8x128xf32>
    %176 = math.tanh %175 : vector<8x128xf32>
    %177 = arith.mulf %172, %176 : vector<8x128xf32>
    %178 = arith.index_cast %147 : i32 to index
    %c0_43 = arith.constant 0 : index
    %179 = vector.load %arg19[%178, %c0_43] : memref<64x128xf32, #tpu.memory_space<vmem>>, vector<8x128xf32>
    tpu.vector_store %arg19[%178, %c0_43], %177 {strides = array<i32>} : memref<64x128xf32, #tpu.memory_space<vmem>>, vector<8x128xf32>,
    %c5_i32 = arith.constant 5 : i32
    %c8_i32_44 = arith.constant 8 : i32
    %180 = arith.muli %c5_i32, %c8_i32_44 : i32
    %181 = tpu.assume_multiple %180, 8 : i32
    %182 = arith.index_cast %181 : i32 to index
    %c0_45 = arith.constant 0 : index
    %183 = vector.load %arg20[%182, %c0_45] : memref<64x512xf32, #tpu.memory_space<vmem>>, vector<8x512xf32>
    %184 = arith.truncf %177 : vector<8x128xf32> to vector<8x128xbf16>
    %cst_46 = arith.constant dense<0.000000e+00> : vector<8x512xf32>
    %185 = tpu.matmul %184, %8, %cst_46 {dimension_numbers = #tpu.dot_dimension_numbers<[1], [0], [0], [1], [0, 0, 1, 1], [], []>} : vector<8x128xbf16>, vector<128x512xbf16>, vector<8x512xf32> -> vector<8x512xf32>
    %186 = arith.addf %183, %185 : vector<8x512xf32>
    %187 = vector.extract_strided_slice %186 {offsets = [0, 0], sizes = [8, 128], strides = [1, 1]} : vector<8x512xf32> to vector<8x128xf32>
    %188 = arith.negf %187 : vector<8x128xf32>
    %189 = math.exp %188 : vector<8x128xf32>
    %cst_47 = arith.constant 1.000000e+00 : f32
    %190 = vector.broadcast %cst_47 : f32 to vector<8x128xf32>
    %191 = arith.addf %190, %189 : vector<8x128xf32>
    %192 = arith.divf %190, %191 : vector<8x128xf32>
    %193 = vector.extract_strided_slice %186 {offsets = [0, 128], sizes = [8, 128], strides = [1, 1]} : vector<8x512xf32> to vector<8x128xf32>
    %194 = arith.negf %193 : vector<8x128xf32>
    %195 = math.exp %194 : vector<8x128xf32>
    %cst_48 = arith.constant 1.000000e+00 : f32
    %196 = vector.broadcast %cst_48 : f32 to vector<8x128xf32>
    %197 = arith.addf %196, %195 : vector<8x128xf32>
    %198 = arith.divf %196, %197 : vector<8x128xf32>
    %199 = vector.extract_strided_slice %186 {offsets = [0, 256], sizes = [8, 128], strides = [1, 1]} : vector<8x512xf32> to vector<8x128xf32>
    %200 = math.tanh %199 : vector<8x128xf32>
    %201 = vector.extract_strided_slice %186 {offsets = [0, 384], sizes = [8, 128], strides = [1, 1]} : vector<8x512xf32> to vector<8x128xf32>
    %202 = arith.negf %201 : vector<8x128xf32>
    %203 = math.exp %202 : vector<8x128xf32>
    %cst_49 = arith.constant 1.000000e+00 : f32
    %204 = vector.broadcast %cst_49 : f32 to vector<8x128xf32>
    %205 = arith.addf %204, %203 : vector<8x128xf32>
    %206 = arith.divf %204, %205 : vector<8x128xf32>
    %207 = arith.mulf %198, %175 : vector<8x128xf32>
    %208 = arith.mulf %192, %200 : vector<8x128xf32>
    %209 = arith.addf %207, %208 : vector<8x128xf32>
    %210 = math.tanh %209 : vector<8x128xf32>
    %211 = arith.mulf %206, %210 : vector<8x128xf32>
    %212 = arith.index_cast %181 : i32 to index
    %c0_50 = arith.constant 0 : index
    %213 = vector.load %arg19[%212, %c0_50] : memref<64x128xf32, #tpu.memory_space<vmem>>, vector<8x128xf32>
    tpu.vector_store %arg19[%212, %c0_50], %211 {strides = array<i32>} : memref<64x128xf32, #tpu.memory_space<vmem>>, vector<8x128xf32>,
    %c6_i32 = arith.constant 6 : i32
    %c8_i32_51 = arith.constant 8 : i32
    %214 = arith.muli %c6_i32, %c8_i32_51 : i32
    %215 = tpu.assume_multiple %214, 8 : i32
    %216 = arith.index_cast %215 : i32 to index
    %c0_52 = arith.constant 0 : index
    %217 = vector.load %arg20[%216, %c0_52] : memref<64x512xf32, #tpu.memory_space<vmem>>, vector<8x512xf32>
    %218 = arith.truncf %211 : vector<8x128xf32> to vector<8x128xbf16>
    %cst_53 = arith.constant dense<0.000000e+00> : vector<8x512xf32>
    %219 = tpu.matmul %218, %8, %cst_53 {dimension_numbers = #tpu.dot_dimension_numbers<[1], [0], [0], [1], [0, 0, 1, 1], [], []>} : vector<8x128xbf16>, vector<128x512xbf16>, vector<8x512xf32> -> vector<8x512xf32>
    %220 = arith.addf %217, %219 : vector<8x512xf32>
    %221 = vector.extract_strided_slice %220 {offsets = [0, 0], sizes = [8, 128], strides = [1, 1]} : vector<8x512xf32> to vector<8x128xf32>
    %222 = arith.negf %221 : vector<8x128xf32>
    %223 = math.exp %222 : vector<8x128xf32>
    %cst_54 = arith.constant 1.000000e+00 : f32
    %224 = vector.broadcast %cst_54 : f32 to vector<8x128xf32>
    %225 = arith.addf %224, %223 : vector<8x128xf32>
    %226 = arith.divf %224, %225 : vector<8x128xf32>
    %227 = vector.extract_strided_slice %220 {offsets = [0, 128], sizes = [8, 128], strides = [1, 1]} : vector<8x512xf32> to vector<8x128xf32>
    %228 = arith.negf %227 : vector<8x128xf32>
    %229 = math.exp %228 : vector<8x128xf32>
    %cst_55 = arith.constant 1.000000e+00 : f32
    %230 = vector.broadcast %cst_55 : f32 to vector<8x128xf32>
    %231 = arith.addf %230, %229 : vector<8x128xf32>
    %232 = arith.divf %230, %231 : vector<8x128xf32>
    %233 = vector.extract_strided_slice %220 {offsets = [0, 256], sizes = [8, 128], strides = [1, 1]} : vector<8x512xf32> to vector<8x128xf32>
    %234 = math.tanh %233 : vector<8x128xf32>
    %235 = vector.extract_strided_slice %220 {offsets = [0, 384], sizes = [8, 128], strides = [1, 1]} : vector<8x512xf32> to vector<8x128xf32>
    %236 = arith.negf %235 : vector<8x128xf32>
    %237 = math.exp %236 : vector<8x128xf32>
    %cst_56 = arith.constant 1.000000e+00 : f32
    %238 = vector.broadcast %cst_56 : f32 to vector<8x128xf32>
    %239 = arith.addf %238, %237 : vector<8x128xf32>
    %240 = arith.divf %238, %239 : vector<8x128xf32>
    %241 = arith.mulf %232, %209 : vector<8x128xf32>
    %242 = arith.mulf %226, %234 : vector<8x128xf32>
    %243 = arith.addf %241, %242 : vector<8x128xf32>
    %244 = math.tanh %243 : vector<8x128xf32>
    %245 = arith.mulf %240, %244 : vector<8x128xf32>
    %246 = arith.index_cast %215 : i32 to index
    %c0_57 = arith.constant 0 : index
    %247 = vector.load %arg19[%246, %c0_57] : memref<64x128xf32, #tpu.memory_space<vmem>>, vector<8x128xf32>
    tpu.vector_store %arg19[%246, %c0_57], %245 {strides = array<i32>} : memref<64x128xf32, #tpu.memory_space<vmem>>, vector<8x128xf32>,
    %c7_i32 = arith.constant 7 : i32
    %c8_i32_58 = arith.constant 8 : i32
    %248 = arith.muli %c7_i32, %c8_i32_58 : i32
    %249 = tpu.assume_multiple %248, 8 : i32
    %250 = arith.index_cast %249 : i32 to index
    %c0_59 = arith.constant 0 : index
    %251 = vector.load %arg20[%250, %c0_59] : memref<64x512xf32, #tpu.memory_space<vmem>>, vector<8x512xf32>
    %252 = arith.truncf %245 : vector<8x128xf32> to vector<8x128xbf16>
    %cst_60 = arith.constant dense<0.000000e+00> : vector<8x512xf32>
    %253 = tpu.matmul %252, %8, %cst_60 {dimension_numbers = #tpu.dot_dimension_numbers<[1], [0], [0], [1], [0, 0, 1, 1], [], []>} : vector<8x128xbf16>, vector<128x512xbf16>, vector<8x512xf32> -> vector<8x512xf32>
    %254 = arith.addf %251, %253 : vector<8x512xf32>
    %255 = vector.extract_strided_slice %254 {offsets = [0, 0], sizes = [8, 128], strides = [1, 1]} : vector<8x512xf32> to vector<8x128xf32>
    %256 = arith.negf %255 : vector<8x128xf32>
    %257 = math.exp %256 : vector<8x128xf32>
    %cst_61 = arith.constant 1.000000e+00 : f32
    %258 = vector.broadcast %cst_61 : f32 to vector<8x128xf32>
    %259 = arith.addf %258, %257 : vector<8x128xf32>
    %260 = arith.divf %258, %259 : vector<8x128xf32>
    %261 = vector.extract_strided_slice %254 {offsets = [0, 128], sizes = [8, 128], strides = [1, 1]} : vector<8x512xf32> to vector<8x128xf32>
    %262 = arith.negf %261 : vector<8x128xf32>
    %263 = math.exp %262 : vector<8x128xf32>
    %cst_62 = arith.constant 1.000000e+00 : f32
    %264 = vector.broadcast %cst_62 : f32 to vector<8x128xf32>
    %265 = arith.addf %264, %263 : vector<8x128xf32>
    %266 = arith.divf %264, %265 : vector<8x128xf32>
    %267 = vector.extract_strided_slice %254 {offsets = [0, 256], sizes = [8, 128], strides = [1, 1]} : vector<8x512xf32> to vector<8x128xf32>
    %268 = math.tanh %267 : vector<8x128xf32>
    %269 = vector.extract_strided_slice %254 {offsets = [0, 384], sizes = [8, 128], strides = [1, 1]} : vector<8x512xf32> to vector<8x128xf32>
    %270 = arith.negf %269 : vector<8x128xf32>
    %271 = math.exp %270 : vector<8x128xf32>
    %cst_63 = arith.constant 1.000000e+00 : f32
    %272 = vector.broadcast %cst_63 : f32 to vector<8x128xf32>
    %273 = arith.addf %272, %271 : vector<8x128xf32>
    %274 = arith.divf %272, %273 : vector<8x128xf32>
    %275 = arith.mulf %266, %243 : vector<8x128xf32>
    %276 = arith.mulf %260, %268 : vector<8x128xf32>
    %277 = arith.addf %275, %276 : vector<8x128xf32>
    %278 = math.tanh %277 : vector<8x128xf32>
    %279 = arith.mulf %274, %278 : vector<8x128xf32>
    %280 = arith.index_cast %249 : i32 to index
    %c0_64 = arith.constant 0 : index
    %281 = vector.load %arg19[%280, %c0_64] : memref<64x128xf32, #tpu.memory_space<vmem>>, vector<8x128xf32>
    tpu.vector_store %arg19[%280, %c0_64], %279 {strides = array<i32>} : memref<64x128xf32, #tpu.memory_space<vmem>>, vector<8x128xf32>,
    %c8_i32_65 = arith.constant 8 : i32
    %c0_66 = arith.constant 0 : index
    %c0_67 = arith.constant 0 : index
    %c0_68 = arith.constant 0 : index
    %282 = vector.load %arg17[%c0_66, %c0_67, %c0_68] : memref<2x8x128xf32, #tpu.memory_space<vmem>>, vector<1x8x128xf32>
    %283 = vector.shape_cast %282 : vector<1x8x128xf32> to vector<8x128xf32>
    %284 = vector.shape_cast %279 : vector<8x128xf32> to vector<1x8x128xf32>
    tpu.vector_store %arg17[%c0_66, %c0_67, %c0_68], %284 {strides = array<i32>} : memref<2x8x128xf32, #tpu.memory_space<vmem>>, vector<1x8x128xf32>,
    %c0_69 = arith.constant 0 : index
    %c0_70 = arith.constant 0 : index
    %c0_71 = arith.constant 0 : index
    %285 = vector.load %arg18[%c0_69, %c0_70, %c0_71] : memref<2x8x128xf32, #tpu.memory_space<vmem>>, vector<1x8x128xf32>
    %286 = vector.shape_cast %285 : vector<1x8x128xf32> to vector<8x128xf32>
    %287 = vector.shape_cast %277 : vector<8x128xf32> to vector<1x8x128xf32>
    tpu.vector_store %arg18[%c0_69, %c0_70, %c0_71], %287 {strides = array<i32>} : memref<2x8x128xf32, #tpu.memory_space<vmem>>, vector<1x8x128xf32>,
    %c0_72 = arith.constant 0 : index
    %c0_73 = arith.constant 0 : index
    %288 = vector.load %arg19[%c0_72, %c0_73] : memref<64x128xf32, #tpu.memory_space<vmem>>, vector<64x128xf32>
    %289 = arith.truncf %288 : vector<64x128xf32> to vector<64x128xbf16>
    %c0_74 = arith.constant 0 : index
    %c0_75 = arith.constant 0 : index
    %290 = vector.load %arg5[%c0_74, %c0_75] : memref<128x512xbf16, #tpu.memory_space<vmem>>, vector<128x512xbf16>
    %cst_76 = arith.constant dense<0.000000e+00> : vector<64x512xf32>
    %291 = tpu.matmul %289, %290, %cst_76 {dimension_numbers = #tpu.dot_dimension_numbers<[1], [0], [0], [1], [0, 0, 1, 1], [], []>} : vector<64x128xbf16>, vector<128x512xbf16>, vector<64x512xf32> -> vector<64x512xf32>
    %c0_77 = arith.constant 0 : index
    %c0_78 = arith.constant 0 : index
    %292 = vector.load %arg7[%c0_77, %c0_78] : memref<1x512xf32, #tpu.memory_space<vmem>>, vector<1x512xf32>
    %293 = vector.broadcast %292 : vector<1x512xf32> to vector<64x512xf32>
    %294 = arith.addf %291, %293 : vector<64x512xf32>
    %c0_79 = arith.constant 0 : index
    %c0_80 = arith.constant 0 : index
    %295 = vector.load %arg20[%c0_79, %c0_80] : memref<64x512xf32, #tpu.memory_space<vmem>>, vector<64x512xf32>
    tpu.vector_store %arg20[%c0_79, %c0_80], %294 {strides = array<i32>} : memref<64x512xf32, #tpu.memory_space<vmem>>, vector<64x512xf32>,
    %c0_81 = arith.constant 0 : index
    %c0_82 = arith.constant 0 : index
    %296 = vector.load %arg6[%c0_81, %c0_82] : memref<128x512xbf16, #tpu.memory_space<vmem>>, vector<128x512xbf16>
    %cst_83 = arith.constant 0.000000e+00 : f32
    %297 = vector.broadcast %cst_83 : f32 to vector<8x128xf32>
    %c0_i32_84 = arith.constant 0 : i32
    %c8_i32_85 = arith.constant 8 : i32
    %298 = arith.muli %c0_i32_84, %c8_i32_85 : i32
    %299 = tpu.assume_multiple %298, 8 : i32
    %300 = arith.index_cast %299 : i32 to index
    %c0_86 = arith.constant 0 : index
    %301 = vector.load %arg20[%300, %c0_86] : memref<64x512xf32, #tpu.memory_space<vmem>>, vector<8x512xf32>
    %302 = arith.truncf %297 : vector<8x128xf32> to vector<8x128xbf16>
    %cst_87 = arith.constant dense<0.000000e+00> : vector<8x512xf32>
    %303 = tpu.matmul %302, %296, %cst_87 {dimension_numbers = #tpu.dot_dimension_numbers<[1], [0], [0], [1], [0, 0, 1, 1], [], []>} : vector<8x128xbf16>, vector<128x512xbf16>, vector<8x512xf32> -> vector<8x512xf32>
    %304 = arith.addf %301, %303 : vector<8x512xf32>
    %305 = vector.extract_strided_slice %304 {offsets = [0, 0], sizes = [8, 128], strides = [1, 1]} : vector<8x512xf32> to vector<8x128xf32>
    %306 = arith.negf %305 : vector<8x128xf32>
    %307 = math.exp %306 : vector<8x128xf32>
    %cst_88 = arith.constant 1.000000e+00 : f32
    %308 = vector.broadcast %cst_88 : f32 to vector<8x128xf32>
    %309 = arith.addf %308, %307 : vector<8x128xf32>
    %310 = arith.divf %308, %309 : vector<8x128xf32>
    %311 = vector.extract_strided_slice %304 {offsets = [0, 128], sizes = [8, 128], strides = [1, 1]} : vector<8x512xf32> to vector<8x128xf32>
    %312 = arith.negf %311 : vector<8x128xf32>
    %313 = math.exp %312 : vector<8x128xf32>
    %cst_89 = arith.constant 1.000000e+00 : f32
    %314 = vector.broadcast %cst_89 : f32 to vector<8x128xf32>
    %315 = arith.addf %314, %313 : vector<8x128xf32>
    %316 = arith.divf %314, %315 : vector<8x128xf32>
    %317 = vector.extract_strided_slice %304 {offsets = [0, 256], sizes = [8, 128], strides = [1, 1]} : vector<8x512xf32> to vector<8x128xf32>
    %318 = math.tanh %317 : vector<8x128xf32>
    %319 = vector.extract_strided_slice %304 {offsets = [0, 384], sizes = [8, 128], strides = [1, 1]} : vector<8x512xf32> to vector<8x128xf32>
    %320 = arith.negf %319 : vector<8x128xf32>
    %321 = math.exp %320 : vector<8x128xf32>
    %cst_90 = arith.constant 1.000000e+00 : f32
    %322 = vector.broadcast %cst_90 : f32 to vector<8x128xf32>
    %323 = arith.addf %322, %321 : vector<8x128xf32>
    %324 = arith.divf %322, %323 : vector<8x128xf32>
    %325 = arith.mulf %316, %297 : vector<8x128xf32>
    %326 = arith.mulf %310, %318 : vector<8x128xf32>
    %327 = arith.addf %325, %326 : vector<8x128xf32>
    %328 = math.tanh %327 : vector<8x128xf32>
    %329 = arith.mulf %324, %328 : vector<8x128xf32>
    %c1_i32_91 = arith.constant 1 : i32
    %c8_i32_92 = arith.constant 8 : i32
    %330 = arith.muli %c1_i32_91, %c8_i32_92 : i32
    %331 = tpu.assume_multiple %330, 8 : i32
    %332 = arith.index_cast %331 : i32 to index
    %c0_93 = arith.constant 0 : index
    %333 = vector.load %arg20[%332, %c0_93] : memref<64x512xf32, #tpu.memory_space<vmem>>, vector<8x512xf32>
    %334 = arith.truncf %329 : vector<8x128xf32> to vector<8x128xbf16>
    %cst_94 = arith.constant dense<0.000000e+00> : vector<8x512xf32>
    %335 = tpu.matmul %334, %296, %cst_94 {dimension_numbers = #tpu.dot_dimension_numbers<[1], [0], [0], [1], [0, 0, 1, 1], [], []>} : vector<8x128xbf16>, vector<128x512xbf16>, vector<8x512xf32> -> vector<8x512xf32>
    %336 = arith.addf %333, %335 : vector<8x512xf32>
    %337 = vector.extract_strided_slice %336 {offsets = [0, 0], sizes = [8, 128], strides = [1, 1]} : vector<8x512xf32> to vector<8x128xf32>
    %338 = arith.negf %337 : vector<8x128xf32>
    %339 = math.exp %338 : vector<8x128xf32>
    %cst_95 = arith.constant 1.000000e+00 : f32
    %340 = vector.broadcast %cst_95 : f32 to vector<8x128xf32>
    %341 = arith.addf %340, %339 : vector<8x128xf32>
    %342 = arith.divf %340, %341 : vector<8x128xf32>
    %343 = vector.extract_strided_slice %336 {offsets = [0, 128], sizes = [8, 128], strides = [1, 1]} : vector<8x512xf32> to vector<8x128xf32>
    %344 = arith.negf %343 : vector<8x128xf32>
    %345 = math.exp %344 : vector<8x128xf32>
    %cst_96 = arith.constant 1.000000e+00 : f32
    %346 = vector.broadcast %cst_96 : f32 to vector<8x128xf32>
    %347 = arith.addf %346, %345 : vector<8x128xf32>
    %348 = arith.divf %346, %347 : vector<8x128xf32>
    %349 = vector.extract_strided_slice %336 {offsets = [0, 256], sizes = [8, 128], strides = [1, 1]} : vector<8x512xf32> to vector<8x128xf32>
    %350 = math.tanh %349 : vector<8x128xf32>
    %351 = vector.extract_strided_slice %336 {offsets = [0, 384], sizes = [8, 128], strides = [1, 1]} : vector<8x512xf32> to vector<8x128xf32>
    %352 = arith.negf %351 : vector<8x128xf32>
    %353 = math.exp %352 : vector<8x128xf32>
    %cst_97 = arith.constant 1.000000e+00 : f32
    %354 = vector.broadcast %cst_97 : f32 to vector<8x128xf32>
    %355 = arith.addf %354, %353 : vector<8x128xf32>
    %356 = arith.divf %354, %355 : vector<8x128xf32>
    %357 = arith.mulf %348, %327 : vector<8x128xf32>
    %358 = arith.mulf %342, %350 : vector<8x128xf32>
    %359 = arith.addf %357, %358 : vector<8x128xf32>
    %360 = math.tanh %359 : vector<8x128xf32>
    %361 = arith.mulf %356, %360 : vector<8x128xf32>
    %c2_i32_98 = arith.constant 2 : i32
    %c8_i32_99 = arith.constant 8 : i32
    %362 = arith.muli %c2_i32_98, %c8_i32_99 : i32
    %363 = tpu.assume_multiple %362, 8 : i32
    %364 = arith.index_cast %363 : i32 to index
    %c0_100 = arith.constant 0 : index
    %365 = vector.load %arg20[%364, %c0_100] : memref<64x512xf32, #tpu.memory_space<vmem>>, vector<8x512xf32>
    %366 = arith.truncf %361 : vector<8x128xf32> to vector<8x128xbf16>
    %cst_101 = arith.constant dense<0.000000e+00> : vector<8x512xf32>
    %367 = tpu.matmul %366, %296, %cst_101 {dimension_numbers = #tpu.dot_dimension_numbers<[1], [0], [0], [1], [0, 0, 1, 1], [], []>} : vector<8x128xbf16>, vector<128x512xbf16>, vector<8x512xf32> -> vector<8x512xf32>
    %368 = arith.addf %365, %367 : vector<8x512xf32>
    %369 = vector.extract_strided_slice %368 {offsets = [0, 0], sizes = [8, 128], strides = [1, 1]} : vector<8x512xf32> to vector<8x128xf32>
    %370 = arith.negf %369 : vector<8x128xf32>
    %371 = math.exp %370 : vector<8x128xf32>
    %cst_102 = arith.constant 1.000000e+00 : f32
    %372 = vector.broadcast %cst_102 : f32 to vector<8x128xf32>
    %373 = arith.addf %372, %371 : vector<8x128xf32>
    %374 = arith.divf %372, %373 : vector<8x128xf32>
    %375 = vector.extract_strided_slice %368 {offsets = [0, 128], sizes = [8, 128], strides = [1, 1]} : vector<8x512xf32> to vector<8x128xf32>
    %376 = arith.negf %375 : vector<8x128xf32>
    %377 = math.exp %376 : vector<8x128xf32>
    %cst_103 = arith.constant 1.000000e+00 : f32
    %378 = vector.broadcast %cst_103 : f32 to vector<8x128xf32>
    %379 = arith.addf %378, %377 : vector<8x128xf32>
    %380 = arith.divf %378, %379 : vector<8x128xf32>
    %381 = vector.extract_strided_slice %368 {offsets = [0, 256], sizes = [8, 128], strides = [1, 1]} : vector<8x512xf32> to vector<8x128xf32>
    %382 = math.tanh %381 : vector<8x128xf32>
    %383 = vector.extract_strided_slice %368 {offsets = [0, 384], sizes = [8, 128], strides = [1, 1]} : vector<8x512xf32> to vector<8x128xf32>
    %384 = arith.negf %383 : vector<8x128xf32>
    %385 = math.exp %384 : vector<8x128xf32>
    %cst_104 = arith.constant 1.000000e+00 : f32
    %386 = vector.broadcast %cst_104 : f32 to vector<8x128xf32>
    %387 = arith.addf %386, %385 : vector<8x128xf32>
    %388 = arith.divf %386, %387 : vector<8x128xf32>
    %389 = arith.mulf %380, %359 : vector<8x128xf32>
    %390 = arith.mulf %374, %382 : vector<8x128xf32>
    %391 = arith.addf %389, %390 : vector<8x128xf32>
    %392 = math.tanh %391 : vector<8x128xf32>
    %393 = arith.mulf %388, %392 : vector<8x128xf32>
    %c3_i32_105 = arith.constant 3 : i32
    %c8_i32_106 = arith.constant 8 : i32
    %394 = arith.muli %c3_i32_105, %c8_i32_106 : i32
    %395 = tpu.assume_multiple %394, 8 : i32
    %396 = arith.index_cast %395 : i32 to index
    %c0_107 = arith.constant 0 : index
    %397 = vector.load %arg20[%396, %c0_107] : memref<64x512xf32, #tpu.memory_space<vmem>>, vector<8x512xf32>
    %398 = arith.truncf %393 : vector<8x128xf32> to vector<8x128xbf16>
    %cst_108 = arith.constant dense<0.000000e+00> : vector<8x512xf32>
    %399 = tpu.matmul %398, %296, %cst_108 {dimension_numbers = #tpu.dot_dimension_numbers<[1], [0], [0], [1], [0, 0, 1, 1], [], []>} : vector<8x128xbf16>, vector<128x512xbf16>, vector<8x512xf32> -> vector<8x512xf32>
    %400 = arith.addf %397, %399 : vector<8x512xf32>
    %401 = vector.extract_strided_slice %400 {offsets = [0, 0], sizes = [8, 128], strides = [1, 1]} : vector<8x512xf32> to vector<8x128xf32>
    %402 = arith.negf %401 : vector<8x128xf32>
    %403 = math.exp %402 : vector<8x128xf32>
    %cst_109 = arith.constant 1.000000e+00 : f32
    %404 = vector.broadcast %cst_109 : f32 to vector<8x128xf32>
    %405 = arith.addf %404, %403 : vector<8x128xf32>
    %406 = arith.divf %404, %405 : vector<8x128xf32>
    %407 = vector.extract_strided_slice %400 {offsets = [0, 128], sizes = [8, 128], strides = [1, 1]} : vector<8x512xf32> to vector<8x128xf32>
    %408 = arith.negf %407 : vector<8x128xf32>
    %409 = math.exp %408 : vector<8x128xf32>
    %cst_110 = arith.constant 1.000000e+00 : f32
    %410 = vector.broadcast %cst_110 : f32 to vector<8x128xf32>
    %411 = arith.addf %410, %409 : vector<8x128xf32>
    %412 = arith.divf %410, %411 : vector<8x128xf32>
    %413 = vector.extract_strided_slice %400 {offsets = [0, 256], sizes = [8, 128], strides = [1, 1]} : vector<8x512xf32> to vector<8x128xf32>
    %414 = math.tanh %413 : vector<8x128xf32>
    %415 = vector.extract_strided_slice %400 {offsets = [0, 384], sizes = [8, 128], strides = [1, 1]} : vector<8x512xf32> to vector<8x128xf32>
    %416 = arith.negf %415 : vector<8x128xf32>
    %417 = math.exp %416 : vector<8x128xf32>
    %cst_111 = arith.constant 1.000000e+00 : f32
    %418 = vector.broadcast %cst_111 : f32 to vector<8x128xf32>
    %419 = arith.addf %418, %417 : vector<8x128xf32>
    %420 = arith.divf %418, %419 : vector<8x128xf32>
    %421 = arith.mulf %412, %391 : vector<8x128xf32>
    %422 = arith.mulf %406, %414 : vector<8x128xf32>
    %423 = arith.addf %421, %422 : vector<8x128xf32>
    %424 = math.tanh %423 : vector<8x128xf32>
    %425 = arith.mulf %420, %424 : vector<8x128xf32>
    %c4_i32_112 = arith.constant 4 : i32
    %c8_i32_113 = arith.constant 8 : i32
    %426 = arith.muli %c4_i32_112, %c8_i32_113 : i32
    %427 = tpu.assume_multiple %426, 8 : i32
    %428 = arith.index_cast %427 : i32 to index
    %c0_114 = arith.constant 0 : index
    %429 = vector.load %arg20[%428, %c0_114] : memref<64x512xf32, #tpu.memory_space<vmem>>, vector<8x512xf32>
    %430 = arith.truncf %425 : vector<8x128xf32> to vector<8x128xbf16>
    %cst_115 = arith.constant dense<0.000000e+00> : vector<8x512xf32>
    %431 = tpu.matmul %430, %296, %cst_115 {dimension_numbers = #tpu.dot_dimension_numbers<[1], [0], [0], [1], [0, 0, 1, 1], [], []>} : vector<8x128xbf16>, vector<128x512xbf16>, vector<8x512xf32> -> vector<8x512xf32>
    %432 = arith.addf %429, %431 : vector<8x512xf32>
    %433 = vector.extract_strided_slice %432 {offsets = [0, 0], sizes = [8, 128], strides = [1, 1]} : vector<8x512xf32> to vector<8x128xf32>
    %434 = arith.negf %433 : vector<8x128xf32>
    %435 = math.exp %434 : vector<8x128xf32>
    %cst_116 = arith.constant 1.000000e+00 : f32
    %436 = vector.broadcast %cst_116 : f32 to vector<8x128xf32>
    %437 = arith.addf %436, %435 : vector<8x128xf32>
    %438 = arith.divf %436, %437 : vector<8x128xf32>
    %439 = vector.extract_strided_slice %432 {offsets = [0, 128], sizes = [8, 128], strides = [1, 1]} : vector<8x512xf32> to vector<8x128xf32>
    %440 = arith.negf %439 : vector<8x128xf32>
    %441 = math.exp %440 : vector<8x128xf32>
    %cst_117 = arith.constant 1.000000e+00 : f32
    %442 = vector.broadcast %cst_117 : f32 to vector<8x128xf32>
    %443 = arith.addf %442, %441 : vector<8x128xf32>
    %444 = arith.divf %442, %443 : vector<8x128xf32>
    %445 = vector.extract_strided_slice %432 {offsets = [0, 256], sizes = [8, 128], strides = [1, 1]} : vector<8x512xf32> to vector<8x128xf32>
    %446 = math.tanh %445 : vector<8x128xf32>
    %447 = vector.extract_strided_slice %432 {offsets = [0, 384], sizes = [8, 128], strides = [1, 1]} : vector<8x512xf32> to vector<8x128xf32>
    %448 = arith.negf %447 : vector<8x128xf32>
    %449 = math.exp %448 : vector<8x128xf32>
    %cst_118 = arith.constant 1.000000e+00 : f32
    %450 = vector.broadcast %cst_118 : f32 to vector<8x128xf32>
    %451 = arith.addf %450, %449 : vector<8x128xf32>
    %452 = arith.divf %450, %451 : vector<8x128xf32>
    %453 = arith.mulf %444, %423 : vector<8x128xf32>
    %454 = arith.mulf %438, %446 : vector<8x128xf32>
    %455 = arith.addf %453, %454 : vector<8x128xf32>
    %456 = math.tanh %455 : vector<8x128xf32>
    %457 = arith.mulf %452, %456 : vector<8x128xf32>
    %c5_i32_119 = arith.constant 5 : i32
    %c8_i32_120 = arith.constant 8 : i32
    %458 = arith.muli %c5_i32_119, %c8_i32_120 : i32
    %459 = tpu.assume_multiple %458, 8 : i32
    %460 = arith.index_cast %459 : i32 to index
    %c0_121 = arith.constant 0 : index
    %461 = vector.load %arg20[%460, %c0_121] : memref<64x512xf32, #tpu.memory_space<vmem>>, vector<8x512xf32>
    %462 = arith.truncf %457 : vector<8x128xf32> to vector<8x128xbf16>
    %cst_122 = arith.constant dense<0.000000e+00> : vector<8x512xf32>
    %463 = tpu.matmul %462, %296, %cst_122 {dimension_numbers = #tpu.dot_dimension_numbers<[1], [0], [0], [1], [0, 0, 1, 1], [], []>} : vector<8x128xbf16>, vector<128x512xbf16>, vector<8x512xf32> -> vector<8x512xf32>
    %464 = arith.addf %461, %463 : vector<8x512xf32>
    %465 = vector.extract_strided_slice %464 {offsets = [0, 0], sizes = [8, 128], strides = [1, 1]} : vector<8x512xf32> to vector<8x128xf32>
    %466 = arith.negf %465 : vector<8x128xf32>
    %467 = math.exp %466 : vector<8x128xf32>
    %cst_123 = arith.constant 1.000000e+00 : f32
    %468 = vector.broadcast %cst_123 : f32 to vector<8x128xf32>
    %469 = arith.addf %468, %467 : vector<8x128xf32>
    %470 = arith.divf %468, %469 : vector<8x128xf32>
    %471 = vector.extract_strided_slice %464 {offsets = [0, 128], sizes = [8, 128], strides = [1, 1]} : vector<8x512xf32> to vector<8x128xf32>
    %472 = arith.negf %471 : vector<8x128xf32>
    %473 = math.exp %472 : vector<8x128xf32>
    %cst_124 = arith.constant 1.000000e+00 : f32
    %474 = vector.broadcast %cst_124 : f32 to vector<8x128xf32>
    %475 = arith.addf %474, %473 : vector<8x128xf32>
    %476 = arith.divf %474, %475 : vector<8x128xf32>
    %477 = vector.extract_strided_slice %464 {offsets = [0, 256], sizes = [8, 128], strides = [1, 1]} : vector<8x512xf32> to vector<8x128xf32>
    %478 = math.tanh %477 : vector<8x128xf32>
    %479 = vector.extract_strided_slice %464 {offsets = [0, 384], sizes = [8, 128], strides = [1, 1]} : vector<8x512xf32> to vector<8x128xf32>
    %480 = arith.negf %479 : vector<8x128xf32>
    %481 = math.exp %480 : vector<8x128xf32>
    %cst_125 = arith.constant 1.000000e+00 : f32
    %482 = vector.broadcast %cst_125 : f32 to vector<8x128xf32>
    %483 = arith.addf %482, %481 : vector<8x128xf32>
    %484 = arith.divf %482, %483 : vector<8x128xf32>
    %485 = arith.mulf %476, %455 : vector<8x128xf32>
    %486 = arith.mulf %470, %478 : vector<8x128xf32>
    %487 = arith.addf %485, %486 : vector<8x128xf32>
    %488 = math.tanh %487 : vector<8x128xf32>
    %489 = arith.mulf %484, %488 : vector<8x128xf32>
    %c6_i32_126 = arith.constant 6 : i32
    %c8_i32_127 = arith.constant 8 : i32
    %490 = arith.muli %c6_i32_126, %c8_i32_127 : i32
    %491 = tpu.assume_multiple %490, 8 : i32
    %492 = arith.index_cast %491 : i32 to index
    %c0_128 = arith.constant 0 : index
    %493 = vector.load %arg20[%492, %c0_128] : memref<64x512xf32, #tpu.memory_space<vmem>>, vector<8x512xf32>
    %494 = arith.truncf %489 : vector<8x128xf32> to vector<8x128xbf16>
    %cst_129 = arith.constant dense<0.000000e+00> : vector<8x512xf32>
    %495 = tpu.matmul %494, %296, %cst_129 {dimension_numbers = #tpu.dot_dimension_numbers<[1], [0], [0], [1], [0, 0, 1, 1], [], []>} : vector<8x128xbf16>, vector<128x512xbf16>, vector<8x512xf32> -> vector<8x512xf32>
    %496 = arith.addf %493, %495 : vector<8x512xf32>
    %497 = vector.extract_strided_slice %496 {offsets = [0, 0], sizes = [8, 128], strides = [1, 1]} : vector<8x512xf32> to vector<8x128xf32>
    %498 = arith.negf %497 : vector<8x128xf32>
    %499 = math.exp %498 : vector<8x128xf32>
    %cst_130 = arith.constant 1.000000e+00 : f32
    %500 = vector.broadcast %cst_130 : f32 to vector<8x128xf32>
    %501 = arith.addf %500, %499 : vector<8x128xf32>
    %502 = arith.divf %500, %501 : vector<8x128xf32>
    %503 = vector.extract_strided_slice %496 {offsets = [0, 128], sizes = [8, 128], strides = [1, 1]} : vector<8x512xf32> to vector<8x128xf32>
    %504 = arith.negf %503 : vector<8x128xf32>
    %505 = math.exp %504 : vector<8x128xf32>
    %cst_131 = arith.constant 1.000000e+00 : f32
    %506 = vector.broadcast %cst_131 : f32 to vector<8x128xf32>
    %507 = arith.addf %506, %505 : vector<8x128xf32>
    %508 = arith.divf %506, %507 : vector<8x128xf32>
    %509 = vector.extract_strided_slice %496 {offsets = [0, 256], sizes = [8, 128], strides = [1, 1]} : vector<8x512xf32> to vector<8x128xf32>
    %510 = math.tanh %509 : vector<8x128xf32>
    %511 = vector.extract_strided_slice %496 {offsets = [0, 384], sizes = [8, 128], strides = [1, 1]} : vector<8x512xf32> to vector<8x128xf32>
    %512 = arith.negf %511 : vector<8x128xf32>
    %513 = math.exp %512 : vector<8x128xf32>
    %cst_132 = arith.constant 1.000000e+00 : f32
    %514 = vector.broadcast %cst_132 : f32 to vector<8x128xf32>
    %515 = arith.addf %514, %513 : vector<8x128xf32>
    %516 = arith.divf %514, %515 : vector<8x128xf32>
    %517 = arith.mulf %508, %487 : vector<8x128xf32>
    %518 = arith.mulf %502, %510 : vector<8x128xf32>
    %519 = arith.addf %517, %518 : vector<8x128xf32>
    %520 = math.tanh %519 : vector<8x128xf32>
    %521 = arith.mulf %516, %520 : vector<8x128xf32>
    %c7_i32_133 = arith.constant 7 : i32
    %c8_i32_134 = arith.constant 8 : i32
    %522 = arith.muli %c7_i32_133, %c8_i32_134 : i32
    %523 = tpu.assume_multiple %522, 8 : i32
    %524 = arith.index_cast %523 : i32 to index
    %c0_135 = arith.constant 0 : index
    %525 = vector.load %arg20[%524, %c0_135] : memref<64x512xf32, #tpu.memory_space<vmem>>, vector<8x512xf32>
    %526 = arith.truncf %521 : vector<8x128xf32> to vector<8x128xbf16>
    %cst_136 = arith.constant dense<0.000000e+00> : vector<8x512xf32>
    %527 = tpu.matmul %526, %296, %cst_136 {dimension_numbers = #tpu.dot_dimension_numbers<[1], [0], [0], [1], [0, 0, 1, 1], [], []>} : vector<8x128xbf16>, vector<128x512xbf16>, vector<8x512xf32> -> vector<8x512xf32>
    %528 = arith.addf %525, %527 : vector<8x512xf32>
    %529 = vector.extract_strided_slice %528 {offsets = [0, 0], sizes = [8, 128], strides = [1, 1]} : vector<8x512xf32> to vector<8x128xf32>
    %530 = arith.negf %529 : vector<8x128xf32>
    %531 = math.exp %530 : vector<8x128xf32>
    %cst_137 = arith.constant 1.000000e+00 : f32
    %532 = vector.broadcast %cst_137 : f32 to vector<8x128xf32>
    %533 = arith.addf %532, %531 : vector<8x128xf32>
    %534 = arith.divf %532, %533 : vector<8x128xf32>
    %535 = vector.extract_strided_slice %528 {offsets = [0, 128], sizes = [8, 128], strides = [1, 1]} : vector<8x512xf32> to vector<8x128xf32>
    %536 = arith.negf %535 : vector<8x128xf32>
    %537 = math.exp %536 : vector<8x128xf32>
    %cst_138 = arith.constant 1.000000e+00 : f32
    %538 = vector.broadcast %cst_138 : f32 to vector<8x128xf32>
    %539 = arith.addf %538, %537 : vector<8x128xf32>
    %540 = arith.divf %538, %539 : vector<8x128xf32>
    %541 = vector.extract_strided_slice %528 {offsets = [0, 256], sizes = [8, 128], strides = [1, 1]} : vector<8x512xf32> to vector<8x128xf32>
    %542 = math.tanh %541 : vector<8x128xf32>
    %543 = vector.extract_strided_slice %528 {offsets = [0, 384], sizes = [8, 128], strides = [1, 1]} : vector<8x512xf32> to vector<8x128xf32>
    %544 = arith.negf %543 : vector<8x128xf32>
    %545 = math.exp %544 : vector<8x128xf32>
    %cst_139 = arith.constant 1.000000e+00 : f32
    %546 = vector.broadcast %cst_139 : f32 to vector<8x128xf32>
    %547 = arith.addf %546, %545 : vector<8x128xf32>
    %548 = arith.divf %546, %547 : vector<8x128xf32>
    %549 = arith.mulf %540, %519 : vector<8x128xf32>
    %550 = arith.mulf %534, %542 : vector<8x128xf32>
    %551 = arith.addf %549, %550 : vector<8x128xf32>
    %552 = math.tanh %551 : vector<8x128xf32>
    %553 = arith.mulf %548, %552 : vector<8x128xf32>
    %c8_i32_140 = arith.constant 8 : i32
    %c1 = arith.constant 1 : index
    %c0_141 = arith.constant 0 : index
    %c0_142 = arith.constant 0 : index
    %554 = vector.load %arg17[%c1, %c0_141, %c0_142] : memref<2x8x128xf32, #tpu.memory_space<vmem>>, vector<1x8x128xf32>
    %555 = vector.shape_cast %554 : vector<1x8x128xf32> to vector<8x128xf32>
    %556 = vector.shape_cast %553 : vector<8x128xf32> to vector<1x8x128xf32>
    tpu.vector_store %arg17[%c1, %c0_141, %c0_142], %556 {strides = array<i32>} : memref<2x8x128xf32, #tpu.memory_space<vmem>>, vector<1x8x128xf32>,
    %c1_143 = arith.constant 1 : index
    %c0_144 = arith.constant 0 : index
    %c0_145 = arith.constant 0 : index
    %557 = vector.load %arg18[%c1_143, %c0_144, %c0_145] : memref<2x8x128xf32, #tpu.memory_space<vmem>>, vector<1x8x128xf32>
    %558 = vector.shape_cast %557 : vector<1x8x128xf32> to vector<8x128xf32>
    %559 = vector.shape_cast %551 : vector<8x128xf32> to vector<1x8x128xf32>
    tpu.vector_store %arg18[%c1_143, %c0_144, %c0_145], %559 {strides = array<i32>} : memref<2x8x128xf32, #tpu.memory_space<vmem>>, vector<1x8x128xf32>,
    %560 = tpu.iota {dimensions = array<i32: 0>} : vector<8x1xi32>
    %c2_i32_146 = arith.constant 2 : i32
    %561 = vector.broadcast %c2_i32_146 : i32 to vector<8x1xi32>
    %562 = arith.cmpi slt, %560, %561 : vector<8x1xi32>
    %cst_147 = arith.constant 0.000000e+00 : f32
    %563 = vector.shape_cast %562 : vector<8x1xi1> to vector<8x1xi1>
    %564 = vector.broadcast %563 : vector<8x1xi1> to vector<8x128xi1>
    %565 = vector.broadcast %cst_147 : f32 to vector<8x128xf32>
    %566 = arith.select %564, %553, %565 : vector<8x128xi1>, vector<8x128xf32>
    %cst_148 = arith.constant dense<0.000000e+00> : vector<128xf32>
    %567 = vector.multi_reduction <add>, %566, %cst_148 [0] : vector<8x128xf32> to vector<128xf32>
    %568 = vector.shape_cast %567 : vector<128xf32> to vector<1x128xf32>
    %cst_149 = arith.constant 5.000000e-01 : f32
    %569 = vector.broadcast %cst_149 : f32 to vector<1x128xf32>
    %570 = arith.mulf %568, %569 : vector<1x128xf32>
    %571 = vector.broadcast %570 : vector<1x128xf32> to vector<8x128xf32>
    %572 = arith.subf %553, %571 : vector<8x128xf32>
    %cst_150 = arith.constant 0.000000e+00 : f32
    %573 = vector.shape_cast %562 : vector<8x1xi1> to vector<8x1xi1>
    %574 = vector.broadcast %573 : vector<8x1xi1> to vector<8x128xi1>
    %575 = vector.broadcast %cst_150 : f32 to vector<8x128xf32>
    %576 = arith.select %574, %572, %575 : vector<8x128xi1>, vector<8x128xf32>
    %577 = arith.mulf %576, %576 : vector<8x128xf32>
    %cst_151 = arith.constant dense<0.000000e+00> : vector<128xf32>
    %578 = vector.multi_reduction <add>, %577, %cst_151 [0] : vector<8x128xf32> to vector<128xf32>
    %579 = vector.shape_cast %578 : vector<128xf32> to vector<1x128xf32>
    %cst_152 = arith.constant 5.000000e-01 : f32
    %580 = vector.broadcast %cst_152 : f32 to vector<1x128xf32>
    %581 = arith.mulf %579, %580 : vector<1x128xf32>
    %582 = vector.broadcast %570 : vector<1x128xf32> to vector<8x128xf32>
    %583 = arith.subf %553, %582 : vector<8x128xf32>
    %cst_153 = arith.constant 9.99999974E-6 : f32
    %584 = vector.broadcast %cst_153 : f32 to vector<1x128xf32>
    %585 = arith.addf %581, %584 : vector<1x128xf32>
    %586 = math.rsqrt %585 : vector<1x128xf32>
    %587 = vector.broadcast %586 : vector<1x128xf32> to vector<8x128xf32>
    %588 = arith.mulf %583, %587 : vector<8x128xf32>
    %c0_154 = arith.constant 0 : index
    %c0_155 = arith.constant 0 : index
    %589 = vector.load %arg8[%c0_154, %c0_155] : memref<1x128xf32, #tpu.memory_space<vmem>>, vector<1x128xf32>
    %590 = vector.broadcast %589 : vector<1x128xf32> to vector<8x128xf32>
    %591 = arith.mulf %588, %590 : vector<8x128xf32>
    %c0_156 = arith.constant 0 : index
    %c0_157 = arith.constant 0 : index
    %592 = vector.load %arg9[%c0_156, %c0_157] : memref<1x128xf32, #tpu.memory_space<vmem>>, vector<1x128xf32>
    %593 = vector.broadcast %592 : vector<1x128xf32> to vector<8x128xf32>
    %594 = arith.addf %591, %593 : vector<8x128xf32>
    %c0_158 = arith.constant 0 : index
    %c0_159 = arith.constant 0 : index
    %595 = vector.load %arg10[%c0_158, %c0_159] : memref<128x8xf32, #tpu.memory_space<vmem>>, vector<128x8xf32>
    %cst_160 = arith.constant dense<0.000000e+00> : vector<8x8xf32>
    %596 = tpu.matmul %594, %595, %cst_160 {dimension_numbers = #tpu.dot_dimension_numbers<[1], [0], [0], [1], [0, 0, 1, 1], [], []>} : vector<8x128xf32>, vector<128x8xf32>, vector<8x8xf32> -> vector<8x8xf32>
    %c0_161 = arith.constant 0 : index
    %c0_162 = arith.constant 0 : index
    %597 = vector.load %arg11[%c0_161, %c0_162] : memref<1x8xf32, #tpu.memory_space<vmem>>, vector<1x8xf32>
    %598 = vector.broadcast %597 : vector<1x8xf32> to vector<8x8xf32>
    %599 = arith.addf %596, %598 : vector<8x8xf32>
    %cst_163 = arith.constant 0.000000e+00 : f32
    %600 = vector.broadcast %cst_163 : f32 to vector<8x8xf32>
    %601 = arith.maximumf %599, %600 : vector<8x8xf32>
    %cst_164 = arith.constant 0.000000e+00 : f32
    %602 = vector.shape_cast %562 : vector<8x1xi1> to vector<8x1xi1>
    %603 = vector.broadcast %602 : vector<8x1xi1> to vector<8x8xi1>
    %604 = vector.broadcast %cst_164 : f32 to vector<8x8xf32>
    %605 = arith.select %603, %601, %604 : vector<8x8xi1>, vector<8x8xf32>
    %cst_165 = arith.constant dense<0.000000e+00> : vector<8xf32>
    %606 = vector.multi_reduction <add>, %605, %cst_165 [0] : vector<8x8xf32> to vector<8xf32>
    %607 = vector.shape_cast %606 : vector<8xf32> to vector<1x8xf32>
    %cst_166 = arith.constant 5.000000e-01 : f32
    %608 = vector.broadcast %cst_166 : f32 to vector<1x8xf32>
    %609 = arith.mulf %607, %608 : vector<1x8xf32>
    %610 = vector.broadcast %609 : vector<1x8xf32> to vector<8x8xf32>
    %611 = arith.subf %601, %610 : vector<8x8xf32>
    %cst_167 = arith.constant 0.000000e+00 : f32
    %612 = vector.shape_cast %562 : vector<8x1xi1> to vector<8x1xi1>
    %613 = vector.broadcast %612 : vector<8x1xi1> to vector<8x8xi1>
    %614 = vector.broadcast %cst_167 : f32 to vector<8x8xf32>
    %615 = arith.select %613, %611, %614 : vector<8x8xi1>, vector<8x8xf32>
    %616 = arith.mulf %615, %615 : vector<8x8xf32>
    %cst_168 = arith.constant dense<0.000000e+00> : vector<8xf32>
    %617 = vector.multi_reduction <add>, %616, %cst_168 [0] : vector<8x8xf32> to vector<8xf32>
    %618 = vector.shape_cast %617 : vector<8xf32> to vector<1x8xf32>
    %cst_169 = arith.constant 5.000000e-01 : f32
    %619 = vector.broadcast %cst_169 : f32 to vector<1x8xf32>
    %620 = arith.mulf %618, %619 : vector<1x8xf32>
    %621 = vector.broadcast %609 : vector<1x8xf32> to vector<8x8xf32>
    %622 = arith.subf %601, %621 : vector<8x8xf32>
    %cst_170 = arith.constant 9.99999974E-6 : f32
    %623 = vector.broadcast %cst_170 : f32 to vector<1x8xf32>
    %624 = arith.addf %620, %623 : vector<1x8xf32>
    %625 = math.rsqrt %624 : vector<1x8xf32>
    %626 = vector.broadcast %625 : vector<1x8xf32> to vector<8x8xf32>
    %627 = arith.mulf %622, %626 : vector<8x8xf32>
    %c0_171 = arith.constant 0 : index
    %c0_172 = arith.constant 0 : index
    %628 = vector.load %arg12[%c0_171, %c0_172] : memref<1x8xf32, #tpu.memory_space<vmem>>, vector<1x8xf32>
    %629 = vector.broadcast %628 : vector<1x8xf32> to vector<8x8xf32>
    %630 = arith.mulf %627, %629 : vector<8x8xf32>
    %c0_173 = arith.constant 0 : index
    %c0_174 = arith.constant 0 : index
    %631 = vector.load %arg13[%c0_173, %c0_174] : memref<1x8xf32, #tpu.memory_space<vmem>>, vector<1x8xf32>
    %632 = vector.broadcast %631 : vector<1x8xf32> to vector<8x8xf32>
    %633 = arith.addf %630, %632 : vector<8x8xf32>
    %c0_175 = arith.constant 0 : index
    %c0_176 = arith.constant 0 : index
    %634 = vector.load %arg14[%c0_175, %c0_176] : memref<8x1xf32, #tpu.memory_space<vmem>>, vector<8x1xf32>
    %cst_177 = arith.constant dense<0.000000e+00> : vector<8x1xf32>
    %635 = tpu.matmul %633, %634, %cst_177 {dimension_numbers = #tpu.dot_dimension_numbers<[1], [0], [0], [1], [0, 0, 1, 1], [], []>} : vector<8x8xf32>, vector<8x1xf32>, vector<8x1xf32> -> vector<8x1xf32>
    %c0_178 = arith.constant 0 : index
    %c0_179 = arith.constant 0 : index
    %636 = vector.load %arg15[%c0_178, %c0_179] : memref<1x1xf32, #tpu.memory_space<vmem>>, vector<1x1xf32>
    %637 = vector.broadcast %636 : vector<1x1xf32> to vector<8x1xf32>
    %638 = arith.addf %635, %637 : vector<8x1xf32>
    %c0_180 = arith.constant 0 : index
    %c0_181 = arith.constant 0 : index
    %639 = vector.load %arg16[%c0_180, %c0_181] : memref<8x1xf32, #tpu.memory_space<vmem>>, vector<8x1xf32>
    tpu.vector_store %arg16[%c0_180, %c0_181], %638 {strides = array<i32>} : memref<8x1xf32, #tpu.memory_space<vmem>>, vector<8x1xf32>,
    return
  }
  func.func @transform_0(%arg0: i32) -> (i32, i32) {
    %c0_i32 = arith.constant 0 : i32
    %c0_i32_0 = arith.constant 0 : i32
    %c0_i32_1 = arith.constant 0 : i32
    return %c0_i32, %c0_i32_0 : i32, i32
  }
  func.func @transform_1(%arg0: i32) -> (i32, i32) {
    %c0_i32 = arith.constant 0 : i32
    %c0_i32_0 = arith.constant 0 : i32
    %c0_i32_1 = arith.constant 0 : i32
    return %c0_i32, %c0_i32_0 : i32, i32
  }
  func.func @transform_2(%arg0: i32) -> (i32, i32) {
    %c0_i32 = arith.constant 0 : i32
    %c0_i32_0 = arith.constant 0 : i32
    %c0_i32_1 = arith.constant 0 : i32
    return %c0_i32, %c0_i32_0 : i32, i32
  }
  func.func @transform_3(%arg0: i32) -> (i32, i32) {
    %c0_i32 = arith.constant 0 : i32
    %c0_i32_0 = arith.constant 0 : i32
    %c0_i32_1 = arith.constant 0 : i32
    return %c0_i32, %c0_i32_0 : i32, i32
  }
  func.func @transform_4(%arg0: i32) -> (i32, i32) {
    %c0_i32 = arith.constant 0 : i32
    %c0_i32_0 = arith.constant 0 : i32
    %c0_i32_1 = arith.constant 0 : i32
    return %c0_i32, %c0_i32_0 : i32, i32
  }
  func.func @transform_5(%arg0: i32) -> (i32, i32) {
    %c0_i32 = arith.constant 0 : i32
    %c0_i32_0 = arith.constant 0 : i32
    %c0_i32_1 = arith.constant 0 : i32
    return %c0_i32, %c0_i32_0 : i32, i32
  }
  func.func @transform_6(%arg0: i32) -> (i32, i32) {
    %c0_i32 = arith.constant 0 : i32
    %c0_i32_0 = arith.constant 0 : i32
    %c0_i32_1 = arith.constant 0 : i32
    return %c0_i32, %c0_i32_0 : i32, i32
  }
  func.func @transform_7(%arg0: i32) -> (i32, i32) {
    %c0_i32 = arith.constant 0 : i32
    %c0_i32_0 = arith.constant 0 : i32
    %c0_i32_1 = arith.constant 0 : i32
    return %c0_i32, %c0_i32_0 : i32, i32
  }
  func.func @transform_8(%arg0: i32) -> (i32, i32) {
    %c0_i32 = arith.constant 0 : i32
    %c0_i32_0 = arith.constant 0 : i32
    %c0_i32_1 = arith.constant 0 : i32
    return %c0_i32, %c0_i32_0 : i32, i32
  }
  func.func @transform_9(%arg0: i32) -> (i32, i32) {
    %c0_i32 = arith.constant 0 : i32
    %c0_i32_0 = arith.constant 0 : i32
    %c0_i32_1 = arith.constant 0 : i32
    return %c0_i32, %c0_i32_0 : i32, i32
  }
  func.func @transform_10(%arg0: i32) -> (i32, i32) {
    %c0_i32 = arith.constant 0 : i32
    %c0_i32_0 = arith.constant 0 : i32
    %c0_i32_1 = arith.constant 0 : i32
    return %c0_i32, %c0_i32_0 : i32, i32
  }
  func.func @transform_11(%arg0: i32) -> (i32, i32) {
    %c0_i32 = arith.constant 0 : i32
    %c0_i32_0 = arith.constant 0 : i32
    %c0_i32_1 = arith.constant 0 : i32
    return %c0_i32, %c0_i32_0 : i32, i32
  }
  func.func @transform_12(%arg0: i32) -> (i32, i32) {
    %c0_i32 = arith.constant 0 : i32
    %c0_i32_0 = arith.constant 0 : i32
    %c0_i32_1 = arith.constant 0 : i32
    return %c0_i32, %c0_i32_0 : i32, i32
  }
  func.func @transform_13(%arg0: i32) -> (i32, i32) {
    %c0_i32 = arith.constant 0 : i32
    %c0_i32_0 = arith.constant 0 : i32
    %c0_i32_1 = arith.constant 0 : i32
    return %c0_i32, %c0_i32_0 : i32, i32
  }
  func.func @transform_14(%arg0: i32) -> (i32, i32) {
    %c0_i32 = arith.constant 0 : i32
    %c0_i32_0 = arith.constant 0 : i32
    %c0_i32_1 = arith.constant 0 : i32
    return %c0_i32, %c0_i32_0 : i32, i32
  }
  func.func @transform_15(%arg0: i32) -> (i32, i32) {
    %c0_i32 = arith.constant 0 : i32
    %c0_i32_0 = arith.constant 0 : i32
    %c0_i32_1 = arith.constant 0 : i32
    return %c0_i32, %c0_i32_0 : i32, i32
  }
  func.func @transform_16(%arg0: i32) -> (i32, i32, i32) {
    %c0_i32 = arith.constant 0 : i32
    %c0_i32_0 = arith.constant 0 : i32
    %c0_i32_1 = arith.constant 0 : i32
    %c0_i32_2 = arith.constant 0 : i32
    return %c0_i32, %c0_i32_0, %c0_i32_1 : i32, i32, i32
  }
  func.func @transform_17(%arg0: i32) -> (i32, i32, i32) {
    %c0_i32 = arith.constant 0 : i32
    %c0_i32_0 = arith.constant 0 : i32
    %c0_i32_1 = arith.constant 0 : i32
    %c0_i32_2 = arith.constant 0 : i32
    return %c0_i32, %c0_i32_0, %c0_i32_1 : i32, i32, i32
  }
}

</mosaic_0001>

<bundles_post_ra>
// kernel: tpu_custom_call.1
= control target key start
LH: loop header
LB: loop body
LE: loop exit
PB: predicated region body
PF: predicated region fallthrough
CT: control target
= control target key end

     0   :  { %s5669_s0 = inlined_call_operand.vmem [shape: f32[64,4], index: 0, kind: input, shape index: {}]   ;;  %s5670_s1 = inlined_call_operand.vmem [shape: bf16[4,512], index: 1, kind: input, shape index: {}]   ;;  %s5671_s2 = inlined_call_operand.hbm [shape: bf16[128,512], index: 2, kind: input, shape index: {}]   ;;  %s5672_s3 = inlined_call_operand.vmem [shape: f32[1,512], index: 3, kind: input, shape index: {}]   ;;  %s5673_s4 = inlined_call_operand.hbm [shape: bf16[128,512], index: 4, kind: input, shape index: {}]   ;;  %s5674_s5 = inlined_call_operand.hbm [shape: bf16[128,512], index: 5, kind: input, shape index: {}]   ;;  %s5675_s6 = inlined_call_operand.vmem [shape: f32[1,512], index: 6, kind: input, shape index: {}]   ;;  %s5676_s7 = inlined_call_operand.vmem [shape: f32[1,128], index: 7, kind: input, shape index: {}]   ;;  %s5677_s8 = inlined_call_operand.vmem [shape: f32[1,128], index: 8, kind: input, shape index: {}]   ;;  %s5678_s9 = inlined_call_operand.vmem [shape: f32[128,8], index: 9, kind: input, shape index: {}]   ;;  %s5679_s10 = inlined_call_operand.vmem [shape: f32[1,8], index: 10, kind: input, shape index: {}]   ;;  %s5680_s11 = inlined_call_operand.vmem [shape: f32[1,8], index: 11, kind: input, shape index: {}]   ;;  %s5681_s12 = inlined_call_operand.vmem [shape: f32[1,8], index: 12, kind: input, shape index: {}]   ;;  %s5682_s13 = inlined_call_operand.vmem [shape: f32[8,1], index: 13, kind: input, shape index: {}]   ;;  %s5683_s14 = inlined_call_operand.<no memory space> [shape: f32[1,1], index: 14, kind: input, shape index: {}]   ;;  %s5684_s15 = inlined_call_operand.vmem [shape: f32[8,1], index: 15, kind: output, shape index: {0}]   ;;  %s5685_s16 = inlined_call_operand.hbm [shape: f32[2,8,128], index: 16, kind: output, shape index: {1}]   ;;  %s5686_s17 = inlined_call_operand.hbm [shape: f32[2,8,128], index: 17, kind: output, shape index: {2}]  }
   0x1   :  { %5697 = sst [smem:[#allocation42_spill]] %s5669_s0  ;;  %v23_v0 = vstv %s5683_s14 }
   0x2   :  { %5698 = sst [smem:[#allocation43_spill]] %s5670_s1  ;;  %24 = vst [vmem:[#allocation4] sm:$0x1] %v23_v0 }
   0x3   :  { %25 = vsyncpa [#allocation6], 0 }
   0x4   :  { %26 = vsyncpa [#allocation9], 0 }
   0x5   :  { %27 = vsyncpa [#allocation7], 0 }
   0x6   :  { %28 = vsyncpa [#allocation13], 0  ;;  %s4176_s26 = smov [#allocation8]   ;;  %s4177_s28 = smov [#allocation5]  }
   0x7   :  { %s52_s27 = sshll.u32 %s4176_s26, 4  ;;  %s38_s29 = sshll.u32 %s4177_s28, 4  ;;  %s53_s27 = int_to_ptr.vmem [resolvable:$true] %s52_s27  ;;  %s4283_s29 = int_to_ptr.vmem [resolvable:$true] %s38_s29 }
   0x8   :  { %s4058_s18 = scalar_lea.hbm %s5673_s4, 4096 }
   0x9   :  { %p4059_p0 = scmp.ne.s32.totalorder %s5673_s4, %s4058_s18  ;;  %p4062_p1 = scmp.lt.u32.totalorder %s4058_s18, %s5673_s4 }
   0xb   :  { %p4064_p2 = pnand %p4062_p1, %p4059_p0 }
   0xd   :  { %4067 = shalt.err (!%p4064_p2)
}
   0xe   :  { %s4068_s21 = scalar_lea.vmem %s53_s27, 4096  ;;  %p4073_p4 = scmp.lt.s32.totalorder %s53_s27, %s53_s27 }
   0xf   :  { %p4069_p3 = scmp.ne.s32.totalorder %s53_s27, %s4068_s21  ;;  %p4074_p5 = scmp.lt.s32.totalorder %s4068_s21, %s4068_s21 }
  0x11   :  { %p4075_p6 = por %p4074_p5, %p4073_p4 }
  0x13   :  { %p4076_p7 = pnand %p4075_p6, %p4069_p3 }
  0x15   :  { %4079 = shalt.err (!%p4076_p7)
}
  0x16   :  { %s4178_s22 = smov 256   ;;  %s4179_s23 = smov 16  }
  0x17   :  { %58 = dma.hbm_to_vmem [thread:$0]  %s5673_s4, 4096, %s53_s27, [#allocation9], %s4178_s22, %s4178_s22, %s4179_s23  }
  0x18   :  { %s4080_s0 = scalar_lea.hbm %s5671_s2, 4096 }
  0x19   :  { %p4081_p8 = scmp.ne.s32.totalorder %s5671_s2, %s4080_s0  ;;  %p4084_p9 = scmp.lt.u32.totalorder %s4080_s0, %s5671_s2 }
  0x1b   :  { %p4086_p10 = pnand %p4084_p9, %p4081_p8 }
  0x1d   :  { %4089 = shalt.err (!%p4086_p10)
}
  0x1e   :  { %s4090_s14 = scalar_lea.vmem %s4283_s29, 4096  ;;  %p4095_p12 = scmp.lt.s32.totalorder %s4283_s29, %s4283_s29 }
  0x1f   :  { %p4091_p11 = scmp.ne.s32.totalorder %s4283_s29, %s4090_s14  ;;  %p4096_p13 = scmp.lt.s32.totalorder %s4090_s14, %s4090_s14 }
  0x21   :  { %p4097_p0 = por %p4096_p13, %p4095_p12 }
  0x23   :  { %p4098_p1 = pnand %p4097_p0, %p4091_p11 }
  0x25   :  { %4101 = shalt.err (!%p4098_p1)
}
  0x26   :  { %44 = dma.hbm_to_vmem [thread:$0]  %s5671_s2, 4096, %s4283_s29, [#allocation6], %s4178_s22, %s4178_s22, %s4179_s23  }
  0x27   :  { %s4180_s20 = smov [#allocation10]   ;;  %s4102_s26 = scalar_lea.hbm %s5674_s5, 4096 }
  0x28   :  { %s64_s21 = sshll.u32 %s4180_s20, 4  ;;  %p4103_p2 = scmp.ne.s32.totalorder %s5674_s5, %s4102_s26  ;;  %s65_s21 = int_to_ptr.vmem [resolvable:$true] %s64_s21 }
  0x29   :  { %p4106_p3 = scmp.lt.u32.totalorder %s4102_s26, %s5674_s5 }
  0x2b   :  { %p4108_p4 = pnand %p4106_p3, %p4103_p2 }
  0x2d   :  { %4111 = shalt.err (!%p4108_p4)
}
  0x2e   :  { %s4112_s19 = scalar_lea.vmem %s65_s21, 4096  ;;  %p4117_p6 = scmp.lt.s32.totalorder %s65_s21, %s65_s21 }
  0x2f   :  { %p4113_p5 = scmp.ne.s32.totalorder %s65_s21, %s4112_s19  ;;  %p4118_p7 = scmp.lt.s32.totalorder %s4112_s19, %s4112_s19 }
  0x31   :  { %p4119_p8 = por %p4118_p7, %p4117_p6 }
  0x33   :  { %p4120_p9 = pnand %p4119_p8, %p4113_p5 }
  0x35   :  { %4123 = shalt.err (!%p4120_p9)
}
  0x36   :  { %70 = dma.hbm_to_vmem [thread:$0]  %s5674_s5, 4096, %s65_s21, [#allocation9], %s4178_s22, %s4178_s22, %s4179_s23  }
  0x37   :  { %4168 = dma.done.wait [#allocation6], 4096  }
  0x38   :  { %4169 = vsyncadd [#allocation6], 4294963200 }
  0x39   :  { %4170 = dma.done.wait [#allocation9], 8192  }
  0x3a   :  { %4171 = vsyncadd [#allocation9], 4294959104  ;;  %v114_v1 = vlaneseq  ;;  %v4181_v2 = vmov 1983009808   ;;  %v5692_v4 = vmov 0   ;;  %s5700_s5 = sld [smem:[#allocation43_spill]] }
  0x3b   :  { %v137_v3 = vunpack.c.l.s4 %v4181_v2  ;;  %210 = vmatprep.mubr.bf16.mxu0 %v5692_v4  ;;  %283 = vmatprep.mubr.bf16.mxu1 %v5692_v4  ;;  %vm165_vm0 = vcmask 1041408   ;;  %s5701_s4 = sld [smem:[#allocation42_spill]]  ;;  %v4350_v16 = vld [vmem:[#allocation5 + $0x4] ss:$16 sps:$4 sm:$0xff]   ;;  %v4354_v20 = vld [vmem:[#allocation5 + $0xc] ss:$16 sps:$4 sm:$0xff]  }
  0x3c   :  { %v4337_v5 = vshrl.u32 %v114_v1, 7  ;;  %vm152_vm1 = vcmask 31744   ;;  %v4356_v21 = vld [vmem:[#allocation5] ss:$16 sps:$4 sm:$0xff]   ;;  %v4360_v22 = vld [vmem:[#allocation5 + $0x24] ss:$16 sps:$4 sm:$0xff]  }
  0x3d   :  { %v138_v6 = vunpack.c.0.s8 %v137_v3  ;;  %v4362_v23 = vld [vmem:[#allocation5 + $0x8] ss:$16 sps:$4 sm:$0xff]   ;;  %v4366_v24 = vld [vmem:[#allocation5 + $0x20] ss:$16 sps:$4 sm:$0xff]   ;;  %v4368_v25 = vld [vmem:[#allocation5 + $0x2c] ss:$16 sps:$4 sm:$0xff]  }
  0x3e   :  { %5699 = vst [vmem:[#allocation18_spill] sm:$0xff] %v4337_v5  ;;  %v4380_v28 = vld [vmem:[#allocation5 + $0x44] ss:$16 sps:$4 sm:$0xff]   ;;  %v4383_v29 = vld [vmem:[#allocation5 + $0x28] ss:$16 sps:$4 sm:$0xff]   ;;  %v5691_v60 = vsub.s32 0, %v4337_v5 }
  0x3f   :  { %v141_v7 = vsub.s32 %v138_v6, %v4337_v5  ;;  %v4387_v31 = vld [vmem:[#allocation5 + $0x4c] ss:$16 sps:$4 sm:$0xff]   ;;  %v4390_v32 = vld [vmem:[#allocation5 + $0x40] ss:$16 sps:$4 sm:$0xff]   ;;  %v4393_v33 = vld [vmem:[#allocation5 + $0x64] ss:$16 sps:$4 sm:$0xff]  }
  0x40   :  { %v111_v8 = vld [vmem:[%s5700_s5] sm:$0xff]  ;;  %v4396_v34 = vld [vmem:[#allocation5 + $0x48] ss:$16 sps:$4 sm:$0xff]   ;;  %v5690_v61 = vsub.s32 2, %v4337_v5  ;;  %v5689_v63 = vsub.s32 1, %v4337_v5  ;;  %v5688_v0 = vsub.s32 3, %v4337_v5 }
  0x41   :  { %v142_v9 = vrot.slane %v111_v8, %v141_v7  ;;  %v135_v10 = vcombine.high %v111_v8, %v111_v8  ;;  %v99_v11 = vld [vmem:[%s5701_s4] sm:$0xff]  ;;  %v100_v12 = vld [vmem:[%s5701_s4 + $0x8] sm:$0xff]  ;;  %v101_v26 = vld [vmem:[%s5701_s4 + $0x10] sm:$0xff]  ;;  %vm4184_vm2 = vmmov 0   ;;  %vm3164_vm4 = vcmask 64512   ;;  %s4186_s5 = smov [#allocation11]  }
  0x42   :  { %v107_v19 = vpack.c.bf16 %v100_v12, %v99_v11  ;;  %v102_v27 = vld [vmem:[%s5701_s4 + $0x18] sm:$0xff]  ;;  %v4403_v36 = vld [vmem:[#allocation5 + $0x60] ss:$16 sps:$4 sm:$0xff]   ;;  %v104_v38 = vld [vmem:[%s5701_s4 + $0x28] sm:$0xff] }
  0x43   :  { %v150_v13 = vcombine.high %v142_v9, %v142_v9  ;;  %v167_v14 = vsel %vm165_vm0, %v142_v9, 0  ;;  %v149_v15 = vrot.slane %v135_v10, %v141_v7  ;;  %v108_v30 = vpack.c.bf16 %v102_v27, %v101_v26  ;;  %v4400_v35 = vld [vmem:[#allocation5 + $0x6c] ss:$16 sps:$4 sm:$0xff]   ;;  %v4414_v39 = vld [vmem:[#allocation5 + $0x84] ss:$16 sps:$4 sm:$0xff]  }
  0x44   :  { %v103_v37 = vld [vmem:[%s5701_s4 + $0x20] sm:$0xff]  ;;  %v4417_v40 = vld [vmem:[#allocation5 + $0x68] ss:$16 sps:$4 sm:$0xff]   ;;  %v105_v48 = vld [vmem:[%s5701_s4 + $0x30] sm:$0xff] }
  0x45   :  { %3331 = vmatprep.subr.msk.bf16.mxu0 %vm165_vm0, %v150_v13  ;;  %v151_v17 = vcombine.high %v149_v15, %v149_v15  ;;  %v173_v18 = vsel %vm165_vm0, %v149_v15, 0  ;;  %v109_v41 = vpack.c.bf16 %v104_v38, %v103_v37  ;;  %v4421_v42 = vld [vmem:[#allocation5 + $0x80] ss:$16 sps:$4 sm:$0xff]   ;;  %v4423_v43 = vld [vmem:[#allocation5 + $0x8c] ss:$16 sps:$4 sm:$0xff]  }
  0x46   :  { %179 = vmatpush1.bf16.msra.mxu0 %v167_v14  ;;  %v4426_v44 = vld [vmem:[#allocation5 + $0x88] ss:$16 sps:$4 sm:$0xff]   ;;  %v4428_v45 = vld [vmem:[#allocation5 + $0xa4] ss:$16 sps:$4 sm:$0xff]   ;;  %v4431_v46 = vld [vmem:[#allocation5 + $0xac] ss:$16 sps:$4 sm:$0xff]  }
  0x47   :  { %3336 = vmatprep.subr.msk.bf16.mxu1 %vm165_vm0, %v151_v17  ;;  %555 = vmatprep.subr.bf16.mxu0 %v4350_v16  ;;  %v4434_v47 = vld [vmem:[#allocation5 + $0xa0] ss:$16 sps:$4 sm:$0xff]   ;;  %v106_v49 = vld [vmem:[%s5701_s4 + $0x38] sm:$0xff] }
  0x48   :  { %252 = vmatpush1.bf16.msra.mxu1 %v173_v18  ;;  %v4444_v50 = vld [vmem:[#allocation5 + $0xc4] ss:$16 sps:$4 sm:$0xff]   ;;  %v4448_v51 = vld [vmem:[#allocation5 + $0xa8] ss:$16 sps:$4 sm:$0xff]   ;;  %v4452_v52 = vld [vmem:[#allocation5 + $0xcc] ss:$16 sps:$4 sm:$0xff]   ;;  %v110_v54 = vpack.c.bf16 %v106_v49, %v105_v48 }
  0x49   :  { %3332 = vmatmul.mubr.msk.bf16.vlgmr.msra.gmra.mrb[0].mxu0 %vm152_vm1, %v107_v19  ;;  %596 = vmatprep.subr.bf16.mxu1 %v4354_v20  ;;  %v4456_v53 = vld [vmem:[#allocation5 + $0xc0] ss:$16 sps:$4 sm:$0xff]   ;;  %v4459_v55 = vld [vmem:[#allocation5 + $0xe4] ss:$16 sps:$4 sm:$0xff]   ;;  %v4462_v56 = vld [vmem:[#allocation5 + $0xc8] ss:$16 sps:$4 sm:$0xff]  }
  0x4a   :  { %556 = vmatpush1.bf16.msra.mxu0 %v4356_v21  ;;  %220 = vmatprep.mubr.bf16.mxu0 %v5692_v4  ;;  %v4465_v57 = vld [vmem:[#allocation5 + $0xec] ss:$16 sps:$4 sm:$0xff]   ;;  %v4468_v58 = vld [vmem:[#allocation5 + $0xe0] ss:$16 sps:$4 sm:$0xff]   ;;  %v4474_v59 = vld [vmem:[#allocation5 + $0xe8] ss:$16 sps:$4 sm:$0xff]  }
  0x4b   :  { %3337 = vmatmul.mubr.msk.bf16.vlgmr.msra.gmra.mrb[0].mxu1 %vm152_vm1, %v107_v19  ;;  %557 = vmatprep.subr.bf16.mxu0 %v4360_v22  ;;  %v112_v62 = vld [vmem:[%s5672_s3] sm:$0xf]  ;;  %s3293_s3 = sshll.u32 %s4186_s5, 4  ;;  %s3294_s3 = int_to_ptr.vmem [resolvable:$true] %s3293_s3 }
  0x4c   :  { %597 = vmatpush1.bf16.msra.mxu1 %v4362_v23  ;;  %293 = vmatprep.mubr.bf16.mxu1 %v5692_v4  ;;  %v4532_v2 = vrot.slane %v112_v62, %v5691_v60  ;;  %v4538_v6 = vrot.slane %v112_v62, %v5690_v61  ;;  %v121_v7 = vrot.slane %v112_v62, %v5689_v63  ;;  %s4124_s22 = scalar_lea.vmem %s3294_s3, 256  ;;  %p4129_p11 = scmp.lt.s32.totalorder %s3294_s3, %s3294_s3 }
  0x4d   :  { %598 = vmatprep.subr.bf16.mxu1 %v4368_v25  ;;  %v4544_v10 = vrot.slane %v112_v62, %v5688_v0  ;;  %p4125_p10 = scmp.ne.s32.totalorder %s3294_s3, %s4124_s22  ;;  %p4130_p12 = scmp.lt.s32.totalorder %s4124_s22, %s4124_s22 }
  0x4e   :  { %558 = vmatpush1.bf16.msra.mxu0 %v4366_v24 }
  0x4f   :  { %559 = vmatprep.subr.bf16.mxu0 %v4380_v28  ;;  %p4131_p13 = por %p4130_p12, %p4129_p11 }
  0x50   :  { %599 = vmatpush1.bf16.msra.mxu1 %v4383_v29 }
  0x51   :  { %3333 = vmatmul.mubr.msk.bf16.gmra.mrb[4].mxu0 %vm152_vm1, %v108_v30  ;;  %600 = vmatprep.subr.bf16.mxu1 %v4387_v31  ;;  %p4132_p0 = pnand %p4131_p13, %p4125_p10 }
  0x52   :  { %560 = vmatpush1.bf16.msra.mxu0 %v4390_v32  ;;  %230 = vmatprep.mubr.bf16.mxu0 %v5692_v4 }
  0x53   :  { %3338 = vmatmul.mubr.msk.bf16.gmra.mrb[4].mxu1 %vm152_vm1, %v108_v30  ;;  %561 = vmatprep.subr.bf16.mxu0 %v4393_v33 }
  0x54   :  { %601 = vmatpush1.bf16.msra.mxu1 %v4396_v34  ;;  %303 = vmatprep.mubr.bf16.mxu1 %v5692_v4 }
  0x55   :  { %602 = vmatprep.subr.bf16.mxu1 %v4400_v35 }
  0x56   :  { %562 = vmatpush1.bf16.msra.mxu0 %v4403_v36 }
  0x57   :  { %563 = vmatprep.subr.bf16.mxu0 %v4414_v39 }
  0x58   :  { %603 = vmatpush1.bf16.msra.mxu1 %v4417_v40 }
  0x59   :  { %3334 = vmatmul.mubr.msk.bf16.gmra.mrb[8].mxu0 %vm152_vm1, %v109_v41  ;;  %604 = vmatprep.subr.bf16.mxu1 %v4423_v43 }
  0x5a   :  { %564 = vmatpush1.bf16.msra.mxu0 %v4421_v42  ;;  %240 = vmatprep.mubr.bf16.mxu0 %v5692_v4 }
  0x5b   :  { %3339 = vmatmul.mubr.msk.bf16.gmra.mrb[8].mxu1 %vm152_vm1, %v109_v41  ;;  %565 = vmatprep.subr.bf16.mxu0 %v4428_v45 }
  0x5c   :  { %605 = vmatpush1.bf16.msra.mxu1 %v4426_v44  ;;  %313 = vmatprep.mubr.bf16.mxu1 %v5692_v4 }
  0x5d   :  { %606 = vmatprep.subr.bf16.mxu1 %v4431_v46 }
  0x5e   :  { %566 = vmatpush1.bf16.msra.mxu0 %v4434_v47 }
  0x5f   :  { %567 = vmatprep.subr.bf16.mxu0 %v4444_v50 }
  0x60   :  { %607 = vmatpush1.bf16.msra.mxu1 %v4448_v51 }
  0x61   :  { %3335 = vmatmul.mubr.msk.bf16.gmra.mrb[12].mxu0 %vm152_vm1, %v110_v54  ;;  %608 = vmatprep.subr.bf16.mxu1 %v4452_v52 }
  0x62   :  { %568 = vmatpush1.bf16.msra.mxu0 %v4456_v53  ;;  %587 = vmatprep.mubr.bf16.mxu0 %v5692_v4 }
  0x63   :  { %3340 = vmatmul.mubr.msk.bf16.gmra.mrb[12].mxu1 %vm152_vm1, %v110_v54  ;;  %569 = vmatprep.subr.bf16.mxu0 %v4459_v55 }
  0x64   :  { %609 = vmatpush1.bf16.msra.mxu1 %v4462_v56  ;;  %628 = vmatprep.mubr.bf16.mxu1 %v5692_v4 }
  0x65   :  { %610 = vmatprep.subr.bf16.mxu1 %v4465_v57 }
  0x66   :  { %570 = vmatpush1.bf16.msra.mxu0 %v4468_v58 }
  0x67   :  { %674 = vmatprep.subr.bf16.mxu0 %v4350_v16 }
  0x68   :  { %611 = vmatpush1.bf16.msra.mxu1 %v4474_v59 }
  0x69   :  { %588 = vmatmul.mubr.bf16.vlgmr.msra.gmra.mrb[16].mxu0 %v5692_v4  ;;  %715 = vmatprep.subr.bf16.mxu1 %v4354_v20 }
  0x6a   :  { %675 = vmatpush1.bf16.msra.mxu0 %v4356_v21  ;;  %706 = vmatprep.mubr.bf16.mxu0 %v5692_v4 }
  0x6b   :  { %629 = vmatmul.mubr.bf16.vlgmr.msra.gmra.mrb[16].mxu1 %v5692_v4  ;;  %676 = vmatprep.subr.bf16.mxu0 %v4360_v22 }
  0x6c   :  { %716 = vmatpush1.bf16.msra.mxu1 %v4362_v23  ;;  %747 = vmatprep.mubr.bf16.mxu1 %v5692_v4 }
  0x6d   :  { %717 = vmatprep.subr.bf16.mxu1 %v4368_v25 }
  0x6e   :  { %677 = vmatpush1.bf16.msra.mxu0 %v4366_v24 }
  0x6f   :  { %678 = vmatprep.subr.bf16.mxu0 %v4380_v28 }
  0x70   :  { %718 = vmatpush1.bf16.msra.mxu1 %v4383_v29 }
  0x71   :  { %719 = vmatprep.subr.bf16.mxu1 %v4387_v31 }
  0x72   :  { %679 = vmatpush1.bf16.msra.mxu0 %v4390_v32 }
  0x73   :  { %680 = vmatprep.subr.bf16.mxu0 %v4393_v33 }
  0x74   :  { %720 = vmatpush1.bf16.msra.mxu1 %v4396_v34 }
  0x75   :  { %721 = vmatprep.subr.bf16.mxu1 %v4400_v35 }
  0x76   :  { %681 = vmatpush1.bf16.msra.mxu0 %v4403_v36 }
  0x77   :  { %682 = vmatprep.subr.bf16.mxu0 %v4414_v39 }
  0x78   :  { %722 = vmatpush1.bf16.msra.mxu1 %v4417_v40 }
  0x79   :  { %723 = vmatprep.subr.bf16.mxu1 %v4423_v43 }
  0x7a   :  { %683 = vmatpush1.bf16.msra.mxu0 %v4421_v42 }
  0x7b   :  { %684 = vmatprep.subr.bf16.mxu0 %v4428_v45 }
  0x7c   :  { %724 = vmatpush1.bf16.msra.mxu1 %v4426_v44 }
  0x7d   :  { %725 = vmatprep.subr.bf16.mxu1 %v4431_v46 }
  0x7e   :  { %685 = vmatpush1.bf16.msra.mxu0 %v4434_v47 }
  0x7f   :  { %686 = vmatprep.subr.bf16.mxu0 %v4444_v50 }
  0x80   :  { %726 = vmatpush1.bf16.msra.mxu1 %v4448_v51 }
  0x81   :  { %727 = vmatprep.subr.bf16.mxu1 %v4452_v52 }
  0x82   :  { %687 = vmatpush1.bf16.msra.mxu0 %v4456_v53 }
  0x83   :  { %688 = vmatprep.subr.bf16.mxu0 %v4459_v55 }
  0x84   :  { %728 = vmatpush1.bf16.msra.mxu1 %v4462_v56 }
  0x85   :  { %729 = vmatprep.subr.bf16.mxu1 %v4465_v57 }
  0x86   :  { %689 = vmatpush1.bf16.msra.mxu0 %v4468_v58 }
  0x87   :  { %794 = vmatprep.subr.bf16.mxu0 %v4350_v16 }
  0x88   :  { %730 = vmatpush1.bf16.msra.mxu1 %v4474_v59 }
  0x89   :  { %835 = vmatprep.subr.bf16.mxu1 %v4354_v20 }
 0x11c   :  { %v4528_v1 = vpop.f32.mrb[0].mxu0 }
 0x11d   :  { %v4534_v3 = vpop.f32.mrb[1].mxu0 }
 0x11e   :  { %v216_v8 = vpop.f32.mrb[2].mxu0  ;;  %v285_v9 = vpop.f32.mrb[0].mxu1 }
 0x11f   :  { %v4547_v11 = vadd.f32 %v216_v8, %v4532_v2  ;;  %v218_v12 = vpop.f32.mrb[3].mxu0  ;;  %v287_v13 = vpop.f32.mrb[1].mxu1 }
 0x120   :  { %v4549_v14 = vadd.f32 %v218_v12, %v121_v7  ;;  %v289_v15 = vpop.f32.mrb[2].mxu1 }
 0x121   :  { %v4552_v17 = vadd.f32 %v289_v15, %v4538_v6  ;;  %v291_v18 = vpop.f32.mrb[3].mxu1 }
 0x122   :  { %v4555_v19 = vadd.f32 %v291_v18, %v4544_v10 }
 0x124   :  { %v222_v26 = vpop.f32.mrb[4].mxu0 }
 0x125   :  { %v4558_v27 = vadd.f32 %v222_v26, %v4532_v2  ;;  %v224_v30 = vpop.f32.mrb[5].mxu0 }
 0x126   :  { %v4560_v37 = vadd.f32 %v224_v30, %v121_v7  ;;  %v226_v38 = vpop.f32.mrb[6].mxu0  ;;  %v295_v41 = vpop.f32.mrb[4].mxu1 }
 0x127   :  { %v4563_v48 = vadd.f32 %v226_v38, %v4532_v2  ;;  %v228_v49 = vpop.f32.mrb[7].mxu0  ;;  %v4566_v54 = vadd.f32 %v295_v41, %v4538_v6  ;;  %v297_v62 = vpop.f32.mrb[5].mxu1 }
 0x128   :  { %v4568_v8 = vadd.f32 %v228_v49, %v121_v7  ;;  %v4571_v12 = vadd.f32 %v297_v62, %v4544_v10  ;;  %v299_v15 = vpop.f32.mrb[6].mxu1 }
 0x129   :  { %5702 = vst [vmem:[#allocation19_spill] sm:$0xff] %v4563_v48  ;;  %v4574_v18 = vadd.f32 %v299_v15, %v4538_v6  ;;  %v301_v26 = vpop.f32.mrb[7].mxu1 }
 0x12a   :  { %5703 = vst [vmem:[#allocation20_spill] sm:$0xff] %v4568_v8  ;;  %5704 = vst [vmem:[#allocation21_spill] sm:$0xff] %v4571_v12  ;;  %v4577_v30 = vadd.f32 %v301_v26, %v4544_v10 }
 0x12b   :  { %5705 = vst [vmem:[#allocation22_spill] sm:$0xff] %v4574_v18 }
 0x12c   :  { %5706 = vst [vmem:[#allocation23_spill] sm:$0xff] %v4577_v30  ;;  %v232_v38 = vpop.f32.mrb[8].mxu0 }
 0x12d   :  { %v4580_v0 = vadd.f32 %v232_v38, %v4532_v2  ;;  %v234_v41 = vpop.f32.mrb[9].mxu0 }
 0x12e   :  { %v4582_v63 = vadd.f32 %v234_v41, %v121_v7  ;;  %v236_v49 = vpop.f32.mrb[10].mxu0  ;;  %v305_v61 = vpop.f32.mrb[8].mxu1 }
 0x12f   :  { %5707 = vst [vmem:[#allocation24_spill] sm:$0xff] %v4580_v0  ;;  %v4585_v62 = vadd.f32 %v236_v49, %v4532_v2  ;;  %v238_v60 = vpop.f32.mrb[11].mxu0  ;;  %v4588_v15 = vadd.f32 %v305_v61, %v4538_v6  ;;  %v307_v4 = vpop.f32.mrb[9].mxu1 }
 0x130   :  { %5708 = vst [vmem:[#allocation25_spill] sm:$0xff] %v4582_v63  ;;  %v4590_v5 = vadd.f32 %v238_v60, %v121_v7  ;;  %v4593_v26 = vadd.f32 %v307_v4, %v4544_v10  ;;  %v309_v38 = vpop.f32.mrb[10].mxu1 }
 0x131   :  { %5709 = vst [vmem:[#allocation26_spill] sm:$0xff] %v4585_v62  ;;  %5710 = vst [vmem:[#allocation27_spill] sm:$0xff] %v4588_v15  ;;  %v4596_v0 = vadd.f32 %v309_v38, %v4538_v6  ;;  %v311_v41 = vpop.f32.mrb[11].mxu1 }
 0x132   :  { %5711 = vst [vmem:[#allocation28_spill] sm:$0xff] %v4590_v5  ;;  %5712 = vst [vmem:[#allocation29_spill] sm:$0xff] %v4593_v26  ;;  %v4599_v63 = vadd.f32 %v311_v41, %v4544_v10 }
 0x133   :  { %5713 = vst [vmem:[#allocation30_spill] sm:$0xff] %v4596_v0 }
 0x134   :  { %5714 = vst [vmem:[#allocation31_spill] sm:$0xff] %v4599_v63  ;;  %v242_v49 = vpop.f32.mrb[12].mxu0 }
 0x135   :  { %v4602_v62 = vadd.f32 %v242_v49, %v4532_v2  ;;  %v244_v61 = vpop.f32.mrb[13].mxu0 }
 0x136   :  { %v4604_v15 = vadd.f32 %v244_v61, %v121_v7  ;;  %v246_v60 = vpop.f32.mrb[14].mxu0  ;;  %v315_v5 = vpop.f32.mrb[12].mxu1 }
 0x137   :  { %5715 = vst [vmem:[#allocation32_spill] sm:$0xff] %v4602_v62  ;;  %v4607_v4 = vadd.f32 %v246_v60, %v4532_v2  ;;  %v248_v26 = vpop.f32.mrb[15].mxu0  ;;  %v4610_v38 = vadd.f32 %v315_v5, %v4538_v6  ;;  %v317_v0 = vpop.f32.mrb[13].mxu1  ;;  %v213_v60 = vadd.f32 %v4528_v1, %v4532_v2  ;;  %v215_v5 = vadd.f32 %v4534_v3, %v121_v7 }
 0x138   :  { %5716 = vst [vmem:[#allocation33_spill] sm:$0xff] %v4604_v15  ;;  %v4612_v30 = vadd.f32 %v248_v26, %v121_v7  ;;  %v4615_v41 = vadd.f32 %v317_v0, %v4544_v10  ;;  %v319_v49 = vpop.f32.mrb[14].mxu1  ;;  %v286_v26 = vadd.f32 %v285_v9, %v4538_v6  ;;  %v288_v0 = vadd.f32 %v287_v13, %v4544_v10 }
 0x139   :  { %5717 = vst [vmem:[#allocation34_spill] sm:$0xff] %v4607_v4  ;;  %5718 = vst [vmem:[#allocation35_spill] sm:$0xff] %v4610_v38  ;;  %v4618_v62 = vadd.f32 %v319_v49, %v4538_v6  ;;  %v321_v61 = vpop.f32.mrb[15].mxu1 }
 0x13a   :  { %5719 = vst [vmem:[#allocation36_spill] sm:$0xff] %v4612_v30  ;;  %5720 = vst [vmem:[#allocation37_spill] sm:$0xff] %v4615_v41  ;;  %v4621_v15 = vadd.f32 %v321_v61, %v4544_v10 }
 0x13b   :  { %5721 = vst [vmem:[#allocation38_spill] sm:$0xff] %v4618_v62 }
 0x13c   :  { %5722 = vst [vmem:[#allocation39_spill] sm:$0xff] %v4621_v15  ;;  %v589_v4 = vpop.f32.mrb[16].mxu0 }
 0x13d   :  { %v637_v30 = vadd.f32 %v589_v4, %v213_v60  ;;  %v591_v38 = vpop.f32.mrb[17].mxu0 }
 0x13e   :  { %v638_v41 = vadd.f32 %v591_v38, %v215_v5  ;;  %v593_v63 = vpop.f32.mrb[18].mxu0  ;;  %v630_v49 = vpop.f32.mrb[16].mxu1 }
 0x13f   :  { %v3373_v62 = vmul.f32 -1.442695, %v637_v30  ;;  %v639_v8 = vadd.f32 %v630_v49, %v286_v26  ;;  %v594_v18 = vpop.f32.mrb[19].mxu0  ;;  %v632_v61 = vpop.f32.mrb[17].mxu1 }
 0x140   :  { %v3374_v15 = vmul.f32 -1.442695, %v638_v41  ;;  %v640_v48 = vadd.f32 %v632_v61, %v288_v0  ;;  %v634_v12 = vpop.f32.mrb[18].mxu1  ;;  %v5723_v41 = vmov 0  }
 0x141   :  { %3734 = vpow2.f32 %v3373_v62  ;;  %v635_v1 = vpop.f32.mrb[19].mxu1 }
 0x142   :  { %3736 = vpow2.f32 %v3374_v15  ;;  %v3375_v2 = vmul.f32 -1.442695, %v640_v48 }
 0x144   :  { %3738 = vpow2.f32 %v3375_v2 }
 0x145   :  { %3740 = vtanh.f32 %v639_v8 }
 0x14b   :  { %v3735_v3 = vpop.eup %3734 }
 0x14c   :  { %v3737_v6 = vpop.eup %3736  ;;  %v644_v7 = vadd.f32 1.0, %v3735_v3 }
 0x14d   :  { %v650_v9 = vadd.f32 1.0, %v3737_v6 }
 0x14e   :  { %3742 = vrcp.f32 %v644_v7  ;;  %v3739_v63 = vpop.eup %3738 }
 0x14f   :  { %3744 = vrcp.f32 %v650_v9  ;;  %v3741_v10 = vpop.eup %3740  ;;  %v657_v4 = vadd.f32 1.0, %v3739_v63 }
 0x151   :  { %3746 = vrcp.f32 %v657_v4 }
 0x158   :  { %v3743_v13 = vpop.eup %3742 }
 0x159   :  { %v3745_v18 = vpop.eup %3744  ;;  %v661_v30 = vmul.f32 %v3743_v13, %v3741_v10 }
 0x15a   :  { %v660_v38 = vmul.f32 0.0, %v3745_v18 }
 0x15b   :  { %v3747_v48 = vpop.eup %3746 }
 0x15c   :  { %v4628_v12 = vadd.f32 %v661_v30, %v660_v38 }
 0x15e   :  { %3748 = vtanh.f32 %v4628_v12 }
 0x168   :  { %v3749_v62 = vpop.eup %3748 }
 0x169   :  { %v4631_v15 = vmul.f32 %v3749_v62, %v3747_v48 }
 0x16b   :  { %v673_v8 = vpack.c.bf16 %v4631_v15, %v4631_v15 }
 0x16d   :  { %707 = vmatmul.mubr.bf16.vlgmr.msra.gmra.mrb[20].mxu0 %v673_v8  ;;  %748 = vmatmul.mubr.bf16.vlgmr.msra.gmra.mrb[20].mxu1 %v673_v8 }
 0x16e   :  { %795 = vmatpush1.bf16.msra.mxu0 %v4356_v21  ;;  %836 = vmatpush1.bf16.msra.mxu1 %v4362_v23 }
 0x16f   :  { %796 = vmatprep.subr.bf16.mxu0 %v4360_v22  ;;  %837 = vmatprep.subr.bf16.mxu1 %v4368_v25 }
 0x170   :  { %826 = vmatprep.mubr.bf16.mxu0 %v5723_v41  ;;  %867 = vmatprep.mubr.bf16.mxu1 %v5723_v41 }
 0x172   :  { %797 = vmatpush1.bf16.msra.mxu0 %v4366_v24  ;;  %838 = vmatpush1.bf16.msra.mxu1 %v4383_v29 }
 0x173   :  { %798 = vmatprep.subr.bf16.mxu0 %v4380_v28  ;;  %839 = vmatprep.subr.bf16.mxu1 %v4387_v31 }
 0x176   :  { %799 = vmatpush1.bf16.msra.mxu0 %v4390_v32  ;;  %840 = vmatpush1.bf16.msra.mxu1 %v4396_v34 }
 0x177   :  { %800 = vmatprep.subr.bf16.mxu0 %v4393_v33  ;;  %841 = vmatprep.subr.bf16.mxu1 %v4400_v35 }
 0x17a   :  { %801 = vmatpush1.bf16.msra.mxu0 %v4403_v36  ;;  %842 = vmatpush1.bf16.msra.mxu1 %v4417_v40 }
 0x17b   :  { %802 = vmatprep.subr.bf16.mxu0 %v4414_v39  ;;  %843 = vmatprep.subr.bf16.mxu1 %v4423_v43 }
 0x17e   :  { %803 = vmatpush1.bf16.msra.mxu0 %v4421_v42  ;;  %844 = vmatpush1.bf16.msra.mxu1 %v4426_v44 }
 0x17f   :  { %804 = vmatprep.subr.bf16.mxu0 %v4428_v45  ;;  %845 = vmatprep.subr.bf16.mxu1 %v4431_v46 }
 0x182   :  { %805 = vmatpush1.bf16.msra.mxu0 %v4434_v47  ;;  %846 = vmatpush1.bf16.msra.mxu1 %v4448_v51 }
 0x183   :  { %806 = vmatprep.subr.bf16.mxu0 %v4444_v50  ;;  %847 = vmatprep.subr.bf16.mxu1 %v4452_v52 }
 0x186   :  { %807 = vmatpush1.bf16.msra.mxu0 %v4456_v53  ;;  %848 = vmatpush1.bf16.msra.mxu1 %v4462_v56 }
 0x187   :  { %808 = vmatprep.subr.bf16.mxu0 %v4459_v55  ;;  %849 = vmatprep.subr.bf16.mxu1 %v4465_v57 }
 0x18a   :  { %809 = vmatpush1.bf16.msra.mxu0 %v4468_v58  ;;  %850 = vmatpush1.bf16.msra.mxu1 %v4474_v59 }
 0x18b   :  { %914 = vmatprep.subr.bf16.mxu0 %v4350_v16  ;;  %955 = vmatprep.subr.bf16.mxu1 %v4354_v20 }
 0x240   :  { %v708_v60 = vpop.f32.mrb[20].mxu0  ;;  %v749_v5 = vpop.f32.mrb[20].mxu1 }
 0x241   :  { %v756_v26 = vadd.f32 %v708_v60, %v4547_v11  ;;  %v758_v0 = vadd.f32 %v749_v5, %v4552_v17  ;;  %v710_v49 = vpop.f32.mrb[21].mxu0  ;;  %v751_v61 = vpop.f32.mrb[21].mxu1 }
 0x242   :  { %v757_v1 = vadd.f32 %v710_v49, %v4549_v14  ;;  %v759_v2 = vadd.f32 %v751_v61, %v4555_v19  ;;  %v712_v3 = vpop.f32.mrb[22].mxu0  ;;  %v753_v6 = vpop.f32.mrb[22].mxu1 }
 0x243   :  { %v3376_v7 = vmul.f32 -1.442695, %v756_v26  ;;  %v713_v9 = vpop.f32.mrb[23].mxu0  ;;  %v754_v63 = vpop.f32.mrb[23].mxu1 }
 0x244   :  { %v3377_v10 = vmul.f32 -1.442695, %v757_v1  ;;  %v3378_v13 = vmul.f32 -1.442695, %v759_v2  ;;  %v5724_v9 = vld [vmem:[#allocation21_spill] sm:$0xff] }
 0x245   :  { %3750 = vpow2.f32 %v3376_v7 }
 0x246   :  { %3752 = vpow2.f32 %v3377_v10 }
 0x247   :  { %3754 = vpow2.f32 %v3378_v13 }
 0x248   :  { %3756 = vtanh.f32 %v758_v0 }
 0x24f   :  { %v3751_v18 = vpop.eup %3750 }
 0x250   :  { %v3753_v30 = vpop.eup %3752  ;;  %v763_v11 = vadd.f32 1.0, %v3751_v18 }
 0x251   :  { %v769_v17 = vadd.f32 1.0, %v3753_v30  ;;  %v3755_v14 = vpop.eup %3754 }
 0x252   :  { %3758 = vrcp.f32 %v763_v11  ;;  %v3757_v4 = vpop.eup %3756  ;;  %v776_v62 = vadd.f32 1.0, %v3755_v14 }
 0x253   :  { %3760 = vrcp.f32 %v769_v17 }
 0x254   :  { %3762 = vrcp.f32 %v776_v62 }
 0x25c   :  { %v3759_v19 = vpop.eup %3758 }
 0x25d   :  { %v3761_v38 = vpop.eup %3760  ;;  %v780_v48 = vmul.f32 %v3759_v19, %v3757_v4 }
 0x25e   :  { %v779_v8 = vmul.f32 %v3761_v38, %v4628_v12  ;;  %v3763_v5 = vpop.eup %3762 }
 0x260   :  { %v4674_v60 = vadd.f32 %v780_v48, %v779_v8 }
 0x262   :  { %3764 = vtanh.f32 %v4674_v60 }
 0x26c   :  { %v3765_v26 = vpop.eup %3764 }
 0x26d   :  { %v4677_v49 = vmul.f32 %v3765_v26, %v3763_v5 }
 0x26f   :  { %v793_v0 = vpack.c.bf16 %v4677_v49, %v4677_v49 }
 0x271   :  { %827 = vmatmul.mubr.bf16.vlgmr.msra.gmra.mrb[24].mxu0 %v793_v0  ;;  %868 = vmatmul.mubr.bf16.vlgmr.msra.gmra.mrb[24].mxu1 %v793_v0 }
 0x272   :  { %915 = vmatpush1.bf16.msra.mxu0 %v4356_v21  ;;  %956 = vmatpush1.bf16.msra.mxu1 %v4362_v23 }
 0x273   :  { %916 = vmatprep.subr.bf16.mxu0 %v4360_v22  ;;  %957 = vmatprep.subr.bf16.mxu1 %v4368_v25 }
 0x274   :  { %946 = vmatprep.mubr.bf16.mxu0 %v5723_v41  ;;  %987 = vmatprep.mubr.bf16.mxu1 %v5723_v41 }
 0x276   :  { %917 = vmatpush1.bf16.msra.mxu0 %v4366_v24  ;;  %958 = vmatpush1.bf16.msra.mxu1 %v4383_v29 }
 0x277   :  { %918 = vmatprep.subr.bf16.mxu0 %v4380_v28  ;;  %959 = vmatprep.subr.bf16.mxu1 %v4387_v31 }
 0x27a   :  { %919 = vmatpush1.bf16.msra.mxu0 %v4390_v32  ;;  %960 = vmatpush1.bf16.msra.mxu1 %v4396_v34 }
 0x27b   :  { %920 = vmatprep.subr.bf16.mxu0 %v4393_v33  ;;  %961 = vmatprep.subr.bf16.mxu1 %v4400_v35 }
 0x27e   :  { %921 = vmatpush1.bf16.msra.mxu0 %v4403_v36  ;;  %962 = vmatpush1.bf16.msra.mxu1 %v4417_v40 }
 0x27f   :  { %922 = vmatprep.subr.bf16.mxu0 %v4414_v39  ;;  %963 = vmatprep.subr.bf16.mxu1 %v4423_v43 }
 0x282   :  { %923 = vmatpush1.bf16.msra.mxu0 %v4421_v42  ;;  %964 = vmatpush1.bf16.msra.mxu1 %v4426_v44 }
 0x283   :  { %924 = vmatprep.subr.bf16.mxu0 %v4428_v45  ;;  %965 = vmatprep.subr.bf16.mxu1 %v4431_v46 }
 0x286   :  { %925 = vmatpush1.bf16.msra.mxu0 %v4434_v47  ;;  %966 = vmatpush1.bf16.msra.mxu1 %v4448_v51 }
 0x287   :  { %926 = vmatprep.subr.bf16.mxu0 %v4444_v50  ;;  %967 = vmatprep.subr.bf16.mxu1 %v4452_v52 }
 0x28a   :  { %927 = vmatpush1.bf16.msra.mxu0 %v4456_v53  ;;  %968 = vmatpush1.bf16.msra.mxu1 %v4462_v56 }
 0x28b   :  { %928 = vmatprep.subr.bf16.mxu0 %v4459_v55  ;;  %969 = vmatprep.subr.bf16.mxu1 %v4465_v57 }
 0x28e   :  { %929 = vmatpush1.bf16.msra.mxu0 %v4468_v58  ;;  %970 = vmatpush1.bf16.msra.mxu1 %v4474_v59 }
 0x28f   :  { %1034 = vmatprep.subr.bf16.mxu0 %v4350_v16  ;;  %1075 = vmatprep.subr.bf16.mxu1 %v4354_v20 }
 0x344   :  { %v828_v12 = vpop.f32.mrb[24].mxu0  ;;  %v869_v61 = vpop.f32.mrb[24].mxu1 }
 0x345   :  { %v876_v1 = vadd.f32 %v828_v12, %v4558_v27  ;;  %v878_v2 = vadd.f32 %v869_v61, %v4566_v54  ;;  %v830_v3 = vpop.f32.mrb[25].mxu0  ;;  %v871_v6 = vpop.f32.mrb[25].mxu1 }
 0x346   :  { %v877_v7 = vadd.f32 %v830_v3, %v4560_v37  ;;  %v879_v63 = vadd.f32 %v871_v6, %v5724_v9  ;;  %v832_v10 = vpop.f32.mrb[26].mxu0  ;;  %v873_v13 = vpop.f32.mrb[26].mxu1 }
 0x347   :  { %v3379_v18 = vmul.f32 -1.442695, %v876_v1  ;;  %v833_v30 = vpop.f32.mrb[27].mxu0  ;;  %v874_v11 = vpop.f32.mrb[27].mxu1 }
 0x348   :  { %v3380_v16 = vmul.f32 -1.442695, %v877_v7  ;;  %v3381_v20 = vmul.f32 -1.442695, %v879_v63 }
 0x349   :  { %3766 = vpow2.f32 %v3379_v18 }
 0x34a   :  { %3768 = vpow2.f32 %v3380_v16 }
 0x34b   :  { %3770 = vpow2.f32 %v3381_v20 }
 0x34c   :  { %3772 = vtanh.f32 %v878_v2 }
 0x353   :  { %v3767_v17 = vpop.eup %3766 }
 0x354   :  { %v3769_v14 = vpop.eup %3768  ;;  %v883_v27 = vadd.f32 1.0, %v3767_v17 }
 0x355   :  { %v889_v54 = vadd.f32 1.0, %v3769_v14  ;;  %v3771_v37 = vpop.eup %3770 }
 0x356   :  { %3774 = vrcp.f32 %v883_v27  ;;  %v3773_v4 = vpop.eup %3772  ;;  %v896_v62 = vadd.f32 1.0, %v3771_v37 }
 0x357   :  { %3776 = vrcp.f32 %v889_v54 }
 0x358   :  { %3778 = vrcp.f32 %v896_v62  ;;  %v4780_v62 = vld [vmem:[#allocation5 + $0x8] ss:$16 sps:$4 sm:$0xff]  }
 0x360   :  { %v3775_v19 = vpop.eup %3774 }
 0x361   :  { %v3777_v38 = vpop.eup %3776  ;;  %v900_v48 = vmul.f32 %v3775_v19, %v3773_v4 }
 0x362   :  { %v899_v8 = vmul.f32 %v3777_v38, %v4674_v60  ;;  %v3779_v26 = vpop.eup %3778 }
 0x364   :  { %v4720_v5 = vadd.f32 %v900_v48, %v899_v8  ;;  %v4777_v48 = vld [vmem:[#allocation5] ss:$16 sps:$4 sm:$0xff]   ;;  %v4783_v8 = vld [vmem:[#allocation5 + $0x24] ss:$16 sps:$4 sm:$0xff]  }
 0x366   :  { %3780 = vtanh.f32 %v4720_v5 }
 0x370   :  { %v3781_v0 = vpop.eup %3780 }
 0x371   :  { %v4723_v12 = vmul.f32 %v3781_v0, %v3779_v26  ;;  %v4791_v26 = vld [vmem:[#allocation5 + $0x20] ss:$16 sps:$4 sm:$0xff]   ;;  %v4794_v0 = vld [vmem:[#allocation5 + $0x28] ss:$16 sps:$4 sm:$0xff]  }
 0x373   :  { %v913_v61 = vpack.c.bf16 %v4723_v12, %v4723_v12 }
 0x375   :  { %947 = vmatmul.mubr.bf16.vlgmr.msra.gmra.mrb[28].mxu0 %v913_v61  ;;  %988 = vmatmul.mubr.bf16.vlgmr.msra.gmra.mrb[28].mxu1 %v913_v61  ;;  %v4797_v61 = vld [vmem:[#allocation5 + $0x44] ss:$16 sps:$4 sm:$0xff]  }
 0x376   :  { %1035 = vmatpush1.bf16.msra.mxu0 %v4356_v21  ;;  %1076 = vmatpush1.bf16.msra.mxu1 %v4362_v23  ;;  %v4759_v21 = vld [vmem:[#allocation5 + $0x4] ss:$16 sps:$4 sm:$0xff]  }
 0x377   :  { %1036 = vmatprep.subr.bf16.mxu0 %v4360_v22  ;;  %1077 = vmatprep.subr.bf16.mxu1 %v4368_v25  ;;  %v4762_v22 = vld [vmem:[#allocation5 + $0xc] ss:$16 sps:$4 sm:$0xff]  }
 0x378   :  { %1066 = vmatprep.mubr.bf16.mxu0 %v5723_v41  ;;  %1107 = vmatprep.mubr.bf16.mxu1 %v5723_v41  ;;  %v5725_v25 = vld [vmem:[#allocation19_spill] sm:$0xff] }
 0x37a   :  { %1037 = vmatpush1.bf16.msra.mxu0 %v4366_v24  ;;  %1078 = vmatpush1.bf16.msra.mxu1 %v4383_v29  ;;  %v5726_v29 = vld [vmem:[#allocation22_spill] sm:$0xff] }
 0x37b   :  { %1038 = vmatprep.subr.bf16.mxu0 %v4380_v28  ;;  %1079 = vmatprep.subr.bf16.mxu1 %v4387_v31 }
 0x37e   :  { %1039 = vmatpush1.bf16.msra.mxu0 %v4390_v32  ;;  %1080 = vmatpush1.bf16.msra.mxu1 %v4396_v34  ;;  %v5727_v34 = vld [vmem:[#allocation20_spill] sm:$0xff] }
 0x37f   :  { %1040 = vmatprep.subr.bf16.mxu0 %v4393_v33  ;;  %1081 = vmatprep.subr.bf16.mxu1 %v4400_v35 }
 0x382   :  { %1041 = vmatpush1.bf16.msra.mxu0 %v4403_v36  ;;  %1082 = vmatpush1.bf16.msra.mxu1 %v4417_v40  ;;  %v5728_v36 = vld [vmem:[#allocation23_spill] sm:$0xff] }
 0x383   :  { %1042 = vmatprep.subr.bf16.mxu0 %v4414_v39  ;;  %1083 = vmatprep.subr.bf16.mxu1 %v4423_v43 }
 0x386   :  { %1043 = vmatpush1.bf16.msra.mxu0 %v4421_v42  ;;  %1084 = vmatpush1.bf16.msra.mxu1 %v4426_v44 }
 0x387   :  { %1044 = vmatprep.subr.bf16.mxu0 %v4428_v45  ;;  %1085 = vmatprep.subr.bf16.mxu1 %v4431_v46 }
 0x38a   :  { %1045 = vmatpush1.bf16.msra.mxu0 %v4434_v47  ;;  %1086 = vmatpush1.bf16.msra.mxu1 %v4448_v51 }
 0x38b   :  { %1046 = vmatprep.subr.bf16.mxu0 %v4444_v50  ;;  %1087 = vmatprep.subr.bf16.mxu1 %v4452_v52 }
 0x38e   :  { %1047 = vmatpush1.bf16.msra.mxu0 %v4456_v53  ;;  %1088 = vmatpush1.bf16.msra.mxu1 %v4462_v56 }
 0x38f   :  { %1048 = vmatprep.subr.bf16.mxu0 %v4459_v55  ;;  %1089 = vmatprep.subr.bf16.mxu1 %v4465_v57 }
 0x392   :  { %1049 = vmatpush1.bf16.msra.mxu0 %v4468_v58  ;;  %1090 = vmatpush1.bf16.msra.mxu1 %v4474_v59 }
 0x393   :  { %1154 = vmatprep.subr.bf16.mxu0 %v4759_v21  ;;  %1195 = vmatprep.subr.bf16.mxu1 %v4762_v22 }
 0x448   :  { %v948_v23 = vpop.f32.mrb[28].mxu0  ;;  %v989_v24 = vpop.f32.mrb[28].mxu1 }
 0x449   :  { %v996_v28 = vadd.f32 %v948_v23, %v5725_v25  ;;  %v998_v31 = vadd.f32 %v989_v24, %v5726_v29  ;;  %v950_v32 = vpop.f32.mrb[29].mxu0  ;;  %v991_v33 = vpop.f32.mrb[29].mxu1  ;;  %v4800_v23 = vld [vmem:[#allocation5 + $0x4c] ss:$16 sps:$4 sm:$0xff]   ;;  %v4803_v24 = vld [vmem:[#allocation5 + $0x40] ss:$16 sps:$4 sm:$0xff]  }
 0x44a   :  { %v997_v35 = vadd.f32 %v950_v32, %v5727_v34  ;;  %v999_v39 = vadd.f32 %v991_v33, %v5728_v36  ;;  %v952_v60 = vpop.f32.mrb[30].mxu0  ;;  %v993_v1 = vpop.f32.mrb[30].mxu1  ;;  %v4806_v25 = vld [vmem:[#allocation5 + $0x48] ss:$16 sps:$4 sm:$0xff]   ;;  %v4812_v29 = vld [vmem:[#allocation5 + $0x6c] ss:$16 sps:$4 sm:$0xff]  }
 0x44b   :  { %v3382_v2 = vmul.f32 -1.442695, %v996_v28  ;;  %v953_v3 = vpop.f32.mrb[31].mxu0  ;;  %v994_v6 = vpop.f32.mrb[31].mxu1  ;;  %v4809_v28 = vld [vmem:[#allocation5 + $0x64] ss:$16 sps:$4 sm:$0xff]  }
 0x44c   :  { %v3383_v7 = vmul.f32 -1.442695, %v997_v35  ;;  %v3384_v9 = vmul.f32 -1.442695, %v999_v39  ;;  %v4819_v32 = vld [vmem:[#allocation5 + $0x84] ss:$16 sps:$4 sm:$0xff]  }
 0x44d   :  { %3782 = vpow2.f32 %v3382_v2 }
 0x44e   :  { %3784 = vpow2.f32 %v3383_v7 }
 0x44f   :  { %3786 = vpow2.f32 %v3384_v9 }
 0x450   :  { %3788 = vtanh.f32 %v998_v31  ;;  %v4815_v31 = vld [vmem:[#allocation5 + $0x60] ss:$16 sps:$4 sm:$0xff]  }
 0x457   :  { %v3783_v63 = vpop.eup %3782 }
 0x458   :  { %v3785_v10 = vpop.eup %3784  ;;  %v1003_v13 = vadd.f32 1.0, %v3783_v63 }
 0x459   :  { %v1009_v18 = vadd.f32 1.0, %v3785_v10  ;;  %v3787_v30 = vpop.eup %3786 }
 0x45a   :  { %3790 = vrcp.f32 %v1003_v13  ;;  %v3789_v11 = vpop.eup %3788  ;;  %v1016_v14 = vadd.f32 1.0, %v3787_v30 }
 0x45b   :  { %3792 = vrcp.f32 %v1009_v18 }
 0x45c   :  { %3794 = vrcp.f32 %v1016_v14  ;;  %v4873_v14 = vld [vmem:[#allocation5 + $0x80] ss:$16 sps:$4 sm:$0xff]  }
 0x464   :  { %v3791_v16 = vpop.eup %3790 }
 0x465   :  { %v3793_v20 = vpop.eup %3792  ;;  %v1020_v17 = vmul.f32 %v3791_v16, %v3789_v11 }
 0x466   :  { %v1019_v27 = vmul.f32 %v3793_v20, %v4720_v5  ;;  %v3795_v37 = vpop.eup %3794  ;;  %v4786_v5 = vld [vmem:[#allocation5 + $0x2c] ss:$16 sps:$4 sm:$0xff]   ;;  %v4866_v20 = vld [vmem:[#allocation5 + $0x68] ss:$16 sps:$4 sm:$0xff]  }
 0x468   :  { %v4770_v54 = vadd.f32 %v1020_v17, %v1019_v27  ;;  %v4870_v17 = vld [vmem:[#allocation5 + $0x8c] ss:$16 sps:$4 sm:$0xff]   ;;  %v4876_v27 = vld [vmem:[#allocation5 + $0x88] ss:$16 sps:$4 sm:$0xff]  }
 0x46a   :  { %3796 = vtanh.f32 %v4770_v54 }
 0x474   :  { %v3797_v4 = vpop.eup %3796 }
 0x475   :  { %v4773_v19 = vmul.f32 %v3797_v4, %v3795_v37  ;;  %v4882_v37 = vld [vmem:[#allocation5 + $0xac] ss:$16 sps:$4 sm:$0xff]   ;;  %v4885_v4 = vld [vmem:[#allocation5 + $0xa0] ss:$16 sps:$4 sm:$0xff]  }
 0x477   :  { %v1033_v38 = vpack.c.bf16 %v4773_v19, %v4773_v19 }
 0x479   :  { %1067 = vmatmul.mubr.bf16.vlgmr.msra.gmra.mrb[32].mxu0 %v1033_v38  ;;  %1108 = vmatmul.mubr.bf16.vlgmr.msra.gmra.mrb[32].mxu1 %v1033_v38  ;;  %v4888_v38 = vld [vmem:[#allocation5 + $0xa8] ss:$16 sps:$4 sm:$0xff]  }
 0x47a   :  { %1155 = vmatpush1.bf16.msra.mxu0 %v4777_v48  ;;  %1196 = vmatpush1.bf16.msra.mxu1 %v4780_v62 }
 0x47b   :  { %1156 = vmatprep.subr.bf16.mxu0 %v4783_v8  ;;  %1197 = vmatprep.subr.bf16.mxu1 %v4786_v5 }
 0x47c   :  { %1186 = vmatprep.mubr.bf16.mxu0 %v5723_v41  ;;  %1227 = vmatprep.mubr.bf16.mxu1 %v5723_v41 }
 0x47e   :  { %1157 = vmatpush1.bf16.msra.mxu0 %v4791_v26  ;;  %1198 = vmatpush1.bf16.msra.mxu1 %v4794_v0 }
 0x47f   :  { %1158 = vmatprep.subr.bf16.mxu0 %v4797_v61  ;;  %1199 = vmatprep.subr.bf16.mxu1 %v4800_v23 }
 0x482   :  { %1159 = vmatpush1.bf16.msra.mxu0 %v4803_v24  ;;  %1200 = vmatpush1.bf16.msra.mxu1 %v4806_v25 }
 0x483   :  { %1160 = vmatprep.subr.bf16.mxu0 %v4809_v28  ;;  %1201 = vmatprep.subr.bf16.mxu1 %v4812_v29 }
 0x486   :  { %1161 = vmatpush1.bf16.msra.mxu0 %v4815_v31  ;;  %1202 = vmatpush1.bf16.msra.mxu1 %v4417_v40 }
 0x487   :  { %1162 = vmatprep.subr.bf16.mxu0 %v4819_v32  ;;  %1203 = vmatprep.subr.bf16.mxu1 %v4423_v43  ;;  %v5729_v43 = vld [vmem:[#allocation24_spill] sm:$0xff] }
 0x48a   :  { %1163 = vmatpush1.bf16.msra.mxu0 %v4421_v42  ;;  %1204 = vmatpush1.bf16.msra.mxu1 %v4426_v44 }
 0x48b   :  { %1164 = vmatprep.subr.bf16.mxu0 %v4428_v45  ;;  %1205 = vmatprep.subr.bf16.mxu1 %v4431_v46  ;;  %v5730_v45 = vld [vmem:[#allocation27_spill] sm:$0xff] }
 0x48e   :  { %1165 = vmatpush1.bf16.msra.mxu0 %v4434_v47  ;;  %1206 = vmatpush1.bf16.msra.mxu1 %v4448_v51  ;;  %v5731_v51 = vld [vmem:[#allocation25_spill] sm:$0xff] }
 0x48f   :  { %1166 = vmatprep.subr.bf16.mxu0 %v4444_v50  ;;  %1207 = vmatprep.subr.bf16.mxu1 %v4452_v52 }
 0x492   :  { %1167 = vmatpush1.bf16.msra.mxu0 %v4456_v53  ;;  %1208 = vmatpush1.bf16.msra.mxu1 %v4462_v56  ;;  %v5732_v53 = vld [vmem:[#allocation29_spill] sm:$0xff] }
 0x493   :  { %1168 = vmatprep.subr.bf16.mxu0 %v4459_v55  ;;  %1209 = vmatprep.subr.bf16.mxu1 %v4465_v57 }
 0x496   :  { %1169 = vmatpush1.bf16.msra.mxu0 %v4468_v58  ;;  %1210 = vmatpush1.bf16.msra.mxu1 %v4474_v59 }
 0x497   :  { %1274 = vmatprep.subr.bf16.mxu0 %v4759_v21  ;;  %1315 = vmatprep.subr.bf16.mxu1 %v4762_v22 }
 0x54c   :  { %v1068_v40 = vpop.f32.mrb[32].mxu0  ;;  %v1109_v42 = vpop.f32.mrb[32].mxu1 }
 0x54d   :  { %v1116_v44 = vadd.f32 %v1068_v40, %v5729_v43  ;;  %v1118_v46 = vadd.f32 %v1109_v42, %v5730_v45  ;;  %v1070_v47 = vpop.f32.mrb[33].mxu0  ;;  %v1111_v50 = vpop.f32.mrb[33].mxu1  ;;  %v4891_v40 = vld [vmem:[#allocation5 + $0xc4] ss:$16 sps:$4 sm:$0xff]   ;;  %v4894_v42 = vld [vmem:[#allocation5 + $0xcc] ss:$16 sps:$4 sm:$0xff]  }
 0x54e   :  { %v1117_v52 = vadd.f32 %v1070_v47, %v5731_v51  ;;  %v1119_v55 = vadd.f32 %v1111_v50, %v5732_v53  ;;  %v1072_v56 = vpop.f32.mrb[34].mxu0  ;;  %v1113_v57 = vpop.f32.mrb[34].mxu1  ;;  %v4897_v43 = vld [vmem:[#allocation5 + $0xc0] ss:$16 sps:$4 sm:$0xff]   ;;  %v4903_v45 = vld [vmem:[#allocation5 + $0xe4] ss:$16 sps:$4 sm:$0xff]  }
 0x54f   :  { %v3385_v58 = vmul.f32 -1.442695, %v1116_v44  ;;  %v1073_v59 = vpop.f32.mrb[35].mxu0  ;;  %v1114_v33 = vpop.f32.mrb[35].mxu1  ;;  %v4900_v44 = vld [vmem:[#allocation5 + $0xc8] ss:$16 sps:$4 sm:$0xff]  }
 0x550   :  { %v3386_v34 = vmul.f32 -1.442695, %v1117_v52  ;;  %v3387_v35 = vmul.f32 -1.442695, %v1119_v55  ;;  %v4909_v47 = vld [vmem:[#allocation5 + $0xe0] ss:$16 sps:$4 sm:$0xff]  }
 0x551   :  { %3798 = vpow2.f32 %v3385_v58  ;;  %v4912_v50 = vld [vmem:[#allocation5 + $0xe8] ss:$16 sps:$4 sm:$0xff]   ;;  %v5733_v53 = vld [vmem:[#allocation26_spill] sm:$0xff]  ;;  %v5735_v33 = vld [vmem:[#allocation28_spill] sm:$0xff] }
 0x552   :  { %3800 = vpow2.f32 %v3386_v34  ;;  %v5734_v56 = vld [vmem:[#allocation30_spill] sm:$0xff] }
 0x553   :  { %3802 = vpow2.f32 %v3387_v35  ;;  %v5736_v35 = vld [vmem:[#allocation31_spill] sm:$0xff] }
 0x554   :  { %3804 = vtanh.f32 %v1118_v46  ;;  %v4906_v46 = vld [vmem:[#allocation5 + $0xec] ss:$16 sps:$4 sm:$0xff]  }
 0x55b   :  { %v3799_v36 = vpop.eup %3798 }
 0x55c   :  { %v3801_v39 = vpop.eup %3800  ;;  %v1123_v60 = vadd.f32 1.0, %v3799_v36 }
 0x55d   :  { %v1129_v1 = vadd.f32 1.0, %v3801_v39  ;;  %v3803_v2 = vpop.eup %3802 }
 0x55e   :  { %3806 = vrcp.f32 %v1123_v60  ;;  %v3805_v3 = vpop.eup %3804  ;;  %v1136_v63 = vadd.f32 1.0, %v3803_v2 }
 0x55f   :  { %3808 = vrcp.f32 %v1129_v1 }
 0x560   :  { %3810 = vrcp.f32 %v1136_v63 }
 0x568   :  { %v3807_v6 = vpop.eup %3806 }
 0x569   :  { %v3809_v7 = vpop.eup %3808  ;;  %v1140_v9 = vmul.f32 %v3807_v6, %v3805_v3 }
 0x56a   :  { %v1139_v10 = vmul.f32 %v3809_v7, %v4770_v54  ;;  %v3811_v18 = vpop.eup %3810  ;;  %v4879_v54 = vld [vmem:[#allocation5 + $0xa4] ss:$16 sps:$4 sm:$0xff]  }
 0x56c   :  { %v4844_v13 = vadd.f32 %v1140_v9, %v1139_v10 }
 0x56e   :  { %3812 = vtanh.f32 %v4844_v13 }
 0x578   :  { %v3813_v30 = vpop.eup %3812 }
 0x579   :  { %v4847_v11 = vmul.f32 %v3813_v30, %v3811_v18 }
 0x57b   :  { %v1153_v16 = vpack.c.bf16 %v4847_v11, %v4847_v11 }
 0x57d   :  { %1187 = vmatmul.mubr.bf16.vlgmr.msra.gmra.mrb[36].mxu0 %v1153_v16  ;;  %1228 = vmatmul.mubr.bf16.vlgmr.msra.gmra.mrb[36].mxu1 %v1153_v16 }
 0x57e   :  { %1275 = vmatpush1.bf16.msra.mxu0 %v4777_v48  ;;  %1316 = vmatpush1.bf16.msra.mxu1 %v4780_v62 }
 0x57f   :  { %1276 = vmatprep.subr.bf16.mxu0 %v4783_v8  ;;  %1317 = vmatprep.subr.bf16.mxu1 %v4786_v5 }
 0x580   :  { %1306 = vmatprep.mubr.bf16.mxu0 %v5723_v41  ;;  %1347 = vmatprep.mubr.bf16.mxu1 %v5723_v41 }
 0x582   :  { %1277 = vmatpush1.bf16.msra.mxu0 %v4791_v26  ;;  %1318 = vmatpush1.bf16.msra.mxu1 %v4794_v0 }
 0x583   :  { %1278 = vmatprep.subr.bf16.mxu0 %v4797_v61  ;;  %1319 = vmatprep.subr.bf16.mxu1 %v4800_v23 }
 0x586   :  { %1279 = vmatpush1.bf16.msra.mxu0 %v4803_v24  ;;  %1320 = vmatpush1.bf16.msra.mxu1 %v4806_v25 }
 0x587   :  { %1280 = vmatprep.subr.bf16.mxu0 %v4809_v28  ;;  %1321 = vmatprep.subr.bf16.mxu1 %v4812_v29 }
 0x58a   :  { %1281 = vmatpush1.bf16.msra.mxu0 %v4815_v31  ;;  %1322 = vmatpush1.bf16.msra.mxu1 %v4866_v20 }
 0x58b   :  { %1282 = vmatprep.subr.bf16.mxu0 %v4819_v32  ;;  %1323 = vmatprep.subr.bf16.mxu1 %v4870_v17 }
 0x58e   :  { %1283 = vmatpush1.bf16.msra.mxu0 %v4873_v14  ;;  %1324 = vmatpush1.bf16.msra.mxu1 %v4876_v27 }
 0x58f   :  { %1284 = vmatprep.subr.bf16.mxu0 %v4879_v54  ;;  %1325 = vmatprep.subr.bf16.mxu1 %v4882_v37 }
 0x592   :  { %1285 = vmatpush1.bf16.msra.mxu0 %v4885_v4  ;;  %1326 = vmatpush1.bf16.msra.mxu1 %v4888_v38 }
 0x593   :  { %1286 = vmatprep.subr.bf16.mxu0 %v4891_v40  ;;  %1327 = vmatprep.subr.bf16.mxu1 %v4894_v42 }
 0x596   :  { %1287 = vmatpush1.bf16.msra.mxu0 %v4897_v43  ;;  %1328 = vmatpush1.bf16.msra.mxu1 %v4900_v44 }
 0x597   :  { %1288 = vmatprep.subr.bf16.mxu0 %v4903_v45  ;;  %1329 = vmatprep.subr.bf16.mxu1 %v4906_v46 }
 0x59a   :  { %1289 = vmatpush1.bf16.msra.mxu0 %v4909_v47  ;;  %1330 = vmatpush1.bf16.msra.mxu1 %v4912_v50 }
 0x59b   :  { %1394 = vmatprep.subr.bf16.mxu0 %v4759_v21  ;;  %1435 = vmatprep.subr.bf16.mxu1 %v4762_v22 }
 0x650   :  { %v1188_v51 = vpop.f32.mrb[36].mxu0  ;;  %v1229_v52 = vpop.f32.mrb[36].mxu1 }
 0x651   :  { %v1236_v55 = vadd.f32 %v1188_v51, %v5733_v53  ;;  %v1238_v57 = vadd.f32 %v1229_v52, %v5734_v56  ;;  %v1190_v58 = vpop.f32.mrb[37].mxu0  ;;  %v1231_v59 = vpop.f32.mrb[37].mxu1 }
 0x652   :  { %v1237_v34 = vadd.f32 %v1190_v58, %v5735_v33  ;;  %v1239_v36 = vadd.f32 %v1231_v59, %v5736_v35  ;;  %v1192_v39 = vpop.f32.mrb[38].mxu0  ;;  %v1233_v60 = vpop.f32.mrb[38].mxu1 }
 0x653   :  { %v3388_v1 = vmul.f32 -1.442695, %v1236_v55  ;;  %v1193_v2 = vpop.f32.mrb[39].mxu0  ;;  %v1234_v3 = vpop.f32.mrb[39].mxu1  ;;  %v3638_v60 = vld [vmem:[#allocation8] ss:$16 sps:$4 sm:$0xff]  }
 0x654   :  { %v3389_v21 = vmul.f32 -1.442695, %v1237_v34  ;;  %v3390_v22 = vmul.f32 -1.442695, %v1239_v36  ;;  %v3646_v3 = vld [vmem:[#allocation8 + $0x24] ss:$16 sps:$4 sm:$0xff]  }
 0x655   :  { %3814 = vpow2.f32 %v3388_v1  ;;  %v3641_v1 = vld [vmem:[#allocation8 + $0x8] ss:$16 sps:$4 sm:$0xff]  }
 0x656   :  { %3816 = vpow2.f32 %v3389_v21  ;;  %v3649_v21 = vld [vmem:[#allocation8 + $0x2c] ss:$16 sps:$4 sm:$0xff]  }
 0x657   :  { %3818 = vpow2.f32 %v3390_v22  ;;  %v3644_v22 = vld [vmem:[#allocation8 + $0x20] ss:$16 sps:$4 sm:$0xff]  }
 0x658   :  { %3820 = vtanh.f32 %v1238_v57 }
 0x65f   :  { %v3815_v6 = vpop.eup %3814 }
 0x660   :  { %v3817_v7 = vpop.eup %3816  ;;  %v1243_v9 = vadd.f32 1.0, %v3815_v6  ;;  %v3647_v6 = vld [vmem:[#allocation8 + $0x28] ss:$16 sps:$4 sm:$0xff]  }
 0x661   :  { %v1249_v63 = vadd.f32 1.0, %v3817_v7  ;;  %v3819_v10 = vpop.eup %3818  ;;  %v3652_v7 = vld [vmem:[#allocation8 + $0x44] ss:$16 sps:$4 sm:$0xff]  }
 0x662   :  { %3822 = vrcp.f32 %v1243_v9  ;;  %v3821_v18 = vpop.eup %3820  ;;  %v1256_v52 = vadd.f32 1.0, %v3819_v10  ;;  %v3655_v9 = vld [vmem:[#allocation8 + $0x4c] ss:$16 sps:$4 sm:$0xff]   ;;  %v3653_v10 = vld [vmem:[#allocation8 + $0x48] ss:$16 sps:$4 sm:$0xff]  }
 0x663   :  { %3824 = vrcp.f32 %v1249_v63  ;;  %v3650_v63 = vld [vmem:[#allocation8 + $0x40] ss:$16 sps:$4 sm:$0xff]  }
 0x664   :  { %3826 = vrcp.f32 %v1256_v52  ;;  %v3664_v52 = vld [vmem:[#allocation8 + $0x84] ss:$16 sps:$4 sm:$0xff]  }
 0x66c   :  { %v3823_v30 = vpop.eup %3822 }
 0x66d   :  { %v3825_v16 = vpop.eup %3824  ;;  %v1260_v51 = vmul.f32 %v3823_v30, %v3821_v18  ;;  %v3658_v18 = vld [vmem:[#allocation8 + $0x64] ss:$16 sps:$4 sm:$0xff]   ;;  %v3661_v30 = vld [vmem:[#allocation8 + $0x6c] ss:$16 sps:$4 sm:$0xff]  }
 0x66e   :  { %v1259_v53 = vmul.f32 %v3825_v16, %v4844_v13  ;;  %v3827_v56 = vpop.eup %3826  ;;  %v3656_v16 = vld [vmem:[#allocation8 + $0x60] ss:$16 sps:$4 sm:$0xff]  }
 0x670   :  { %v4922_v55 = vadd.f32 %v1260_v51, %v1259_v53  ;;  %v3659_v51 = vld [vmem:[#allocation8 + $0x68] ss:$16 sps:$4 sm:$0xff]   ;;  %v3667_v53 = vld [vmem:[#allocation8 + $0x8c] ss:$16 sps:$4 sm:$0xff]  }
 0x672   :  { %3828 = vtanh.f32 %v4922_v55 }
 0x67c   :  { %v3829_v58 = vpop.eup %3828 }
 0x67d   :  { %v4925_v59 = vmul.f32 %v3829_v58, %v3827_v56  ;;  %v3665_v56 = vld [vmem:[#allocation8 + $0x88] ss:$16 sps:$4 sm:$0xff]   ;;  %v3670_v58 = vld [vmem:[#allocation8 + $0xa4] ss:$16 sps:$4 sm:$0xff]  }
 0x67f   :  { %v1273_v57 = vpack.c.bf16 %v4925_v59, %v4925_v59 }
 0x681   :  { %1307 = vmatmul.mubr.bf16.vlgmr.msra.gmra.mrb[40].mxu0 %v1273_v57  ;;  %1348 = vmatmul.mubr.bf16.vlgmr.msra.gmra.mrb[40].mxu1 %v1273_v57  ;;  %v3673_v57 = vld [vmem:[#allocation8 + $0xac] ss:$16 sps:$4 sm:$0xff]  }
 0x682   :  { %1395 = vmatpush1.bf16.msra.mxu0 %v4777_v48  ;;  %1436 = vmatpush1.bf16.msra.mxu1 %v4780_v62  ;;  %v3640_v48 = vld [vmem:[#allocation8 + $0x4] ss:$16 sps:$4 sm:$0xff]   ;;  %v3643_v62 = vld [vmem:[#allocation8 + $0xc] ss:$16 sps:$4 sm:$0xff]  }
 0x683   :  { %1396 = vmatprep.subr.bf16.mxu0 %v4783_v8  ;;  %1437 = vmatprep.subr.bf16.mxu1 %v4786_v5 }
 0x684   :  { %1426 = vmatprep.mubr.bf16.mxu0 %v5723_v41  ;;  %1467 = vmatprep.mubr.bf16.mxu1 %v5723_v41 }
 0x686   :  { %1397 = vmatpush1.bf16.msra.mxu0 %v4791_v26  ;;  %1438 = vmatpush1.bf16.msra.mxu1 %v4794_v0  ;;  %v5737_v26 = vld [vmem:[#allocation32_spill] sm:$0xff] }
 0x687   :  { %1398 = vmatprep.subr.bf16.mxu0 %v4797_v61  ;;  %1439 = vmatprep.subr.bf16.mxu1 %v4800_v23  ;;  %v5738_v61 = vld [vmem:[#allocation35_spill] sm:$0xff] }
 0x68a   :  { %1399 = vmatpush1.bf16.msra.mxu0 %v4803_v24  ;;  %1440 = vmatpush1.bf16.msra.mxu1 %v4806_v25 }
 0x68b   :  { %1400 = vmatprep.subr.bf16.mxu0 %v4809_v28  ;;  %1441 = vmatprep.subr.bf16.mxu1 %v4812_v29  ;;  %v5739_v28 = vld [vmem:[#allocation33_spill] sm:$0xff] }
 0x68e   :  { %1401 = vmatpush1.bf16.msra.mxu0 %v4815_v31  ;;  %1442 = vmatpush1.bf16.msra.mxu1 %v4866_v20  ;;  %v5740_v31 = vld [vmem:[#allocation37_spill] sm:$0xff] }
 0x68f   :  { %1402 = vmatprep.subr.bf16.mxu0 %v4819_v32  ;;  %1443 = vmatprep.subr.bf16.mxu1 %v4870_v17 }
 0x692   :  { %1403 = vmatpush1.bf16.msra.mxu0 %v4873_v14  ;;  %1444 = vmatpush1.bf16.msra.mxu1 %v4876_v27 }
 0x693   :  { %1404 = vmatprep.subr.bf16.mxu0 %v4879_v54  ;;  %1445 = vmatprep.subr.bf16.mxu1 %v4882_v37 }
 0x696   :  { %1405 = vmatpush1.bf16.msra.mxu0 %v4885_v4  ;;  %1446 = vmatpush1.bf16.msra.mxu1 %v4888_v38 }
 0x697   :  { %1406 = vmatprep.subr.bf16.mxu0 %v4891_v40  ;;  %1447 = vmatprep.subr.bf16.mxu1 %v4894_v42 }
 0x69a   :  { %1407 = vmatpush1.bf16.msra.mxu0 %v4897_v43  ;;  %1448 = vmatpush1.bf16.msra.mxu1 %v4900_v44 }
 0x69b   :  { %1408 = vmatprep.subr.bf16.mxu0 %v4903_v45  ;;  %1449 = vmatprep.subr.bf16.mxu1 %v4906_v46 }
 0x69e   :  { %1409 = vmatpush1.bf16.msra.mxu0 %v4909_v47  ;;  %1450 = vmatpush1.bf16.msra.mxu1 %v4912_v50 }
 0x69f   :  { %1734 = vmatprep.subr.bf16.mxu0 %v3640_v48  ;;  %1807 = vmatprep.subr.bf16.mxu1 %v3643_v62  ;;  %v3668_v48 = vld [vmem:[#allocation8 + $0xa0] ss:$16 sps:$4 sm:$0xff]   ;;  %v3671_v62 = vld [vmem:[#allocation8 + $0xa8] ss:$16 sps:$4 sm:$0xff]  }
 0x754   :  { %v1308_v8 = vpop.f32.mrb[40].mxu0  ;;  %v1349_v5 = vpop.f32.mrb[40].mxu1 }
 0x755   :  { %v1356_v0 = vadd.f32 %v1308_v8, %v5737_v26  ;;  %v1358_v23 = vadd.f32 %v1349_v5, %v5738_v61  ;;  %v1310_v24 = vpop.f32.mrb[41].mxu0  ;;  %v1351_v25 = vpop.f32.mrb[41].mxu1  ;;  %v3676_v8 = vld [vmem:[#allocation8 + $0xc4] ss:$16 sps:$4 sm:$0xff]   ;;  %v3679_v5 = vld [vmem:[#allocation8 + $0xcc] ss:$16 sps:$4 sm:$0xff]  }
 0x756   :  { %v1357_v29 = vadd.f32 %v1310_v24, %v5739_v28  ;;  %v1359_v32 = vadd.f32 %v1351_v25, %v5740_v31  ;;  %v1312_v13 = vpop.f32.mrb[42].mxu0  ;;  %v1353_v20 = vpop.f32.mrb[42].mxu1  ;;  %v3674_v26 = vld [vmem:[#allocation8 + $0xc0] ss:$16 sps:$4 sm:$0xff]   ;;  %v3682_v61 = vld [vmem:[#allocation8 + $0xe4] ss:$16 sps:$4 sm:$0xff]   ;;  %v1516_v28 = vpack.c.bf16 %v4677_v49, %v4631_v15  ;;  %v1518_v31 = vpack.c.bf16 %v4925_v59, %v4847_v11 }
 0x757   :  { %v3391_v17 = vmul.f32 -1.442695, %v1356_v0  ;;  %v1313_v14 = vpop.f32.mrb[43].mxu0  ;;  %v1354_v27 = vpop.f32.mrb[43].mxu1  ;;  %v3677_v0 = vld [vmem:[#allocation8 + $0xc8] ss:$16 sps:$4 sm:$0xff]  }
 0x758   :  { %v3392_v54 = vmul.f32 -1.442695, %v1357_v29  ;;  %v3393_v37 = vmul.f32 -1.442695, %v1359_v32  ;;  %v3680_v24 = vld [vmem:[#allocation8 + $0xe0] ss:$16 sps:$4 sm:$0xff]   ;;  %v1517_v29 = vpack.c.bf16 %v4773_v19, %v4723_v12 }
 0x759   :  { %3830 = vpow2.f32 %v3391_v17  ;;  %v3683_v25 = vld [vmem:[#allocation8 + $0xe8] ss:$16 sps:$4 sm:$0xff]   ;;  %v4987_v15 = vld [vmem:[#allocation10 + $0x4] ss:$16 sps:$4 sm:$0xff]   ;;  %v4989_v49 = vld [vmem:[#allocation10 + $0xc] ss:$16 sps:$4 sm:$0xff]  }
 0x75a   :  { %3832 = vpow2.f32 %v3392_v54  ;;  %v4991_v12 = vld [vmem:[#allocation10] ss:$16 sps:$4 sm:$0xff]   ;;  %v4993_v19 = vld [vmem:[#allocation10 + $0x8] ss:$16 sps:$4 sm:$0xff]   ;;  %v4999_v11 = vld [vmem:[#allocation10 + $0x24] ss:$16 sps:$4 sm:$0xff]  }
 0x75b   :  { %3834 = vpow2.f32 %v3393_v37  ;;  %v5001_v59 = vld [vmem:[#allocation10 + $0x2c] ss:$16 sps:$4 sm:$0xff]   ;;  %v5003_v32 = vld [vmem:[#allocation10 + $0x20] ss:$16 sps:$4 sm:$0xff]   ;;  %v5005_v13 = vld [vmem:[#allocation10 + $0x28] ss:$16 sps:$4 sm:$0xff]  }
 0x75c   :  { %3836 = vtanh.f32 %v1358_v23  ;;  %v3685_v23 = vld [vmem:[#allocation8 + $0xec] ss:$16 sps:$4 sm:$0xff]   ;;  %v5011_v20 = vld [vmem:[#allocation10 + $0x44] ss:$16 sps:$4 sm:$0xff]   ;;  %v5015_v14 = vld [vmem:[#allocation10 + $0x40] ss:$16 sps:$4 sm:$0xff]  }
 0x75d   :  { %v5013_v17 = vld [vmem:[#allocation10 + $0x4c] ss:$16 sps:$4 sm:$0xff]   ;;  %v5017_v27 = vld [vmem:[#allocation10 + $0x48] ss:$16 sps:$4 sm:$0xff]   ;;  %v5023_v54 = vld [vmem:[#allocation10 + $0x64] ss:$16 sps:$4 sm:$0xff]  }
 0x75e   :  { %v5025_v37 = vld [vmem:[#allocation10 + $0x6c] ss:$16 sps:$4 sm:$0xff]  }
 0x763   :  { %v3831_v4 = vpop.eup %3830 }
 0x764   :  { %v3833_v38 = vpop.eup %3832  ;;  %v1363_v40 = vadd.f32 1.0, %v3831_v4  ;;  %v5027_v4 = vld [vmem:[#allocation10 + $0x60] ss:$16 sps:$4 sm:$0xff]  }
 0x765   :  { %v1369_v42 = vadd.f32 1.0, %v3833_v38  ;;  %v3835_v43 = vpop.eup %3834  ;;  %v5029_v38 = vld [vmem:[#allocation10 + $0x68] ss:$16 sps:$4 sm:$0xff]  }
 0x766   :  { %3838 = vrcp.f32 %v1363_v40  ;;  %v3837_v44 = vpop.eup %3836  ;;  %v1376_v50 = vadd.f32 1.0, %v3835_v43  ;;  %v5035_v40 = vld [vmem:[#allocation10 + $0x84] ss:$16 sps:$4 sm:$0xff]   ;;  %v5039_v43 = vld [vmem:[#allocation10 + $0x80] ss:$16 sps:$4 sm:$0xff]  }
 0x767   :  { %3840 = vrcp.f32 %v1369_v42  ;;  %v5037_v42 = vld [vmem:[#allocation10 + $0x8c] ss:$16 sps:$4 sm:$0xff]  }
 0x768   :  { %3842 = vrcp.f32 %v1376_v50  ;;  %v5053_v50 = vld [vmem:[#allocation10 + $0xa8] ss:$16 sps:$4 sm:$0xff]  }
 0x770   :  { %v3839_v45 = vpop.eup %3838 }
 0x771   :  { %v3841_v46 = vpop.eup %3840  ;;  %v1380_v47 = vmul.f32 %v3839_v45, %v3837_v44  ;;  %v5041_v44 = vld [vmem:[#allocation10 + $0x88] ss:$16 sps:$4 sm:$0xff]   ;;  %v5047_v45 = vld [vmem:[#allocation10 + $0xa4] ss:$16 sps:$4 sm:$0xff]  }
 0x772   :  { %v1379_v33 = vmul.f32 %v3841_v46, %v4922_v55  ;;  %v3843_v35 = vpop.eup %3842  ;;  %v3662_v55 = vld [vmem:[#allocation8 + $0x80] ss:$16 sps:$4 sm:$0xff]   ;;  %v5049_v46 = vld [vmem:[#allocation10 + $0xac] ss:$16 sps:$4 sm:$0xff]  }
 0x774   :  { %v4966_v34 = vadd.f32 %v1380_v47, %v1379_v33  ;;  %v5051_v47 = vld [vmem:[#allocation10 + $0xa0] ss:$16 sps:$4 sm:$0xff]   ;;  %v5059_v33 = vld [vmem:[#allocation10 + $0xc4] ss:$16 sps:$4 sm:$0xff]  }
 0x776   :  { %3844 = vtanh.f32 %v4966_v34 }
 0x780   :  { %v3845_v36 = vpop.eup %3844 }
 0x781   :  { %v4969_v39 = vmul.f32 %v3845_v36, %v3843_v35  ;;  %v5061_v35 = vld [vmem:[#allocation10 + $0xcc] ss:$16 sps:$4 sm:$0xff]   ;;  %v5063_v36 = vld [vmem:[#allocation10 + $0xc0] ss:$16 sps:$4 sm:$0xff]  }
 0x783   :  { %v1393_v2 = vpack.c.bf16 %v4969_v39, %v4969_v39 }
 0x785   :  { %1427 = vmatmul.mubr.bf16.vlgmr.msra.gmra.mrb[44].mxu0 %v1393_v2  ;;  %1468 = vmatmul.mubr.bf16.vlgmr.msra.gmra.mrb[44].mxu1 %v1393_v2  ;;  %v5073_v2 = vld [vmem:[#allocation10 + $0xec] ss:$16 sps:$4 sm:$0xff]  }
 0x786   :  { %1735 = vmatpush1.bf16.msra.mxu0 %v3638_v60  ;;  %1808 = vmatpush1.bf16.msra.mxu1 %v3641_v1  ;;  %v5065_v60 = vld [vmem:[#allocation10 + $0xc8] ss:$16 sps:$4 sm:$0xff]   ;;  %v5071_v1 = vld [vmem:[#allocation10 + $0xe4] ss:$16 sps:$4 sm:$0xff]  }
 0x787   :  { %1736 = vmatprep.subr.bf16.mxu0 %v3646_v3  ;;  %1809 = vmatprep.subr.bf16.mxu1 %v3649_v21  ;;  %v5075_v3 = vld [vmem:[#allocation10 + $0xe0] ss:$16 sps:$4 sm:$0xff]   ;;  %v5077_v21 = vld [vmem:[#allocation10 + $0xe8] ss:$16 sps:$4 sm:$0xff]  }
 0x788   :  { %1766 = vmatprep.mubr.bf16.mxu0 %v5723_v41  ;;  %1839 = vmatprep.mubr.bf16.mxu1 %v5723_v41 }
 0x78a   :  { %1737 = vmatpush1.bf16.msra.mxu0 %v3644_v22  ;;  %1810 = vmatpush1.bf16.msra.mxu1 %v3647_v6 }
 0x78b   :  { %1738 = vmatprep.subr.bf16.mxu0 %v3652_v7  ;;  %1811 = vmatprep.subr.bf16.mxu1 %v3655_v9  ;;  %v5741_v7 = vld [vmem:[#allocation34_spill] sm:$0xff] }
 0x78e   :  { %1739 = vmatpush1.bf16.msra.mxu0 %v3650_v63  ;;  %1812 = vmatpush1.bf16.msra.mxu1 %v3653_v10  ;;  %v5742_v63 = vld [vmem:[#allocation38_spill] sm:$0xff] }
 0x78f   :  { %1740 = vmatprep.subr.bf16.mxu0 %v3658_v18  ;;  %1813 = vmatprep.subr.bf16.mxu1 %v3661_v30 }
 0x792   :  { %1741 = vmatpush1.bf16.msra.mxu0 %v3656_v16  ;;  %1814 = vmatpush1.bf16.msra.mxu1 %v3659_v51  ;;  %v5743_v16 = vld [vmem:[#allocation36_spill] sm:$0xff] }
 0x793   :  { %1742 = vmatprep.subr.bf16.mxu0 %v3664_v52  ;;  %1815 = vmatprep.subr.bf16.mxu1 %v3667_v53  ;;  %v5744_v52 = vld [vmem:[#allocation39_spill] sm:$0xff] }
 0x796   :  { %1743 = vmatpush1.bf16.msra.mxu0 %v3662_v55  ;;  %1816 = vmatpush1.bf16.msra.mxu1 %v3665_v56 }
 0x797   :  { %1744 = vmatprep.subr.bf16.mxu0 %v3670_v58  ;;  %1817 = vmatprep.subr.bf16.mxu1 %v3673_v57 }
 0x79a   :  { %1745 = vmatpush1.bf16.msra.mxu0 %v3668_v48  ;;  %1818 = vmatpush1.bf16.msra.mxu1 %v3671_v62 }
 0x79b   :  { %1746 = vmatprep.subr.bf16.mxu0 %v3676_v8  ;;  %1819 = vmatprep.subr.bf16.mxu1 %v3679_v5 }
 0x79e   :  { %1747 = vmatpush1.bf16.msra.mxu0 %v3674_v26  ;;  %1820 = vmatpush1.bf16.msra.mxu1 %v3677_v0 }
 0x79f   :  { %1748 = vmatprep.subr.bf16.mxu0 %v3682_v61  ;;  %1821 = vmatprep.subr.bf16.mxu1 %v3685_v23 }
 0x7a2   :  { %1749 = vmatpush1.bf16.msra.mxu0 %v3680_v24  ;;  %1822 = vmatpush1.bf16.msra.mxu1 %v3683_v25 }
 0x7a3   :  { %2108 = vmatprep.subr.bf16.mxu0 %v4987_v15  ;;  %2149 = vmatprep.subr.bf16.mxu1 %v4989_v49 }
 0x7a5   :  { %1767 = vmatmul.mubr.bf16.vlgmr.msra.gmra.mrb[48].mxu0 %v1516_v28  ;;  %1840 = vmatmul.mubr.bf16.vlgmr.msra.gmra.mrb[48].mxu1 %v1516_v28 }
 0x7a6   :  { %1776 = vmatprep.mubr.bf16.mxu0 %v5723_v41  ;;  %1849 = vmatprep.mubr.bf16.mxu1 %v5723_v41 }
 0x7a7   :  { %2109 = vmatpush1.bf16.msra.mxu0 %v4991_v12  ;;  %2150 = vmatpush1.bf16.msra.mxu1 %v4993_v19 }
 0x7a8   :  { %2110 = vmatprep.subr.bf16.mxu0 %v4999_v11  ;;  %2151 = vmatprep.subr.bf16.mxu1 %v5001_v59 }
 0x7ab   :  { %2111 = vmatpush1.bf16.msra.mxu0 %v5003_v32  ;;  %2152 = vmatpush1.bf16.msra.mxu1 %v5005_v13 }
 0x7ac   :  { %2112 = vmatprep.subr.bf16.mxu0 %v5011_v20  ;;  %2153 = vmatprep.subr.bf16.mxu1 %v5013_v17 }
 0x7ad   :  { %1777 = vmatmul.mubr.bf16.gmra.mrb[52].mxu0 %v1517_v29  ;;  %1850 = vmatmul.mubr.bf16.gmra.mrb[52].mxu1 %v1517_v29 }
 0x7ae   :  { %1786 = vmatprep.mubr.bf16.mxu0 %v5723_v41  ;;  %1859 = vmatprep.mubr.bf16.mxu1 %v5723_v41 }
 0x7af   :  { %2113 = vmatpush1.bf16.msra.mxu0 %v5015_v14  ;;  %2154 = vmatpush1.bf16.msra.mxu1 %v5017_v27 }
 0x7b0   :  { %2114 = vmatprep.subr.bf16.mxu0 %v5023_v54  ;;  %2155 = vmatprep.subr.bf16.mxu1 %v5025_v37 }
 0x7b3   :  { %2115 = vmatpush1.bf16.msra.mxu0 %v5027_v4  ;;  %2156 = vmatpush1.bf16.msra.mxu1 %v5029_v38 }
 0x7b4   :  { %2116 = vmatprep.subr.bf16.mxu0 %v5035_v40  ;;  %2157 = vmatprep.subr.bf16.mxu1 %v5037_v42 }
 0x7b5   :  { %1787 = vmatmul.mubr.bf16.gmra.mrb[56].mxu0 %v1518_v31  ;;  %1860 = vmatmul.mubr.bf16.gmra.mrb[56].mxu1 %v1518_v31 }
 0x7b6   :  { %1796 = vmatprep.mubr.bf16.mxu0 %v5723_v41  ;;  %1869 = vmatprep.mubr.bf16.mxu1 %v5723_v41 }
 0x7b7   :  { %2117 = vmatpush1.bf16.msra.mxu0 %v5039_v43  ;;  %2158 = vmatpush1.bf16.msra.mxu1 %v5041_v44 }
 0x7b8   :  { %2118 = vmatprep.subr.bf16.mxu0 %v5047_v45  ;;  %2159 = vmatprep.subr.bf16.mxu1 %v5049_v46 }
 0x7bb   :  { %2119 = vmatpush1.bf16.msra.mxu0 %v5051_v47  ;;  %2160 = vmatpush1.bf16.msra.mxu1 %v5053_v50 }
 0x7bc   :  { %2120 = vmatprep.subr.bf16.mxu0 %v5059_v33  ;;  %2161 = vmatprep.subr.bf16.mxu1 %v5061_v35 }
 0x7bf   :  { %2121 = vmatpush1.bf16.msra.mxu0 %v5063_v36  ;;  %2162 = vmatpush1.bf16.msra.mxu1 %v5065_v60 }
 0x7c0   :  { %2122 = vmatprep.subr.bf16.mxu0 %v5071_v1  ;;  %2163 = vmatprep.subr.bf16.mxu1 %v5073_v2 }
 0x7c3   :  { %2123 = vmatpush1.bf16.msra.mxu0 %v5075_v3  ;;  %2164 = vmatpush1.bf16.msra.mxu1 %v5077_v21 }
 0x7c4   :  { %2223 = vmatprep.subr.bf16.mxu0 %v4987_v15  ;;  %2264 = vmatprep.subr.bf16.mxu1 %v4989_v49 }
 0x858   :  { %v1428_v22 = vpop.f32.mrb[44].mxu0  ;;  %v1469_v6 = vpop.f32.mrb[44].mxu1 }
 0x859   :  { %v1476_v9 = vadd.f32 %v1428_v22, %v5741_v7  ;;  %v1478_v10 = vadd.f32 %v1469_v6, %v5742_v63  ;;  %v1430_v18 = vpop.f32.mrb[45].mxu0  ;;  %v1471_v30 = vpop.f32.mrb[45].mxu1 }
 0x85a   :  { %v1477_v51 = vadd.f32 %v1430_v18, %v5743_v16  ;;  %v1479_v53 = vadd.f32 %v1471_v30, %v5744_v52  ;;  %v1432_v55 = vpop.f32.mrb[46].mxu0  ;;  %v1473_v56 = vpop.f32.mrb[46].mxu1 }
 0x85b   :  { %v3394_v58 = vmul.f32 -1.442695, %v1476_v9  ;;  %v1433_v57 = vpop.f32.mrb[47].mxu0  ;;  %v1474_v48 = vpop.f32.mrb[47].mxu1 }
 0x85c   :  { %v3395_v62 = vmul.f32 -1.442695, %v1477_v51  ;;  %v3396_v8 = vmul.f32 -1.442695, %v1479_v53 }
 0x85d   :  { %3846 = vpow2.f32 %v3394_v58 }
 0x85e   :  { %3848 = vpow2.f32 %v3395_v62 }
 0x85f   :  { %3850 = vpow2.f32 %v3396_v8 }
 0x860   :  { %3852 = vtanh.f32 %v1478_v10 }
 0x867   :  { %v3847_v5 = vpop.eup %3846 }
 0x868   :  { %v3849_v26 = vpop.eup %3848  ;;  %v1483_v0 = vadd.f32 1.0, %v3847_v5 }
 0x869   :  { %v1489_v61 = vadd.f32 1.0, %v3849_v26  ;;  %v3851_v23 = vpop.eup %3850 }
 0x86a   :  { %3854 = vrcp.f32 %v1483_v0  ;;  %v3853_v24 = vpop.eup %3852  ;;  %v1496_v31 = vadd.f32 1.0, %v3851_v23 }
 0x86b   :  { %3856 = vrcp.f32 %v1489_v61 }
 0x86c   :  { %3858 = vrcp.f32 %v1496_v31  ;;  %v1552_v31 = vld [vmem:[%s5675_s6] sm:$0xf] }
 0x874   :  { %v3855_v25 = vpop.eup %3854 }
 0x875   :  { %v3857_v28 = vpop.eup %3856  ;;  %v1500_v29 = vmul.f32 %v3855_v25, %v3853_v24 }
 0x876   :  { %v1499_v22 = vmul.f32 %v3857_v28, %v4966_v34  ;;  %v3859_v57 = vpop.eup %3858 }
 0x878   :  { %v1501_v6 = vadd.f32 %v1500_v29, %v1499_v22  ;;  %v5090_v7 = vpop.f32.mrb[48].mxu0  ;;  %v5092_v9 = vpop.f32.mrb[48].mxu1 }
 0x879   :  { %v5094_v63 = vpop.f32.mrb[49].mxu0  ;;  %v5096_v10 = vpop.f32.mrb[49].mxu1 }
 0x87a   :  { %1507 = vst [vmem:[#allocation12] sm:$0xff] %v1501_v6  ;;  %v5098_v18 = vpop.f32.mrb[50].mxu0  ;;  %v5100_v30 = vpop.f32.mrb[50].mxu1  ;;  %3860 = vtanh.f32 %v1501_v6 }
 0x87b   :  { %v5102_v16 = vpop.f32.mrb[51].mxu0  ;;  %v5104_v51 = vpop.f32.mrb[51].mxu1 }
 0x880   :  { %v5106_v34 = vpop.f32.mrb[52].mxu0  ;;  %v5108_v52 = vpop.f32.mrb[52].mxu1 }
 0x881   :  { %5745 = vst [vmem:[#allocation21_spill] sm:$0xff] %v5108_v52  ;;  %v5110_v53 = vpop.f32.mrb[53].mxu0  ;;  %v5112_v55 = vpop.f32.mrb[53].mxu1 }
 0x882   :  { %5746 = vst [vmem:[#allocation19_spill] sm:$0xff] %v5110_v53  ;;  %5747 = vst [vmem:[#allocation22_spill] sm:$0xff] %v5112_v55  ;;  %v5114_v56 = vpop.f32.mrb[54].mxu0  ;;  %v5116_v58 = vpop.f32.mrb[54].mxu1 }
 0x883   :  { %5748 = vst [vmem:[#allocation20_spill] sm:$0xff] %v5114_v56  ;;  %5749 = vst [vmem:[#allocation23_spill] sm:$0xff] %v5116_v58  ;;  %v5118_v48 = vpop.f32.mrb[55].mxu0  ;;  %v5120_v62 = vpop.f32.mrb[55].mxu1 }
 0x884   :  { %5750 = vst [vmem:[#allocation24_spill] sm:$0xff] %v5118_v48  ;;  %5751 = vst [vmem:[#allocation27_spill] sm:$0xff] %v5120_v62  ;;  %v3861_v8 = vpop.eup %3860 }
 0x885   :  { %v1503_v5 = vmul.f32 %v3861_v8, %v3859_v57 }
 0x887   :  { %1506 = vst [vmem:[#allocation11] sm:$0xff] %v1503_v5  ;;  %v1519_v26 = vpack.c.bf16 %v1503_v5, %v4969_v39 }
 0x888   :  { %v5123_v0 = vpop.f32.mrb[56].mxu0  ;;  %v5125_v61 = vpop.f32.mrb[56].mxu1 }
 0x889   :  { %5752 = vst [vmem:[#allocation25_spill] sm:$0xff] %v5123_v0  ;;  %5753 = vst [vmem:[#allocation29_spill] sm:$0xff] %v5125_v61  ;;  %v5127_v23 = vpop.f32.mrb[57].mxu0  ;;  %v5129_v24 = vpop.f32.mrb[57].mxu1  ;;  %1797 = vmatmul.mubr.bf16.gmra.mrb[60].mxu0 %v1519_v26  ;;  %1870 = vmatmul.mubr.bf16.gmra.mrb[60].mxu1 %v1519_v26 }
 0x88a   :  { %5754 = vst [vmem:[#allocation26_spill] sm:$0xff] %v5127_v23  ;;  %5755 = vst [vmem:[#allocation30_spill] sm:$0xff] %v5129_v24  ;;  %v5131_v25 = vpop.f32.mrb[58].mxu0  ;;  %v5133_v28 = vpop.f32.mrb[58].mxu1  ;;  %2140 = vmatprep.mubr.bf16.mxu0 %v5723_v41  ;;  %2181 = vmatprep.mubr.bf16.mxu1 %v5723_v41 }
 0x88b   :  { %5756 = vst [vmem:[#allocation28_spill] sm:$0xff] %v5131_v25  ;;  %5757 = vst [vmem:[#allocation31_spill] sm:$0xff] %v5133_v28  ;;  %v5137_v29 = vpop.f32.mrb[59].mxu0  ;;  %v5139_v39 = vpop.f32.mrb[59].mxu1 }
 0x88c   :  { %5758 = vst [vmem:[#allocation32_spill] sm:$0xff] %v5137_v29  ;;  %5759 = vst [vmem:[#allocation35_spill] sm:$0xff] %v5139_v39  ;;  %v5766_v39 = vld [vmem:[#allocation18_spill] sm:$0xff] }
 0x88d   :  { %v5767_v29 = vsub.s32 0, %v5766_v39  ;;  %v5768_v25 = vsub.s32 2, %v5766_v39 }
 0x88f   :  { %v5194_v28 = vrot.slane %v1552_v31, %v5767_v29  ;;  %v5198_v24 = vrot.slane %v1552_v31, %v5768_v25 }
 0x891   :  { %2141 = vmatmul.mubr.bf16.vlgmr.msra.gmra.mrb[64].mxu0 %v5723_v41  ;;  %2182 = vmatmul.mubr.bf16.vlgmr.msra.gmra.mrb[64].mxu1 %v5723_v41  ;;  %v1769_v29 = vadd.f32 %v5090_v7, %v5194_v28 }
 0x892   :  { %2224 = vmatpush1.bf16.msra.mxu0 %v4991_v12  ;;  %2265 = vmatpush1.bf16.msra.mxu1 %v4993_v19 }
 0x893   :  { %2225 = vmatprep.subr.bf16.mxu0 %v4999_v11  ;;  %2266 = vmatprep.subr.bf16.mxu1 %v5001_v59 }
 0x894   :  { %2255 = vmatprep.mubr.bf16.mxu0 %v5723_v41  ;;  %2296 = vmatprep.mubr.bf16.mxu1 %v5723_v41 }
 0x896   :  { %2226 = vmatpush1.bf16.msra.mxu0 %v5003_v32  ;;  %2267 = vmatpush1.bf16.msra.mxu1 %v5005_v13 }
 0x897   :  { %2227 = vmatprep.subr.bf16.mxu0 %v5011_v20  ;;  %2268 = vmatprep.subr.bf16.mxu1 %v5013_v17 }
 0x89a   :  { %2228 = vmatpush1.bf16.msra.mxu0 %v5015_v14  ;;  %2269 = vmatpush1.bf16.msra.mxu1 %v5017_v27 }
 0x89b   :  { %2229 = vmatprep.subr.bf16.mxu0 %v5023_v54  ;;  %2270 = vmatprep.subr.bf16.mxu1 %v5025_v37 }
 0x89e   :  { %2230 = vmatpush1.bf16.msra.mxu0 %v5027_v4  ;;  %2271 = vmatpush1.bf16.msra.mxu1 %v5029_v38 }
 0x89f   :  { %2231 = vmatprep.subr.bf16.mxu0 %v5035_v40  ;;  %2272 = vmatprep.subr.bf16.mxu1 %v5037_v42 }
 0x8a2   :  { %2232 = vmatpush1.bf16.msra.mxu0 %v5039_v43  ;;  %2273 = vmatpush1.bf16.msra.mxu1 %v5041_v44 }
 0x8a3   :  { %2233 = vmatprep.subr.bf16.mxu0 %v5047_v45  ;;  %2274 = vmatprep.subr.bf16.mxu1 %v5049_v46 }
 0x8a6   :  { %2234 = vmatpush1.bf16.msra.mxu0 %v5051_v47  ;;  %2275 = vmatpush1.bf16.msra.mxu1 %v5053_v50 }
 0x8a7   :  { %2235 = vmatprep.subr.bf16.mxu0 %v5059_v33  ;;  %2276 = vmatprep.subr.bf16.mxu1 %v5061_v35 }
 0x8aa   :  { %2236 = vmatpush1.bf16.msra.mxu0 %v5063_v36  ;;  %2277 = vmatpush1.bf16.msra.mxu1 %v5065_v60 }
 0x8ab   :  { %2237 = vmatprep.subr.bf16.mxu0 %v5071_v1  ;;  %2278 = vmatprep.subr.bf16.mxu1 %v5073_v2 }
 0x8ae   :  { %2238 = vmatpush1.bf16.msra.mxu0 %v5075_v3  ;;  %2279 = vmatpush1.bf16.msra.mxu1 %v5077_v21 }
 0x8af   :  { %2338 = vmatprep.subr.bf16.mxu0 %v4987_v15  ;;  %2379 = vmatprep.subr.bf16.mxu1 %v4989_v49 }
 0x95c   :  { %v5180_v22 = vpop.f32.mrb[60].mxu0  ;;  %v5182_v6 = vpop.f32.mrb[60].mxu1 }
 0x95d   :  { %5760 = vst [vmem:[#allocation33_spill] sm:$0xff] %v5180_v22  ;;  %5761 = vst [vmem:[#allocation37_spill] sm:$0xff] %v5182_v6  ;;  %v5184_v57 = vpop.f32.mrb[61].mxu0  ;;  %v5186_v8 = vpop.f32.mrb[61].mxu1 }
 0x95e   :  { %5762 = vst [vmem:[#allocation34_spill] sm:$0xff] %v5184_v57  ;;  %5763 = vst [vmem:[#allocation38_spill] sm:$0xff] %v5186_v8  ;;  %v5188_v5 = vpop.f32.mrb[62].mxu0  ;;  %v5190_v26 = vpop.f32.mrb[62].mxu1  ;;  %v5771_v57 = vsub.s32 1, %v5766_v39 }
 0x95f   :  { %5764 = vst [vmem:[#allocation36_spill] sm:$0xff] %v5188_v5  ;;  %5765 = vst [vmem:[#allocation39_spill] sm:$0xff] %v5190_v26  ;;  %v5200_v23 = vpop.f32.mrb[63].mxu0  ;;  %v5202_v22 = vpop.f32.mrb[63].mxu1  ;;  %v5772_v5 = vsub.s32 3, %v5766_v39  ;;  %v1842_v26 = vadd.f32 %v5092_v9, %v5198_v24 }
 0x960   :  { %5769 = vst [vmem:[#allocation40_spill] sm:$0xff] %v5200_v23  ;;  %5770 = vst [vmem:[#allocation41_spill] sm:$0xff] %v5202_v22  ;;  %v5206_v6 = vrot.slane %v1552_v31, %v5771_v57 }
 0x961   :  { %v5210_v8 = vrot.slane %v1552_v31, %v5772_v5 }
 0x962   :  { %v1771_v25 = vadd.f32 %v5094_v63, %v5206_v6 }
 0x963   :  { %v1844_v22 = vadd.f32 %v5096_v10, %v5210_v8 }
 0x964   :  { %v2142_v23 = vpop.f32.mrb[64].mxu0  ;;  %v2183_v61 = vpop.f32.mrb[64].mxu1 }
 0x965   :  { %v2190_v57 = vadd.f32 %v2142_v23, %v1769_v29  ;;  %v2192_v0 = vadd.f32 %v2183_v61, %v1842_v26  ;;  %v2144_v62 = vpop.f32.mrb[65].mxu0  ;;  %v2185_v39 = vpop.f32.mrb[65].mxu1 }
 0x966   :  { %v2191_v31 = vadd.f32 %v2144_v62, %v1771_v25  ;;  %v2193_v5 = vadd.f32 %v2185_v39, %v1844_v22  ;;  %v2146_v48 = vpop.f32.mrb[66].mxu0  ;;  %v2187_v58 = vpop.f32.mrb[66].mxu1 }
 0x967   :  { %v3461_v7 = vmul.f32 -1.442695, %v2190_v57  ;;  %v2147_v56 = vpop.f32.mrb[67].mxu0  ;;  %v2188_v55 = vpop.f32.mrb[67].mxu1  ;;  %v1775_v57 = vadd.f32 %v5102_v16, %v5206_v6 }
 0x968   :  { %v3462_v9 = vmul.f32 -1.442695, %v2191_v31  ;;  %v3463_v63 = vmul.f32 -1.442695, %v2193_v5  ;;  %v1848_v31 = vadd.f32 %v5104_v51, %v5210_v8 }
 0x969   :  { %3862 = vpow2.f32 %v3461_v7 }
 0x96a   :  { %3864 = vpow2.f32 %v3462_v9 }
 0x96b   :  { %3866 = vpow2.f32 %v3463_v63 }
 0x96c   :  { %3868 = vtanh.f32 %v2192_v0  ;;  %v1846_v0 = vadd.f32 %v5100_v30, %v5198_v24 }
 0x973   :  { %v3863_v53 = vpop.eup %3862 }
 0x974   :  { %v3865_v52 = vpop.eup %3864  ;;  %v2197_v10 = vadd.f32 1.0, %v3863_v53 }
 0x975   :  { %v2203_v23 = vadd.f32 1.0, %v3865_v52  ;;  %v3867_v61 = vpop.eup %3866  ;;  %v1773_v52 = vadd.f32 %v5098_v18, %v5194_v28 }
 0x976   :  { %3870 = vrcp.f32 %v2197_v10  ;;  %v3869_v62 = vpop.eup %3868  ;;  %v2210_v22 = vadd.f32 1.0, %v3867_v61 }
 0x977   :  { %3872 = vrcp.f32 %v2203_v23 }
 0x978   :  { %3874 = vrcp.f32 %v2210_v22 }
 0x980   :  { %v3871_v39 = vpop.eup %3870 }
 0x981   :  { %v3873_v48 = vpop.eup %3872  ;;  %v2214_v58 = vmul.f32 %v3871_v39, %v3869_v62 }
 0x982   :  { %v2213_v56 = vmul.f32 0.0, %v3873_v48  ;;  %v3875_v26 = vpop.eup %3874 }
 0x984   :  { %v5220_v55 = vadd.f32 %v2214_v58, %v2213_v56 }
 0x986   :  { %3876 = vtanh.f32 %v5220_v55 }
 0x990   :  { %v3877_v29 = vpop.eup %3876 }
 0x991   :  { %v2217_v53 = vmul.f32 %v3877_v29, %v3875_v26 }
 0x993   :  { %v2222_v25 = vpack.c.bf16 %v2217_v53, %v2217_v53 }
 0x995   :  { %2256 = vmatmul.mubr.bf16.vlgmr.msra.gmra.mrb[68].mxu0 %v2222_v25  ;;  %2297 = vmatmul.mubr.bf16.vlgmr.msra.gmra.mrb[68].mxu1 %v2222_v25 }
 0x996   :  { %2339 = vmatpush1.bf16.msra.mxu0 %v4991_v12  ;;  %2380 = vmatpush1.bf16.msra.mxu1 %v4993_v19 }
 0x997   :  { %2340 = vmatprep.subr.bf16.mxu0 %v4999_v11  ;;  %2381 = vmatprep.subr.bf16.mxu1 %v5001_v59 }
 0x998   :  { %2370 = vmatprep.mubr.bf16.mxu0 %v5723_v41  ;;  %2411 = vmatprep.mubr.bf16.mxu1 %v5723_v41 }
 0x99a   :  { %2341 = vmatpush1.bf16.msra.mxu0 %v5003_v32  ;;  %2382 = vmatpush1.bf16.msra.mxu1 %v5005_v13 }
 0x99b   :  { %2342 = vmatprep.subr.bf16.mxu0 %v5011_v20  ;;  %2383 = vmatprep.subr.bf16.mxu1 %v5013_v17 }
 0x99e   :  { %2343 = vmatpush1.bf16.msra.mxu0 %v5015_v14  ;;  %2384 = vmatpush1.bf16.msra.mxu1 %v5017_v27 }
 0x99f   :  { %2344 = vmatprep.subr.bf16.mxu0 %v5023_v54  ;;  %2385 = vmatprep.subr.bf16.mxu1 %v5025_v37 }
 0x9a2   :  { %2345 = vmatpush1.bf16.msra.mxu0 %v5027_v4  ;;  %2386 = vmatpush1.bf16.msra.mxu1 %v5029_v38 }
 0x9a3   :  { %2346 = vmatprep.subr.bf16.mxu0 %v5035_v40  ;;  %2387 = vmatprep.subr.bf16.mxu1 %v5037_v42 }
 0x9a6   :  { %2347 = vmatpush1.bf16.msra.mxu0 %v5039_v43  ;;  %2388 = vmatpush1.bf16.msra.mxu1 %v5041_v44 }
 0x9a7   :  { %2348 = vmatprep.subr.bf16.mxu0 %v5047_v45  ;;  %2389 = vmatprep.subr.bf16.mxu1 %v5049_v46 }
 0x9aa   :  { %2349 = vmatpush1.bf16.msra.mxu0 %v5051_v47  ;;  %2390 = vmatpush1.bf16.msra.mxu1 %v5053_v50 }
 0x9ab   :  { %2350 = vmatprep.subr.bf16.mxu0 %v5059_v33  ;;  %2391 = vmatprep.subr.bf16.mxu1 %v5061_v35 }
 0x9ae   :  { %2351 = vmatpush1.bf16.msra.mxu0 %v5063_v36  ;;  %2392 = vmatpush1.bf16.msra.mxu1 %v5065_v60 }
 0x9af   :  { %2352 = vmatprep.subr.bf16.mxu0 %v5071_v1  ;;  %2393 = vmatprep.subr.bf16.mxu1 %v5073_v2 }
 0x9b2   :  { %2353 = vmatpush1.bf16.msra.mxu0 %v5075_v3  ;;  %2394 = vmatpush1.bf16.msra.mxu1 %v5077_v21 }
 0x9b3   :  { %2453 = vmatprep.subr.bf16.mxu0 %v4987_v15  ;;  %2494 = vmatprep.subr.bf16.mxu1 %v4989_v49 }
 0xa68   :  { %v2257_v5 = vpop.f32.mrb[68].mxu0  ;;  %v2298_v7 = vpop.f32.mrb[68].mxu1 }
 0xa69   :  { %v2305_v9 = vadd.f32 %v2257_v5, %v1773_v52  ;;  %v2307_v63 = vadd.f32 %v2298_v7, %v1846_v0  ;;  %v2259_v10 = vpop.f32.mrb[69].mxu0  ;;  %v2300_v23 = vpop.f32.mrb[69].mxu1 }
 0xa6a   :  { %v2306_v61 = vadd.f32 %v2259_v10, %v1775_v57  ;;  %v2308_v62 = vadd.f32 %v2300_v23, %v1848_v31  ;;  %v2261_v39 = vpop.f32.mrb[70].mxu0  ;;  %v2302_v48 = vpop.f32.mrb[70].mxu1 }
 0xa6b   :  { %v3464_v18 = vmul.f32 -1.442695, %v2305_v9  ;;  %v2262_v58 = vpop.f32.mrb[71].mxu0  ;;  %v2303_v22 = vpop.f32.mrb[71].mxu1  ;;  %v5774_v39 = vld [vmem:[#allocation19_spill] sm:$0xff] }
 0xa6c   :  { %v3465_v30 = vmul.f32 -1.442695, %v2306_v61  ;;  %v3466_v16 = vmul.f32 -1.442695, %v2308_v62  ;;  %v5773_v61 = vld [vmem:[#allocation21_spill] sm:$0xff]  ;;  %v1781_v48 = vadd.f32 %v5774_v39, %v5206_v6 }
 0xa6d   :  { %3878 = vpow2.f32 %v3464_v18  ;;  %v1852_v62 = vadd.f32 %v5773_v61, %v5198_v24  ;;  %v5775_v18 = vld [vmem:[#allocation22_spill] sm:$0xff] }
 0xa6e   :  { %3880 = vpow2.f32 %v3465_v30  ;;  %v1854_v58 = vadd.f32 %v5775_v18, %v5210_v8 }
 0xa6f   :  { %3882 = vpow2.f32 %v3466_v16 }
 0xa70   :  { %3884 = vtanh.f32 %v2307_v63 }
 0xa77   :  { %v3879_v56 = vpop.eup %3878 }
 0xa78   :  { %v3881_v26 = vpop.eup %3880  ;;  %v2312_v51 = vadd.f32 1.0, %v3879_v56 }
 0xa79   :  { %v2318_v29 = vadd.f32 1.0, %v3881_v26  ;;  %v3883_v53 = vpop.eup %3882 }
 0xa7a   :  { %3886 = vrcp.f32 %v2312_v51  ;;  %v3885_v25 = vpop.eup %3884  ;;  %v2325_v31 = vadd.f32 1.0, %v3883_v53 }
 0xa7b   :  { %3888 = vrcp.f32 %v2318_v29 }
 0xa7c   :  { %3890 = vrcp.f32 %v2325_v31 }
 0xa84   :  { %v3887_v52 = vpop.eup %3886 }
 0xa85   :  { %v3889_v0 = vpop.eup %3888  ;;  %v2329_v57 = vmul.f32 %v3887_v52, %v3885_v25 }
 0xa86   :  { %v2328_v5 = vmul.f32 %v3889_v0, %v5220_v55  ;;  %v3891_v9 = vpop.eup %3890  ;;  %v1779_v55 = vadd.f32 %v5106_v34, %v5194_v28 }
 0xa88   :  { %v5266_v7 = vadd.f32 %v2329_v57, %v2328_v5 }
 0xa8a   :  { %3892 = vtanh.f32 %v5266_v7 }
 0xa94   :  { %v3893_v10 = vpop.eup %3892 }
 0xa95   :  { %v2332_v23 = vmul.f32 %v3893_v10, %v3891_v9 }
 0xa97   :  { %v2337_v63 = vpack.c.bf16 %v2332_v23, %v2332_v23 }
 0xa99   :  { %2371 = vmatmul.mubr.bf16.vlgmr.msra.gmra.mrb[72].mxu0 %v2337_v63  ;;  %2412 = vmatmul.mubr.bf16.vlgmr.msra.gmra.mrb[72].mxu1 %v2337_v63 }
 0xa9a   :  { %2454 = vmatpush1.bf16.msra.mxu0 %v4991_v12  ;;  %2495 = vmatpush1.bf16.msra.mxu1 %v4993_v19 }
 0xa9b   :  { %2455 = vmatprep.subr.bf16.mxu0 %v4999_v11  ;;  %2496 = vmatprep.subr.bf16.mxu1 %v5001_v59 }
 0xa9c   :  { %2485 = vmatprep.mubr.bf16.mxu0 %v5723_v41  ;;  %2526 = vmatprep.mubr.bf16.mxu1 %v5723_v41 }
 0xa9e   :  { %2456 = vmatpush1.bf16.msra.mxu0 %v5003_v32  ;;  %2497 = vmatpush1.bf16.msra.mxu1 %v5005_v13 }
 0xa9f   :  { %2457 = vmatprep.subr.bf16.mxu0 %v5011_v20  ;;  %2498 = vmatprep.subr.bf16.mxu1 %v5013_v17 }
 0xaa2   :  { %2458 = vmatpush1.bf16.msra.mxu0 %v5015_v14  ;;  %2499 = vmatpush1.bf16.msra.mxu1 %v5017_v27 }
 0xaa3   :  { %2459 = vmatprep.subr.bf16.mxu0 %v5023_v54  ;;  %2500 = vmatprep.subr.bf16.mxu1 %v5025_v37 }
 0xaa6   :  { %2460 = vmatpush1.bf16.msra.mxu0 %v5027_v4  ;;  %2501 = vmatpush1.bf16.msra.mxu1 %v5029_v38 }
 0xaa7   :  { %2461 = vmatprep.subr.bf16.mxu0 %v5035_v40  ;;  %2502 = vmatprep.subr.bf16.mxu1 %v5037_v42 }
 0xaaa   :  { %2462 = vmatpush1.bf16.msra.mxu0 %v5039_v43  ;;  %2503 = vmatpush1.bf16.msra.mxu1 %v5041_v44 }
 0xaab   :  { %2463 = vmatprep.subr.bf16.mxu0 %v5047_v45  ;;  %2504 = vmatprep.subr.bf16.mxu1 %v5049_v46 }
 0xaae   :  { %2464 = vmatpush1.bf16.msra.mxu0 %v5051_v47  ;;  %2505 = vmatpush1.bf16.msra.mxu1 %v5053_v50 }
 0xaaf   :  { %2465 = vmatprep.subr.bf16.mxu0 %v5059_v33  ;;  %2506 = vmatprep.subr.bf16.mxu1 %v5061_v35 }
 0xab2   :  { %2466 = vmatpush1.bf16.msra.mxu0 %v5063_v36  ;;  %2507 = vmatpush1.bf16.msra.mxu1 %v5065_v60 }
 0xab3   :  { %2467 = vmatprep.subr.bf16.mxu0 %v5071_v1  ;;  %2508 = vmatprep.subr.bf16.mxu1 %v5073_v2 }
 0xab6   :  { %2468 = vmatpush1.bf16.msra.mxu0 %v5075_v3  ;;  %2509 = vmatpush1.bf16.msra.mxu1 %v5077_v21 }
 0xab7   :  { %2568 = vmatprep.subr.bf16.mxu0 %v4987_v15  ;;  %2609 = vmatprep.subr.bf16.mxu1 %v4989_v49 }
 0xb6c   :  { %v2372_v22 = vpop.f32.mrb[72].mxu0  ;;  %v2413_v30 = vpop.f32.mrb[72].mxu1 }
 0xb6d   :  { %v2420_v16 = vadd.f32 %v2372_v22, %v1779_v55  ;;  %v2422_v56 = vadd.f32 %v2413_v30, %v1852_v62  ;;  %v2374_v26 = vpop.f32.mrb[73].mxu0  ;;  %v2415_v51 = vpop.f32.mrb[73].mxu1 }
 0xb6e   :  { %v2421_v29 = vadd.f32 %v2374_v26, %v1781_v48  ;;  %v2423_v53 = vadd.f32 %v2415_v51, %v1854_v58  ;;  %v2376_v25 = vpop.f32.mrb[74].mxu0  ;;  %v2417_v52 = vpop.f32.mrb[74].mxu1 }
 0xb6f   :  { %v3467_v34 = vmul.f32 -1.442695, %v2420_v16  ;;  %v2377_v0 = vpop.f32.mrb[75].mxu0  ;;  %v2418_v57 = vpop.f32.mrb[75].mxu1  ;;  %v5778_v25 = vld [vmem:[#allocation24_spill] sm:$0xff] }
 0xb70   :  { %v3468_v31 = vmul.f32 -1.442695, %v2421_v29  ;;  %v3469_v5 = vmul.f32 -1.442695, %v2423_v53  ;;  %v5777_v29 = vld [vmem:[#allocation23_spill] sm:$0xff]  ;;  %v1785_v52 = vadd.f32 %v5778_v25, %v5206_v6 }
 0xb71   :  { %3894 = vpow2.f32 %v3467_v34  ;;  %v1856_v53 = vadd.f32 %v5777_v29, %v5198_v24  ;;  %v5779_v34 = vld [vmem:[#allocation27_spill] sm:$0xff] }
 0xb72   :  { %3896 = vpow2.f32 %v3468_v31  ;;  %v1858_v0 = vadd.f32 %v5779_v34, %v5210_v8 }
 0xb73   :  { %3898 = vpow2.f32 %v3469_v5 }
 0xb74   :  { %3900 = vtanh.f32 %v2422_v56 }
 0xb7b   :  { %v3895_v9 = vpop.eup %3894 }
 0xb7c   :  { %v3897_v10 = vpop.eup %3896  ;;  %v2427_v23 = vadd.f32 1.0, %v3895_v9 }
 0xb7d   :  { %v2433_v63 = vadd.f32 1.0, %v3897_v10  ;;  %v3899_v55 = vpop.eup %3898 }
 0xb7e   :  { %3902 = vrcp.f32 %v2427_v23  ;;  %v3901_v61 = vpop.eup %3900  ;;  %v2440_v18 = vadd.f32 1.0, %v3899_v55 }
 0xb7f   :  { %3904 = vrcp.f32 %v2433_v63 }
 0xb80   :  { %3906 = vrcp.f32 %v2440_v18 }
 0xb88   :  { %v3903_v62 = vpop.eup %3902 }
 0xb89   :  { %v3905_v39 = vpop.eup %3904  ;;  %v2444_v48 = vmul.f32 %v3903_v62, %v3901_v61 }
 0xb8a   :  { %v2443_v58 = vmul.f32 %v3905_v39, %v5266_v7  ;;  %v3907_v30 = vpop.eup %3906  ;;  %v5776_v7 = vld [vmem:[#allocation20_spill] sm:$0xff] }
 0xb8b   :  { %v1783_v51 = vadd.f32 %v5776_v7, %v5194_v28 }
 0xb8c   :  { %v5312_v22 = vadd.f32 %v2444_v48, %v2443_v58 }
 0xb8e   :  { %3908 = vtanh.f32 %v5312_v22 }
 0xb98   :  { %v3909_v16 = vpop.eup %3908 }
 0xb99   :  { %v2447_v26 = vmul.f32 %v3909_v16, %v3907_v30 }
 0xb9b   :  { %v2452_v56 = vpack.c.bf16 %v2447_v26, %v2447_v26 }
 0xb9d   :  { %2486 = vmatmul.mubr.bf16.vlgmr.msra.gmra.mrb[76].mxu0 %v2452_v56  ;;  %2527 = vmatmul.mubr.bf16.vlgmr.msra.gmra.mrb[76].mxu1 %v2452_v56 }
 0xb9e   :  { %2569 = vmatpush1.bf16.msra.mxu0 %v4991_v12  ;;  %2610 = vmatpush1.bf16.msra.mxu1 %v4993_v19 }
 0xb9f   :  { %2570 = vmatprep.subr.bf16.mxu0 %v4999_v11  ;;  %2611 = vmatprep.subr.bf16.mxu1 %v5001_v59 }
 0xba0   :  { %2600 = vmatprep.mubr.bf16.mxu0 %v5723_v41  ;;  %2641 = vmatprep.mubr.bf16.mxu1 %v5723_v41 }
 0xba2   :  { %2571 = vmatpush1.bf16.msra.mxu0 %v5003_v32  ;;  %2612 = vmatpush1.bf16.msra.mxu1 %v5005_v13 }
 0xba3   :  { %2572 = vmatprep.subr.bf16.mxu0 %v5011_v20  ;;  %2613 = vmatprep.subr.bf16.mxu1 %v5013_v17 }
 0xba6   :  { %2573 = vmatpush1.bf16.msra.mxu0 %v5015_v14  ;;  %2614 = vmatpush1.bf16.msra.mxu1 %v5017_v27 }
 0xba7   :  { %2574 = vmatprep.subr.bf16.mxu0 %v5023_v54  ;;  %2615 = vmatprep.subr.bf16.mxu1 %v5025_v37 }
 0xbaa   :  { %2575 = vmatpush1.bf16.msra.mxu0 %v5027_v4  ;;  %2616 = vmatpush1.bf16.msra.mxu1 %v5029_v38 }
 0xbab   :  { %2576 = vmatprep.subr.bf16.mxu0 %v5035_v40  ;;  %2617 = vmatprep.subr.bf16.mxu1 %v5037_v42 }
 0xbae   :  { %2577 = vmatpush1.bf16.msra.mxu0 %v5039_v43  ;;  %2618 = vmatpush1.bf16.msra.mxu1 %v5041_v44 }
 0xbaf   :  { %2578 = vmatprep.subr.bf16.mxu0 %v5047_v45  ;;  %2619 = vmatprep.subr.bf16.mxu1 %v5049_v46 }
 0xbb2   :  { %2579 = vmatpush1.bf16.msra.mxu0 %v5051_v47  ;;  %2620 = vmatpush1.bf16.msra.mxu1 %v5053_v50 }
 0xbb3   :  { %2580 = vmatprep.subr.bf16.mxu0 %v5059_v33  ;;  %2621 = vmatprep.subr.bf16.mxu1 %v5061_v35 }
 0xbb6   :  { %2581 = vmatpush1.bf16.msra.mxu0 %v5063_v36  ;;  %2622 = vmatpush1.bf16.msra.mxu1 %v5065_v60 }
 0xbb7   :  { %2582 = vmatprep.subr.bf16.mxu0 %v5071_v1  ;;  %2623 = vmatprep.subr.bf16.mxu1 %v5073_v2 }
 0xbba   :  { %2583 = vmatpush1.bf16.msra.mxu0 %v5075_v3  ;;  %2624 = vmatpush1.bf16.msra.mxu1 %v5077_v21 }
 0xbbb   :  { %2683 = vmatprep.subr.bf16.mxu0 %v4987_v15  ;;  %2724 = vmatprep.subr.bf16.mxu1 %v4989_v49 }
 0xc70   :  { %v2487_v57 = vpop.f32.mrb[76].mxu0  ;;  %v2528_v31 = vpop.f32.mrb[76].mxu1 }
 0xc71   :  { %v2535_v5 = vadd.f32 %v2487_v57, %v1783_v51  ;;  %v2537_v9 = vadd.f32 %v2528_v31, %v1856_v53  ;;  %v2489_v10 = vpop.f32.mrb[77].mxu0  ;;  %v2530_v23 = vpop.f32.mrb[77].mxu1 }
 0xc72   :  { %v2536_v63 = vadd.f32 %v2489_v10, %v1785_v52  ;;  %v2538_v55 = vadd.f32 %v2530_v23, %v1858_v0  ;;  %v2491_v61 = vpop.f32.mrb[78].mxu0  ;;  %v2532_v62 = vpop.f32.mrb[78].mxu1 }
 0xc73   :  { %v3470_v39 = vmul.f32 -1.442695, %v2535_v5  ;;  %v2492_v48 = vpop.f32.mrb[79].mxu0  ;;  %v2533_v18 = vpop.f32.mrb[79].mxu1 }
 0xc74   :  { %v3471_v58 = vmul.f32 -1.442695, %v2536_v63  ;;  %v3472_v30 = vmul.f32 -1.442695, %v2538_v55  ;;  %v5407_v48 = vld [vmem:[#allocation10] ss:$16 sps:$4 sm:$0xff]  }
 0xc75   :  { %3910 = vpow2.f32 %v3470_v39  ;;  %v5410_v18 = vld [vmem:[#allocation10 + $0x8] ss:$16 sps:$4 sm:$0xff]  }
 0xc76   :  { %3912 = vpow2.f32 %v3471_v58  ;;  %v5413_v58 = vld [vmem:[#allocation10 + $0x24] ss:$16 sps:$4 sm:$0xff]  }
 0xc77   :  { %3914 = vpow2.f32 %v3472_v30  ;;  %v5416_v30 = vld [vmem:[#allocation10 + $0x2c] ss:$16 sps:$4 sm:$0xff]  }
 0xc78   :  { %3916 = vtanh.f32 %v2537_v9 }
 0xc7f   :  { %v3911_v16 = vpop.eup %3910 }
 0xc80   :  { %v3913_v26 = vpop.eup %3912  ;;  %v2542_v56 = vadd.f32 1.0, %v3911_v16  ;;  %v5421_v16 = vld [vmem:[#allocation10 + $0x20] ss:$16 sps:$4 sm:$0xff]  }
 0xc81   :  { %v2548_v7 = vadd.f32 1.0, %v3913_v26  ;;  %v3915_v51 = vpop.eup %3914  ;;  %v5424_v26 = vld [vmem:[#allocation10 + $0x28] ss:$16 sps:$4 sm:$0xff]  }
 0xc82   :  { %3918 = vrcp.f32 %v2542_v56  ;;  %v3917_v29 = vpop.eup %3916  ;;  %v2555_v34 = vadd.f32 1.0, %v3915_v51  ;;  %v5427_v56 = vld [vmem:[#allocation10 + $0x44] ss:$16 sps:$4 sm:$0xff]   ;;  %v5433_v51 = vld [vmem:[#allocation10 + $0x40] ss:$16 sps:$4 sm:$0xff]  }
 0xc83   :  { %3920 = vrcp.f32 %v2548_v7  ;;  %v5430_v7 = vld [vmem:[#allocation10 + $0x4c] ss:$16 sps:$4 sm:$0xff]  }
 0xc84   :  { %3922 = vrcp.f32 %v2555_v34  ;;  %v5448_v34 = vld [vmem:[#allocation10 + $0x68] ss:$16 sps:$4 sm:$0xff]  }
 0xc8c   :  { %v3919_v53 = vpop.eup %3918 }
 0xc8d   :  { %v3921_v25 = vpop.eup %3920  ;;  %v2559_v52 = vmul.f32 %v3919_v53, %v3917_v29  ;;  %v5436_v29 = vld [vmem:[#allocation10 + $0x48] ss:$16 sps:$4 sm:$0xff]   ;;  %v5439_v53 = vld [vmem:[#allocation10 + $0x64] ss:$16 sps:$4 sm:$0xff]  }
 0xc8e   :  { %v2558_v0 = vmul.f32 %v3921_v25, %v5312_v22  ;;  %v3923_v31 = vpop.eup %3922  ;;  %v5442_v25 = vld [vmem:[#allocation10 + $0x6c] ss:$16 sps:$4 sm:$0xff]  }
 0xc90   :  { %v5358_v57 = vadd.f32 %v2559_v52, %v2558_v0  ;;  %v5445_v52 = vld [vmem:[#allocation10 + $0x60] ss:$16 sps:$4 sm:$0xff]   ;;  %v5451_v0 = vld [vmem:[#allocation10 + $0x84] ss:$16 sps:$4 sm:$0xff]  }
 0xc92   :  { %3924 = vtanh.f32 %v5358_v57 }
 0xc9c   :  { %v3925_v5 = vpop.eup %3924 }
 0xc9d   :  { %v2562_v10 = vmul.f32 %v3925_v5, %v3923_v31  ;;  %v5457_v31 = vld [vmem:[#allocation10 + $0x80] ss:$16 sps:$4 sm:$0xff]   ;;  %v5460_v5 = vld [vmem:[#allocation10 + $0x88] ss:$16 sps:$4 sm:$0xff]  }
 0xc9f   :  { %v2567_v9 = vpack.c.bf16 %v2562_v10, %v2562_v10  ;;  %v5463_v10 = vld [vmem:[#allocation10 + $0xa4] ss:$16 sps:$4 sm:$0xff]  }
 0xca1   :  { %2601 = vmatmul.mubr.bf16.vlgmr.msra.gmra.mrb[80].mxu0 %v2567_v9  ;;  %2642 = vmatmul.mubr.bf16.vlgmr.msra.gmra.mrb[80].mxu1 %v2567_v9  ;;  %v5466_v9 = vld [vmem:[#allocation10 + $0xac] ss:$16 sps:$4 sm:$0xff]  }
 0xca2   :  { %2684 = vmatpush1.bf16.msra.mxu0 %v4991_v12  ;;  %2725 = vmatpush1.bf16.msra.mxu1 %v4993_v19  ;;  %v5780_v12 = vld [vmem:[#allocation25_spill] sm:$0xff] }
 0xca3   :  { %2685 = vmatprep.subr.bf16.mxu0 %v4999_v11  ;;  %2726 = vmatprep.subr.bf16.mxu1 %v5001_v59  ;;  %v1789_v19 = vadd.f32 %v5780_v12, %v5194_v28  ;;  %v5781_v11 = vld [vmem:[#allocation29_spill] sm:$0xff]  ;;  %v5469_v12 = vld [vmem:[#allocation10 + $0xa0] ss:$16 sps:$4 sm:$0xff]  }
 0xca4   :  { %2715 = vmatprep.mubr.bf16.mxu0 %v5723_v41  ;;  %2756 = vmatprep.mubr.bf16.mxu1 %v5723_v41  ;;  %v1862_v59 = vadd.f32 %v5781_v11, %v5198_v24  ;;  %v5475_v11 = vld [vmem:[#allocation10 + $0xc4] ss:$16 sps:$4 sm:$0xff]  }
 0xca6   :  { %2686 = vmatpush1.bf16.msra.mxu0 %v5003_v32  ;;  %2727 = vmatpush1.bf16.msra.mxu1 %v5005_v13  ;;  %v5782_v32 = vld [vmem:[#allocation26_spill] sm:$0xff] }
 0xca7   :  { %2687 = vmatprep.subr.bf16.mxu0 %v5011_v20  ;;  %2728 = vmatprep.subr.bf16.mxu1 %v5013_v17  ;;  %v1791_v13 = vadd.f32 %v5782_v32, %v5206_v6  ;;  %v5783_v20 = vld [vmem:[#allocation30_spill] sm:$0xff] }
 0xca8   :  { %v1864_v17 = vadd.f32 %v5783_v20, %v5210_v8  ;;  %v5481_v32 = vld [vmem:[#allocation10 + $0xc0] ss:$16 sps:$4 sm:$0xff]   ;;  %v5487_v20 = vld [vmem:[#allocation10 + $0xe4] ss:$16 sps:$4 sm:$0xff]  }
 0xcaa   :  { %2688 = vmatpush1.bf16.msra.mxu0 %v5015_v14  ;;  %2729 = vmatpush1.bf16.msra.mxu1 %v5017_v27 }
 0xcab   :  { %2689 = vmatprep.subr.bf16.mxu0 %v5023_v54  ;;  %2730 = vmatprep.subr.bf16.mxu1 %v5025_v37 }
 0xcae   :  { %2690 = vmatpush1.bf16.msra.mxu0 %v5027_v4  ;;  %2731 = vmatpush1.bf16.msra.mxu1 %v5029_v38 }
 0xcaf   :  { %2691 = vmatprep.subr.bf16.mxu0 %v5035_v40  ;;  %2732 = vmatprep.subr.bf16.mxu1 %v5037_v42 }
 0xcb2   :  { %2692 = vmatpush1.bf16.msra.mxu0 %v5039_v43  ;;  %2733 = vmatpush1.bf16.msra.mxu1 %v5041_v44 }
 0xcb3   :  { %2693 = vmatprep.subr.bf16.mxu0 %v5047_v45  ;;  %2734 = vmatprep.subr.bf16.mxu1 %v5049_v46 }
 0xcb6   :  { %2694 = vmatpush1.bf16.msra.mxu0 %v5051_v47  ;;  %2735 = vmatpush1.bf16.msra.mxu1 %v5053_v50 }
 0xcb7   :  { %2695 = vmatprep.subr.bf16.mxu0 %v5059_v33  ;;  %2736 = vmatprep.subr.bf16.mxu1 %v5061_v35 }
 0xcba   :  { %2696 = vmatpush1.bf16.msra.mxu0 %v5063_v36  ;;  %2737 = vmatpush1.bf16.msra.mxu1 %v5065_v60 }
 0xcbb   :  { %2697 = vmatprep.subr.bf16.mxu0 %v5071_v1  ;;  %2738 = vmatprep.subr.bf16.mxu1 %v5073_v2 }
 0xcbe   :  { %2698 = vmatpush1.bf16.msra.mxu0 %v5075_v3  ;;  %2739 = vmatpush1.bf16.msra.mxu1 %v5077_v21 }
 0xcbf   :  { %2798 = vmatprep.subr.bf16.mxu0 %v4987_v15  ;;  %2839 = vmatprep.subr.bf16.mxu1 %v4989_v49 }
 0xd74   :  { %v2602_v14 = vpop.f32.mrb[80].mxu0  ;;  %v2643_v27 = vpop.f32.mrb[80].mxu1 }
 0xd75   :  { %v2650_v54 = vadd.f32 %v2602_v14, %v1789_v19  ;;  %v2652_v37 = vadd.f32 %v2643_v27, %v1862_v59  ;;  %v2604_v4 = vpop.f32.mrb[81].mxu0  ;;  %v2645_v15 = vpop.f32.mrb[81].mxu1  ;;  %v5472_v19 = vld [vmem:[#allocation10 + $0xa8] ss:$16 sps:$4 sm:$0xff]   ;;  %v5478_v59 = vld [vmem:[#allocation10 + $0xcc] ss:$16 sps:$4 sm:$0xff]  }
 0xd76   :  { %v2651_v38 = vadd.f32 %v2604_v4, %v1791_v13  ;;  %v2653_v49 = vadd.f32 %v2645_v15, %v1864_v17  ;;  %v2606_v40 = vpop.f32.mrb[82].mxu0  ;;  %v2647_v42 = vpop.f32.mrb[82].mxu1  ;;  %v5484_v13 = vld [vmem:[#allocation10 + $0xc8] ss:$16 sps:$4 sm:$0xff]   ;;  %v5490_v17 = vld [vmem:[#allocation10 + $0xec] ss:$16 sps:$4 sm:$0xff]  }
 0xd77   :  { %v3473_v43 = vmul.f32 -1.442695, %v2650_v54  ;;  %v2607_v44 = vpop.f32.mrb[83].mxu0  ;;  %v2648_v45 = vpop.f32.mrb[83].mxu1  ;;  %v5493_v14 = vld [vmem:[#allocation10 + $0xe0] ss:$16 sps:$4 sm:$0xff]  }
 0xd78   :  { %v3474_v46 = vmul.f32 -1.442695, %v2651_v38  ;;  %v3475_v47 = vmul.f32 -1.442695, %v2653_v49  ;;  %v5496_v27 = vld [vmem:[#allocation10 + $0xe8] ss:$16 sps:$4 sm:$0xff]  }
 0xd79   :  { %3926 = vpow2.f32 %v3473_v43  ;;  %v4056_v54 = vld [vmem:[#allocation10 + $0x4] ss:$16 sps:$4 sm:$0xff]   ;;  %v5785_v38 = vld [vmem:[#allocation31_spill] sm:$0xff] }
 0xd7a   :  { %3928 = vpow2.f32 %v3474_v46  ;;  %v5784_v4 = vld [vmem:[#allocation28_spill] sm:$0xff]  ;;  %v1866_v49 = vadd.f32 %v5785_v38, %v5198_v24  ;;  %v5787_v43 = vld [vmem:[#allocation35_spill] sm:$0xff] }
 0xd7b   :  { %3930 = vpow2.f32 %v3475_v47  ;;  %v1793_v15 = vadd.f32 %v5784_v4, %v5194_v28  ;;  %v5786_v40 = vld [vmem:[#allocation32_spill] sm:$0xff]  ;;  %v1868_v44 = vadd.f32 %v5787_v43, %v5210_v8 }
 0xd7c   :  { %3932 = vtanh.f32 %v2652_v37  ;;  %v4057_v37 = vld [vmem:[#allocation10 + $0xc] ss:$16 sps:$4 sm:$0xff]   ;;  %v1795_v42 = vadd.f32 %v5786_v40, %v5206_v6 }
 0xd83   :  { %v3927_v50 = vpop.eup %3926 }
 0xd84   :  { %v3929_v33 = vpop.eup %3928  ;;  %v2657_v35 = vadd.f32 1.0, %v3927_v50 }
 0xd85   :  { %v2663_v36 = vadd.f32 1.0, %v3929_v33  ;;  %v3931_v60 = vpop.eup %3930 }
 0xd86   :  { %3934 = vrcp.f32 %v2657_v35  ;;  %v3933_v1 = vpop.eup %3932  ;;  %v2670_v22 = vadd.f32 1.0, %v3931_v60 }
 0xd87   :  { %3936 = vrcp.f32 %v2663_v36 }
 0xd88   :  { %3938 = vrcp.f32 %v2670_v22 }
 0xd90   :  { %v3935_v2 = vpop.eup %3934 }
 0xd91   :  { %v3937_v3 = vpop.eup %3936  ;;  %v2674_v21 = vmul.f32 %v3935_v2, %v3933_v1 }
 0xd92   :  { %v2673_v23 = vmul.f32 %v3937_v3, %v5358_v57  ;;  %v3939_v55 = vpop.eup %3938  ;;  %v5454_v57 = vld [vmem:[#allocation10 + $0x8c] ss:$16 sps:$4 sm:$0xff]  }
 0xd94   :  { %v5404_v63 = vadd.f32 %v2674_v21, %v2673_v23 }
 0xd96   :  { %3940 = vtanh.f32 %v5404_v63 }
 0xda0   :  { %v3941_v61 = vpop.eup %3940 }
 0xda1   :  { %v2677_v62 = vmul.f32 %v3941_v61, %v3939_v55 }
 0xda3   :  { %v2682_v39 = vpack.c.bf16 %v2677_v62, %v2677_v62 }
 0xda5   :  { %2716 = vmatmul.mubr.bf16.vlgmr.msra.gmra.mrb[84].mxu0 %v2682_v39  ;;  %2757 = vmatmul.mubr.bf16.vlgmr.msra.gmra.mrb[84].mxu1 %v2682_v39 }
 0xda6   :  { %2799 = vmatpush1.bf16.msra.mxu0 %v5407_v48  ;;  %2840 = vmatpush1.bf16.msra.mxu1 %v5410_v18 }
 0xda7   :  { %2800 = vmatprep.subr.bf16.mxu0 %v5413_v58  ;;  %2841 = vmatprep.subr.bf16.mxu1 %v5416_v30 }
 0xda8   :  { %2830 = vmatprep.mubr.bf16.mxu0 %v5723_v41  ;;  %2871 = vmatprep.mubr.bf16.mxu1 %v5723_v41 }
 0xdaa   :  { %2801 = vmatpush1.bf16.msra.mxu0 %v5421_v16  ;;  %2842 = vmatpush1.bf16.msra.mxu1 %v5424_v26 }
 0xdab   :  { %2802 = vmatprep.subr.bf16.mxu0 %v5427_v56  ;;  %2843 = vmatprep.subr.bf16.mxu1 %v5430_v7 }
 0xdae   :  { %2803 = vmatpush1.bf16.msra.mxu0 %v5433_v51  ;;  %2844 = vmatpush1.bf16.msra.mxu1 %v5436_v29 }
 0xdaf   :  { %2804 = vmatprep.subr.bf16.mxu0 %v5439_v53  ;;  %2845 = vmatprep.subr.bf16.mxu1 %v5442_v25 }
 0xdb2   :  { %2805 = vmatpush1.bf16.msra.mxu0 %v5445_v52  ;;  %2846 = vmatpush1.bf16.msra.mxu1 %v5448_v34 }
 0xdb3   :  { %2806 = vmatprep.subr.bf16.mxu0 %v5451_v0  ;;  %2847 = vmatprep.subr.bf16.mxu1 %v5454_v57 }
 0xdb6   :  { %2807 = vmatpush1.bf16.msra.mxu0 %v5457_v31  ;;  %2848 = vmatpush1.bf16.msra.mxu1 %v5460_v5 }
 0xdb7   :  { %2808 = vmatprep.subr.bf16.mxu0 %v5463_v10  ;;  %2849 = vmatprep.subr.bf16.mxu1 %v5466_v9 }
 0xdba   :  { %2809 = vmatpush1.bf16.msra.mxu0 %v5469_v12  ;;  %2850 = vmatpush1.bf16.msra.mxu1 %v5472_v19 }
 0xdbb   :  { %2810 = vmatprep.subr.bf16.mxu0 %v5475_v11  ;;  %2851 = vmatprep.subr.bf16.mxu1 %v5478_v59 }
 0xdbe   :  { %2811 = vmatpush1.bf16.msra.mxu0 %v5481_v32  ;;  %2852 = vmatpush1.bf16.msra.mxu1 %v5484_v13 }
 0xdbf   :  { %2812 = vmatprep.subr.bf16.mxu0 %v5487_v20  ;;  %2853 = vmatprep.subr.bf16.mxu1 %v5490_v17 }
 0xdc2   :  { %2813 = vmatpush1.bf16.msra.mxu0 %v5493_v14  ;;  %2854 = vmatpush1.bf16.msra.mxu1 %v5496_v27 }
 0xdc3   :  { %2913 = vmatprep.subr.bf16.mxu0 %v4056_v54  ;;  %2954 = vmatprep.subr.bf16.mxu1 %v4057_v37 }
 0xe78   :  { %v2717_v45 = vpop.f32.mrb[84].mxu0  ;;  %v2758_v46 = vpop.f32.mrb[84].mxu1 }
 0xe79   :  { %v2765_v47 = vadd.f32 %v2717_v45, %v1793_v15  ;;  %v2767_v50 = vadd.f32 %v2758_v46, %v1866_v49  ;;  %v2719_v33 = vpop.f32.mrb[85].mxu0  ;;  %v2760_v35 = vpop.f32.mrb[85].mxu1 }
 0xe7a   :  { %v2766_v36 = vadd.f32 %v2719_v33, %v1795_v42  ;;  %v2768_v60 = vadd.f32 %v2760_v35, %v1868_v44  ;;  %v2721_v1 = vpop.f32.mrb[86].mxu0  ;;  %v2762_v2 = vpop.f32.mrb[86].mxu1 }
 0xe7b   :  { %v3476_v3 = vmul.f32 -1.442695, %v2765_v47  ;;  %v2722_v21 = vpop.f32.mrb[87].mxu0  ;;  %v2763_v22 = vpop.f32.mrb[87].mxu1 }
 0xe7c   :  { %v3477_v23 = vmul.f32 -1.442695, %v2766_v36  ;;  %v3478_v55 = vmul.f32 -1.442695, %v2768_v60  ;;  %v3070_v21 = vld [vmem:[%s5678_s9 + $0x8] sm:$0xff]  ;;  %v3071_v22 = vld [vmem:[%s5678_s9 + $0x10] sm:$0xff] }
 0xe7d   :  { %3942 = vpow2.f32 %v3476_v3  ;;  %v3069_v3 = vld [vmem:[%s5678_s9] sm:$0xff] }
 0xe7e   :  { %3944 = vpow2.f32 %v3477_v23  ;;  %v4183_v23 = vmov 0.0|0.0  }
 0xe7f   :  { %3946 = vpow2.f32 %v3478_v55  ;;  %v3552_v55 = vpack.c.bf16 %v3070_v21, %v3069_v3  ;;  %v5796_v3 = vld [vmem:[#allocation18_spill] sm:$0xff] }
 0xe80   :  { %3948 = vtanh.f32 %v2767_v50  ;;  %vm3029_vm3 = vcmp.lt.s32.totalorder %v5796_v3, 2 }
 0xe87   :  { %v3943_v61 = vpop.eup %3942 }
 0xe88   :  { %v3945_v62 = vpop.eup %3944  ;;  %v2772_v39 = vadd.f32 1.0, %v3943_v61  ;;  %v3072_v61 = vld [vmem:[%s5678_s9 + $0x18] sm:$0xff] }
 0xe89   :  { %v2778_v54 = vadd.f32 1.0, %v3945_v62  ;;  %v3947_v37 = vpop.eup %3946  ;;  %v4185_v62 = vmov 0.0  }
 0xe8a   :  { %3950 = vrcp.f32 %v2772_v39  ;;  %v3949_v4 = vpop.eup %3948  ;;  %v2785_v40 = vadd.f32 1.0, %v3947_v37  ;;  %v3555_v39 = vpack.c.bf16 %v3072_v61, %v3071_v22  ;;  %v3074_v37 = vld [vmem:[%s5678_s9 + $0x28] sm:$0xff] }
 0xe8b   :  { %3952 = vrcp.f32 %v2778_v54  ;;  %v3073_v54 = vld [vmem:[%s5678_s9 + $0x20] sm:$0xff] }
 0xe8c   :  { %3954 = vrcp.f32 %v2785_v40  ;;  %v3077_v40 = vld [vmem:[%s5678_s9 + $0x40] sm:$0xff] }
 0xe94   :  { %v3951_v15 = vpop.eup %3950 }
 0xe95   :  { %v3953_v38 = vpop.eup %3952  ;;  %v2789_v49 = vmul.f32 %v3951_v15, %v3949_v4  ;;  %v3558_v4 = vpack.c.bf16 %v3074_v37, %v3073_v54  ;;  %v3075_v15 = vld [vmem:[%s5678_s9 + $0x30] sm:$0xff] }
 0xe96   :  { %v2788_v42 = vmul.f32 %v3953_v38, %v5404_v63  ;;  %v3955_v44 = vpop.eup %3954  ;;  %v3076_v38 = vld [vmem:[%s5678_s9 + $0x38] sm:$0xff] }
 0xe98   :  { %v5508_v43 = vadd.f32 %v2789_v49, %v2788_v42  ;;  %v3561_v49 = vpack.c.bf16 %v3076_v38, %v3075_v15  ;;  %v3078_v42 = vld [vmem:[%s5678_s9 + $0x48] sm:$0xff] }
 0xe9a   :  { %3956 = vtanh.f32 %v5508_v43 }
 0xea4   :  { %v3957_v45 = vpop.eup %3956 }
 0xea5   :  { %v2792_v46 = vmul.f32 %v3957_v45, %v3955_v44  ;;  %v3079_v44 = vld [vmem:[%s5678_s9 + $0x50] sm:$0xff]  ;;  %v3080_v45 = vld [vmem:[%s5678_s9 + $0x58] sm:$0xff] }
 0xea7   :  { %v2797_v47 = vpack.c.bf16 %v2792_v46, %v2792_v46  ;;  %v3567_v46 = vpack.c.bf16 %v3080_v45, %v3079_v44 }
 0xea9   :  { %2831 = vmatmul.mubr.bf16.vlgmr.msra.gmra.mrb[88].mxu0 %v2797_v47  ;;  %2872 = vmatmul.mubr.bf16.vlgmr.msra.gmra.mrb[88].mxu1 %v2797_v47  ;;  %v3081_v47 = vld [vmem:[%s5678_s9 + $0x60] sm:$0xff] }
 0xeaa   :  { %2914 = vmatpush1.bf16.msra.mxu0 %v5407_v48  ;;  %2955 = vmatpush1.bf16.msra.mxu1 %v5410_v18  ;;  %v5789_v48 = vld [vmem:[#allocation37_spill] sm:$0xff] }
 0xeab   :  { %2915 = vmatprep.subr.bf16.mxu0 %v5413_v58  ;;  %2956 = vmatprep.subr.bf16.mxu1 %v5416_v30  ;;  %v1872_v18 = vadd.f32 %v5789_v48, %v5198_v24  ;;  %v5790_v58 = vld [vmem:[#allocation34_spill] sm:$0xff]  ;;  %v3083_v48 = vld [vmem:[%s5678_s9 + $0x70] sm:$0xff] }
 0xeac   :  { %2945 = vmatprep.mubr.bf16.mxu0 %v5723_v41  ;;  %2986 = vmatprep.mubr.bf16.mxu1 %v5723_v41  ;;  %v5788_v41 = vld [vmem:[#allocation33_spill] sm:$0xff]  ;;  %v1801_v30 = vadd.f32 %v5790_v58, %v5206_v6 }
 0xead   :  { %v1799_v63 = vadd.f32 %v5788_v41, %v5194_v28  ;;  %v3082_v41 = vld [vmem:[%s5678_s9 + $0x68] sm:$0xff] }
 0xeae   :  { %2916 = vmatpush1.bf16.msra.mxu0 %v5421_v16  ;;  %2957 = vmatpush1.bf16.msra.mxu1 %v5424_v26  ;;  %v5791_v16 = vld [vmem:[#allocation38_spill] sm:$0xff] }
 0xeaf   :  { %2917 = vmatprep.subr.bf16.mxu0 %v5427_v56  ;;  %2958 = vmatprep.subr.bf16.mxu1 %v5430_v7  ;;  %v1874_v26 = vadd.f32 %v5791_v16, %v5210_v8 }
 0xeb2   :  { %2918 = vmatpush1.bf16.msra.mxu0 %v5433_v51  ;;  %2959 = vmatpush1.bf16.msra.mxu1 %v5436_v29 }
 0xeb3   :  { %2919 = vmatprep.subr.bf16.mxu0 %v5439_v53  ;;  %2960 = vmatprep.subr.bf16.mxu1 %v5442_v25 }
 0xeb6   :  { %2920 = vmatpush1.bf16.msra.mxu0 %v5445_v52  ;;  %2961 = vmatpush1.bf16.msra.mxu1 %v5448_v34 }
 0xeb7   :  { %2921 = vmatprep.subr.bf16.mxu0 %v5451_v0  ;;  %2962 = vmatprep.subr.bf16.mxu1 %v5454_v57 }
 0xeba   :  { %2922 = vmatpush1.bf16.msra.mxu0 %v5457_v31  ;;  %2963 = vmatpush1.bf16.msra.mxu1 %v5460_v5 }
 0xebb   :  { %2923 = vmatprep.subr.bf16.mxu0 %v5463_v10  ;;  %2964 = vmatprep.subr.bf16.mxu1 %v5466_v9 }
 0xebe   :  { %2924 = vmatpush1.bf16.msra.mxu0 %v5469_v12  ;;  %2965 = vmatpush1.bf16.msra.mxu1 %v5472_v19 }
 0xebf   :  { %2925 = vmatprep.subr.bf16.mxu0 %v5475_v11  ;;  %2966 = vmatprep.subr.bf16.mxu1 %v5478_v59 }
 0xec2   :  { %2926 = vmatpush1.bf16.msra.mxu0 %v5481_v32  ;;  %2967 = vmatpush1.bf16.msra.mxu1 %v5484_v13 }
 0xec3   :  { %2927 = vmatprep.subr.bf16.mxu0 %v5487_v20  ;;  %2968 = vmatprep.subr.bf16.mxu1 %v5490_v17 }
 0xec6   :  { %2928 = vmatpush1.bf16.msra.mxu0 %v5493_v14  ;;  %2969 = vmatpush1.bf16.msra.mxu1 %v5496_v27 }
 0xec7   :  { %3551 = vmatprep.subr.bf16.mxu0 %v4183_v23  ;;  %3546 = vmatprep.subr.mxu1 %v4185_v62 }
 0xf7c   :  { %v2832_v56 = vpop.f32.mrb[88].mxu0  ;;  %v2873_v7 = vpop.f32.mrb[88].mxu1 }
 0xf7d   :  { %v2880_v51 = vadd.f32 %v2832_v56, %v1799_v63  ;;  %v2882_v29 = vadd.f32 %v2873_v7, %v1872_v18  ;;  %v2834_v53 = vpop.f32.mrb[89].mxu0  ;;  %v2875_v25 = vpop.f32.mrb[89].mxu1  ;;  %v3570_v63 = vpack.c.bf16 %v3082_v41, %v3081_v47  ;;  %v3084_v18 = vld [vmem:[%s5678_s9 + $0x78] sm:$0xff]  ;;  %v3485_v41 = vld [vmem:[%s5676_s7] ss:$0 sm:$0xff] }
 0xf7e   :  { %v2881_v52 = vadd.f32 %v2834_v53, %v1801_v30  ;;  %v2883_v34 = vadd.f32 %v2875_v25, %v1874_v26  ;;  %v2836_v0 = vpop.f32.mrb[90].mxu0  ;;  %v2877_v57 = vpop.f32.mrb[90].mxu1  ;;  %v3573_v58 = vpack.c.bf16 %v3084_v18, %v3083_v48  ;;  %v5792_v30 = vld [vmem:[#allocation36_spill] sm:$0xff]  ;;  %v5793_v26 = vld [vmem:[#allocation39_spill] sm:$0xff]  ;;  %v3486_v48 = vld [vmem:[%s5677_s8] ss:$0 sm:$0xff] }
 0xf7f   :  { %v3479_v31 = vmul.f32 -1.442695, %v2880_v51  ;;  %v2837_v5 = vpop.f32.mrb[91].mxu0  ;;  %v2878_v10 = vpop.f32.mrb[91].mxu1  ;;  %v1803_v16 = vadd.f32 %v5792_v30, %v5194_v28  ;;  %v1876_v56 = vadd.f32 %v5793_v26, %v5198_v24  ;;  %v5794_v7 = vld [vmem:[#allocation40_spill] sm:$0xff]  ;;  %v3203_v30 = vld [vmem:[%s5682_s13] sm:$0xff] }
 0xf80   :  { %v3480_v9 = vmul.f32 -1.442695, %v2881_v52  ;;  %v3481_v12 = vmul.f32 -1.442695, %v2883_v34  ;;  %v1805_v51 = vadd.f32 %v5794_v7, %v5206_v6 }
 0xf81   :  { %3958 = vpow2.f32 %v3479_v31 }
 0xf82   :  { %3960 = vpow2.f32 %v3480_v9 }
 0xf83   :  { %3962 = vpow2.f32 %v3481_v12 }
 0xf84   :  { %3964 = vtanh.f32 %v2882_v29  ;;  %v5795_v29 = vld [vmem:[#allocation41_spill] sm:$0xff] }
 0xf85   :  { %v1878_v53 = vadd.f32 %v5795_v29, %v5210_v8 }
 0xf8b   :  { %v3959_v19 = vpop.eup %3958 }
 0xf8c   :  { %v3961_v11 = vpop.eup %3960  ;;  %v2887_v59 = vadd.f32 1.0, %v3959_v19 }
 0xf8d   :  { %v2893_v32 = vadd.f32 1.0, %v3961_v11  ;;  %v3963_v13 = vpop.eup %3962 }
 0xf8e   :  { %3966 = vrcp.f32 %v2887_v59  ;;  %v3965_v20 = vpop.eup %3964  ;;  %v2900_v50 = vadd.f32 1.0, %v3963_v13 }
 0xf8f   :  { %3968 = vrcp.f32 %v2893_v32 }
 0xf90   :  { %3970 = vrcp.f32 %v2900_v50 }
 0xf98   :  { %v3967_v17 = vpop.eup %3966 }
 0xf99   :  { %v3969_v14 = vpop.eup %3968  ;;  %v2904_v27 = vmul.f32 %v3967_v17, %v3965_v20 }
 0xf9a   :  { %v2903_v33 = vmul.f32 %v3969_v14, %v5508_v43  ;;  %v3971_v36 = vpop.eup %3970  ;;  %v3564_v43 = vpack.c.bf16 %v3078_v42, %v3077_v40 }
 0xf9c   :  { %v5552_v35 = vadd.f32 %v2904_v27, %v2903_v33 }
 0xf9e   :  { %3972 = vtanh.f32 %v5552_v35 }
 0xfa8   :  { %v3973_v60 = vpop.eup %3972 }
 0xfa9   :  { %v2907_v1 = vmul.f32 %v3973_v60, %v3971_v36 }
 0xfab   :  { %v2912_v2 = vpack.c.bf16 %v2907_v1, %v2907_v1 }
 0xfad   :  { %2946 = vmatmul.mubr.bf16.vlgmr.msra.gmra.mrb[92].mxu0 %v2912_v2  ;;  %2987 = vmatmul.mubr.bf16.vlgmr.msra.gmra.mrb[92].mxu1 %v2912_v2 }
 0xfae   :  { %3543 = vmatprep.mubr.msk.f32.mxu0 %vm4184_vm2, %v4185_v62  ;;  %3548 = vmatprep.mubr.msk.f32.mxu1 %vm4184_vm2, %v4185_v62 }
 0xfaf   :  { %3553 = vmatpush3.bf16.msra.mxu0 %v3552_v55  ;;  %3547 = vmatpush3.msra.mxu1 %v3203_v30 }
 0xfb0   :  { %3554 = vmatprep.subr.bf16.mxu0 %v4183_v23 }
 0xfb3   :  { %3556 = vmatpush3.bf16.msra.mxu0 %v3555_v39 }
 0xfb4   :  { %3557 = vmatprep.subr.bf16.mxu0 %v4183_v23 }
 0xfb7   :  { %3559 = vmatpush3.bf16.msra.mxu0 %v3558_v4 }
 0xfb8   :  { %3560 = vmatprep.subr.bf16.mxu0 %v4183_v23 }
 0xfbb   :  { %3562 = vmatpush3.bf16.msra.mxu0 %v3561_v49 }
 0xfbc   :  { %3563 = vmatprep.subr.bf16.mxu0 %v4183_v23 }
 0xfbf   :  { %3565 = vmatpush3.bf16.msra.mxu0 %v3564_v43 }
 0xfc0   :  { %3566 = vmatprep.subr.bf16.mxu0 %v4183_v23 }
 0xfc3   :  { %3568 = vmatpush3.bf16.msra.mxu0 %v3567_v46 }
 0xfc4   :  { %3569 = vmatprep.subr.bf16.mxu0 %v4183_v23 }
 0xfc7   :  { %3571 = vmatpush3.bf16.msra.mxu0 %v3570_v63 }
 0xfc8   :  { %3572 = vmatprep.subr.bf16.mxu0 %v4183_v23 }
 0xfcb   :  { %3574 = vmatpush3.bf16.msra.mxu0 %v3573_v58 }
0x1080   :  { %v2947_v25 = vpop.f32.mrb[92].mxu0  ;;  %v2988_v52 = vpop.f32.mrb[92].mxu1 }
0x1081   :  { %v2995_v34 = vadd.f32 %v2947_v25, %v1803_v16  ;;  %v2997_v0 = vadd.f32 %v2988_v52, %v1876_v56  ;;  %v2949_v57 = vpop.f32.mrb[93].mxu0  ;;  %v2990_v31 = vpop.f32.mrb[93].mxu1  ;;  %v3487_v16 = vld [vmem:[%s5679_s10] ss:$0 sm:$0xff] }
0x1082   :  { %v2996_v5 = vadd.f32 %v2949_v57, %v1805_v51  ;;  %v2998_v10 = vadd.f32 %v2990_v31, %v1878_v53  ;;  %v2951_v9 = vpop.f32.mrb[94].mxu0  ;;  %v2992_v12 = vpop.f32.mrb[94].mxu1 }
0x1083   :  { %v3482_v28 = vmul.f32 -1.442695, %v2995_v34  ;;  %v2952_v19 = vpop.f32.mrb[95].mxu0  ;;  %v2993_v11 = vpop.f32.mrb[95].mxu1 }
0x1084   :  { %v3483_v24 = vmul.f32 -1.442695, %v2996_v5  ;;  %v3484_v6 = vmul.f32 -1.442695, %v2998_v10 }
0x1085   :  { %3974 = vpow2.f32 %v3482_v28 }
0x1086   :  { %3976 = vpow2.f32 %v3483_v24 }
0x1087   :  { %3978 = vpow2.f32 %v3484_v6 }
0x1088   :  { %3980 = vtanh.f32 %v2997_v0 }
0x108f   :  { %v3975_v59 = vpop.eup %3974 }
0x1090   :  { %v3977_v32 = vpop.eup %3976  ;;  %v3002_v8 = vadd.f32 1.0, %v3975_v59 }
0x1091   :  { %v3008_v13 = vadd.f32 1.0, %v3977_v32  ;;  %v3979_v20 = vpop.eup %3978 }
0x1092   :  { %3982 = vrcp.f32 %v3002_v8  ;;  %v3981_v17 = vpop.eup %3980  ;;  %v3015_v33 = vadd.f32 1.0, %v3979_v20 }
0x1093   :  { %3984 = vrcp.f32 %v3008_v13 }
0x1094   :  { %3986 = vrcp.f32 %v3015_v33 }
0x109c   :  { %v3983_v14 = vpop.eup %3982 }
0x109d   :  { %v3985_v27 = vpop.eup %3984  ;;  %v3019_v50 = vmul.f32 %v3983_v14, %v3981_v17  ;;  %v3488_v17 = vld [vmem:[%s5680_s11] ss:$0 sm:$0xff] }
0x109e   :  { %v3018_v36 = vmul.f32 %v3985_v27, %v5552_v35  ;;  %v3987_v1 = vpop.eup %3986  ;;  %v3489_v27 = vld [vmem:[%s5681_s12] ss:$0 sm:$0xff] }
0x10a0   :  { %v3020_v60 = vadd.f32 %v3019_v50, %v3018_v36 }
0x10a2   :  { %3988 = vtanh.f32 %v3020_v60  ;;  %3026 = vst [vmem:[#allocation12 + $0x8] sm:$0xff] %v3020_v60 }
0x10ac   :  { %v3989_v2 = vpop.eup %3988 }
0x10ad   :  { %v3022_v21 = vmul.f32 %v3989_v2, %v3987_v1 }
0x10af   :  { %3024 = vst [vmem:[#allocation11 + $0x8] sm:$0xff] %v3022_v21  ;;  %v3032_v22 = vsel %vm3029_vm3, %v3022_v21, 0.0 }
0x10b0   :  { %v3033_v23 = vrot.slane %v3032_v22, 4 }
0x10b2   :  { %v3034_v55 = vadd.f32 %v3033_v23, %v3032_v22 }
0x10b4   :  { %v3035_v61 = vrot.slane %v3034_v55, 2 }
0x10b6   :  { %v3036_v62 = vadd.f32 %v3035_v61, %v3034_v55 }
0x10b8   :  { %v3037_v39 = vrot.slane %v3036_v62, 1 }
0x10ba   :  { %v3038_v54 = vadd.f32 %v3037_v39, %v3036_v62 }
0x10bc   :  { %v3039_v35 = vmul.f32 0.5, %v3038_v54 }
0x10be   :  { %v3040_v37 = vsub.f32 %v3022_v21, %v3039_v35 }
0x10c0   :  { %v3041_v4 = vsel %vm3029_vm3, %v3040_v37, 0.0 }
0x10c1   :  { %v3042_v15 = vmul.f32 %v3041_v4, %v3041_v4 }
0x10c3   :  { %v3043_v38 = vrot.slane %v3042_v15, 4 }
0x10c5   :  { %v3044_v49 = vadd.f32 %v3043_v38, %v3042_v15 }
0x10c7   :  { %v3045_v40 = vrot.slane %v3044_v49, 2 }
0x10c9   :  { %v3046_v42 = vadd.f32 %v3045_v40, %v3044_v49 }
0x10cb   :  { %v3047_v43 = vrot.slane %v3046_v42, 1 }
0x10cd   :  { %v3048_v44 = vadd.f32 %v3047_v43, %v3046_v42 }
0x10cf   :  { %v3049_v45 = vmul.f32 0.5, %v3048_v44 }
0x10d1   :  { %v3050_v46 = vadd.f32 1e-05, %v3049_v45 }
0x10d3   :  { %3990 = vrsqrt.f32 %v3050_v46 }
0x10dd   :  { %v3991_v47 = vpop.eup %3990 }
0x10de   :  { %v3052_v63 = vmul.f32 %v3991_v47, %v3040_v37 }
0x10e0   :  { %v3060_v18 = vmul.f32 %v3485_v41, %v3052_v63 }
0x10e2   :  { %v3068_v58 = vadd.f32 %v3486_v48, %v3060_v18 }
0x10e4   :  { %3544 = vmatmul.mubr.f32.vlgmr.msra.gmra.mrb[96].mxu0 %v3068_v58 }
0x11b7   :  { %v3158_v26 = vpop.f32.mrb[96].mxu0 }
0x11b8   :  { %v3159_v56 = vadd.f32 %v3487_v16, %v3158_v26  ;;  %v3545_v7 = vpop.f32.mrb[97].mxu0 }
0x11ba   :  { %v3162_v51 = vmax.f32 %v3159_v56, 0.0 }
0x11bc   :  { %v3163_v29 = vsel %vm3029_vm3, %v3162_v51, 0.0 }
0x11bd   :  { %v3165_v53 = vsel %vm3164_vm4, %v3163_v29, 0.0 }
0x11be   :  { %v3166_v25 = vrot.slane %v3165_v53, 4 }
0x11c0   :  { %v3167_v52 = vadd.f32 %v3166_v25, %v3165_v53 }
0x11c2   :  { %v3168_v34 = vrot.slane %v3167_v52, 2 }
0x11c4   :  { %v3169_v0 = vadd.f32 %v3168_v34, %v3167_v52 }
0x11c6   :  { %v3170_v57 = vrot.slane %v3169_v0, 1 }
0x11c8   :  { %v3171_v31 = vadd.f32 %v3170_v57, %v3169_v0 }
0x11ca   :  { %v3172_v5 = vmul.f32 0.5, %v3171_v31 }
0x11cc   :  { %v3173_v10 = vsub.f32 %v3162_v51, %v3172_v5 }
0x11ce   :  { %v3174_v9 = vsel %vm3029_vm3, %v3173_v10, 0.0 }
0x11cf   :  { %v3175_v12 = vmul.f32 %v3174_v9, %v3174_v9 }
0x11d1   :  { %v3176_v28 = vsel %vm3164_vm4, %v3175_v12, 0.0 }
0x11d2   :  { %v3177_v19 = vrot.slane %v3176_v28, 4 }
0x11d4   :  { %v3178_v11 = vadd.f32 %v3177_v19, %v3176_v28 }
0x11d6   :  { %v3179_v24 = vrot.slane %v3178_v11, 2 }
0x11d8   :  { %v3180_v6 = vadd.f32 %v3179_v24, %v3178_v11 }
0x11da   :  { %v3181_v59 = vrot.slane %v3180_v6, 1 }
0x11dc   :  { %v3182_v32 = vadd.f32 %v3181_v59, %v3180_v6 }
0x11de   :  { %v3183_v8 = vmul.f32 0.5, %v3182_v32 }
0x11e0   :  { %v3184_v13 = vadd.f32 1e-05, %v3183_v8 }
0x11e2   :  { %3992 = vrsqrt.f32 %v3184_v13 }
0x11ec   :  { %v3993_v20 = vpop.eup %3992 }
0x11ed   :  { %v3186_v14 = vmul.f32 %v3993_v20, %v3173_v10 }
0x11ef   :  { %v3194_v50 = vmul.f32 %v3488_v17, %v3186_v14 }
0x11f1   :  { %v3202_v33 = vadd.f32 %v3489_v27, %v3194_v50 }
0x11f3   :  { %3549 = vmatmul.mubr.msk.f32.vlgmr.msra.gmra.mrb[96].mxu1 %vm3164_vm4, %v3202_v33 }
0x11f4   :  { %4135 = shalt.err (!%p4132_p0)
}
0x11f5   :  { %s4136_s23 = scalar_lea.hbm %s5685_s16, 256 }
0x11f6   :  { %p4137_p1 = scmp.ne.s32.totalorder %s5685_s16, %s4136_s23  ;;  %p4140_p2 = scmp.lt.u32.totalorder %s4136_s23, %s5685_s16 }
0x11f8   :  { %p4142_p3 = pnand %p4140_p2, %p4137_p1 }
0x11fa   :  { %4145 = shalt.err (!%p4142_p3)
}
0x11fb   :  { %s4187_s21 = smov 128   ;;  %s4188_s24 = smov 8  }
0x11fc   :  { %3299 = dma.vmem_to_hbm [thread:$0]  %s3294_s3, 256, %s5685_s16, [#allocation7], %s4187_s21, %s4187_s21, %s4188_s24  }
0x11fd   :  { %s4189_s28 = smov [#allocation12]  }
0x11fe   :  { %s3305_s0 = sshll.u32 %s4189_s28, 4  ;;  %s3306_s0 = int_to_ptr.vmem [resolvable:$true] %s3305_s0 }
0x11ff   :  { %s4146_s9 = scalar_lea.vmem %s3306_s0, 256  ;;  %p4151_p5 = scmp.lt.s32.totalorder %s3306_s0, %s3306_s0 }
0x1200   :  { %p4147_p4 = scmp.ne.s32.totalorder %s3306_s0, %s4146_s9  ;;  %p4152_p6 = scmp.lt.s32.totalorder %s4146_s9, %s4146_s9 }
0x1202   :  { %p4153_p7 = por %p4152_p6, %p4151_p5 }
0x1204   :  { %p4154_p8 = pnand %p4153_p7, %p4147_p4 }
0x1206   :  { %4157 = shalt.err (!%p4154_p8)
}
0x1207   :  { %s4158_s19 = scalar_lea.hbm %s5686_s17, 256 }
0x1208   :  { %p4159_p9 = scmp.ne.s32.totalorder %s5686_s17, %s4158_s19  ;;  %p4162_p10 = scmp.lt.u32.totalorder %s4158_s19, %s5686_s17 }
0x120a   :  { %p4164_p11 = pnand %p4162_p10, %p4159_p9 }
0x120c   :  { %4167 = shalt.err (!%p4164_p11)
}
0x120d   :  { %3311 = dma.vmem_to_hbm [thread:$0]  %s3306_s0, 256, %s5686_s17, [#allocation13], %s4187_s21, %s4187_s21, %s4188_s24   ;;  %v3490_v36 = vld [vmem:[#allocation4] ss:$0 sm:$0xff]  ;;  %vm3284_vm5 = vcmask 7168  }
0x12c6   :  { %v3280_v60 = vpop.f32.mrb[96].mxu1 }
0x12c7   :  { %v3281_v1 = vadd.f32 %v3490_v36, %v3280_v60  ;;  %v3550_v2 = vpop.f32.mrb[97].mxu1 }
0x12c9   :  { %3285 = vst.msk [vmem:[%s5684_s15] sm:$0xff] %vm3284_vm5, %v3281_v1 }
0x12ca   :  { %4172 = dma.done.wait [#allocation7], 256  }
0x12cb   :  { %4173 = vsyncadd [#allocation7], 4294967040 }
0x12cc   :  { %4174 = dma.done.wait [#allocation13], 256  }
0x12cd   :  { %4175 = vsyncadd [#allocation13], 4294967040 }
0x12ce   :  { %3320 = vsyncpa [#allocation6], 1 }
0x12cf   :  { %3321 = vsyncpa [#allocation9], 1 }
0x12d0   :  { %3322 = vsyncpa [#allocation7], 1 }
0x12d1   :  { %3323 = vsyncpa [#allocation13], 1 }

</bundles_post_ra>
